<compile_context>
chip_gen: v6e
topology: v6e:2x2x1
jax: 0.10.0
libtpu: 0.0.40
codegen_flags: <defaults>
</compile_context>

<pallas_src>
import jax
import jax.numpy as jnp
import numpy as np
from jax import lax
from jax.experimental import pallas as pl
from jax.experimental.pallas import tpu as pltpu

EPS = 1e-5


# ---------------------------------------------------------------------------
# ConvTranspose3d, kernel_size=2, stride=2: one matmul per input voxel
# (Cin -> 8*Cout), bf16 operands, f32 accumulation.  Grid = (N, D).
# ---------------------------------------------------------------------------
def _convt_kernel(x_ref, w_ref, b_ref, o_ref):
    # x_ref: (1,1,H*W,Cin) bf16   w_ref: (Cin, 8*Co) bf16   b_ref: (1, 8*Co) f32
    y = jnp.dot(x_ref[0, 0], w_ref[...], preferred_element_type=jnp.float32)
    o_ref[0, 0] = (y + b_ref[...]).astype(o_ref.dtype)


def conv_transpose3d_k2s2(x_ncdhw, wt8, bt8):
    # x_ncdhw: (N, Cin, D, H, W); wt8: (Cin, 8*Co) bf16; bt8: (1, 8*Co) f32
    N, Cin, D, H, W = x_ncdhw.shape
    Co8 = wt8.shape[1]
    Co = Co8 // 8
    x2 = jnp.transpose(x_ncdhw, (0, 2, 3, 4, 1)).reshape(N, D, H * W, Cin)
    x2 = x2.astype(jnp.bfloat16)
    y = pl.pallas_call(
        _convt_kernel,
        grid=(N, D),
        in_specs=[
            pl.BlockSpec((1, 1, H * W, Cin), lambda n, d: (n, d, 0, 0)),
            pl.BlockSpec((Cin, Co8), lambda n, d: (0, 0)),
            pl.BlockSpec((1, Co8), lambda n, d: (0, 0)),
        ],
        out_specs=pl.BlockSpec((1, 1, H * W, Co8), lambda n, d: (n, d, 0, 0)),
        out_shape=jax.ShapeDtypeStruct((N, D, H * W, Co8), jnp.bfloat16),
        compiler_params=pltpu.CompilerParams(
            dimension_semantics=("parallel", "parallel")),
    )(x2, wt8, bt8)
    # Interleave the 2x2x2 offsets into the (2D,2H,2W) grid, channels-last.
    # bf16 pass only (was f32 before); in-kernel fusion deferred (see TODO).
    y = y.reshape(N, D, H, W, 2, 2, 2, Co)
    y = jnp.transpose(y, (0, 1, 4, 2, 5, 3, 6, 7))
    return y.reshape(N, 2 * D, 2 * H, 2 * W * Co)  # bf16, lanes ordered (w, c)


# ---------------------------------------------------------------------------
# Block-Toeplitz weights along W with the W-padding folded in:
# per (kd, kh) a (W*Cin, W*Cout) matrix over the UNPADDED width, so the
# in-kernel scratch only needs D/H halos and stays lane-aligned.
# ---------------------------------------------------------------------------
def toeplitz_weights(w, W):
    # w: torch layout (Cout, Cin, 3, 3, 3)
    Co, Ci = w.shape[0], w.shape[1]
    xi = jnp.arange(W)[:, None]                   # unpadded input position x'
    xo = jnp.arange(W)[None, :]                   # output position x
    kw = xi - xo + 1                              # kernel index (padding=1)
    valid = ((kw >= 0) & (kw <= 2)).astype(w.dtype)
    kwc = jnp.clip(kw, 0, 2)
    w_perm = jnp.transpose(w, (2, 3, 4, 1, 0))    # (kd, kh, kw, Ci, Co)
    t = w_perm[:, :, kwc, :, :]                   # (3, 3, W, W, Ci, Co)
    t = t * valid[None, None, :, :, None, None]
    t = jnp.transpose(t, (0, 1, 2, 4, 3, 5))      # (3, 3, W, Ci, W, Co)
    return t.reshape(9, W * Ci, W * Co)           # rows (x',ci), cols (x,co)


# ---------------------------------------------------------------------------
# Conv3d 3x3x3 pad=1 with concat fused (two inputs, weight split row-wise).
# Grid = (N, 3): kd is the reduction axis.  Outputs h1 (bf16) plus per-batch
# column sum / sumsq (f32) for BN statistics.
# ---------------------------------------------------------------------------
def _make_conv_cat_kernel(D, H, W, Ca, Cb, Co):
    Ka, Kb, L = W * Ca, W * Cb, W * Co
    DH = D * H

    def kernel(a_ref, s_ref, wa_ref, wb_ref, bias_ref,
               h_ref, ssum_ref, ssq_ref, pa_ref, pb_ref, acc_ref):
        kd = pl.program_id(1)

        @pl.when(kd == 0)
        def _init():
            # zero only the D/H halo ring; interior is fully overwritten below
            # and the W halo is folded into the Toeplitz weights.
            pa_ref[0:1] = jnp.zeros((1, H + 2, Ka), jnp.bfloat16)
            pa_ref[D + 1:D + 2] = jnp.zeros((1, H + 2, Ka), jnp.bfloat16)
            pa_ref[1:D + 1, 0:1] = jnp.zeros((D, 1, Ka), jnp.bfloat16)
            pa_ref[1:D + 1, H + 1:H + 2] = jnp.zeros((D, 1, Ka), jnp.bfloat16)
            pb_ref[0:1] = jnp.zeros((1, H + 2, Kb), jnp.bfloat16)
            pb_ref[D + 1:D + 2] = jnp.zeros((1, H + 2, Kb), jnp.bfloat16)
            pb_ref[1:D + 1, 0:1] = jnp.zeros((D, 1, Kb), jnp.bfloat16)
            pb_ref[1:D + 1, H + 1:H + 2] = jnp.zeros((D, 1, Kb), jnp.bfloat16)
            pa_ref[1:D + 1, 1:H + 1, :] = a_ref[0]
            pb_ref[1:D + 1, 1:H + 1, :] = s_ref[0]
            acc_ref[...] = jnp.zeros((DH, L), jnp.float32)

        for kh in range(3):
            la = pa_ref[pl.ds(kd, D), pl.ds(kh, H), :].reshape(DH, Ka)
            lb = pb_ref[pl.ds(kd, D), pl.ds(kh, H), :].reshape(DH, Kb)
            acc_ref[...] += jnp.dot(la, wa_ref[kh],
                                    preferred_element_type=jnp.float32)
            acc_ref[...] += jnp.dot(lb, wb_ref[kh],
                                    preferred_element_type=jnp.float32)

        @pl.when(kd == pl.num_programs(1) - 1)
        def _fin():
            res = acc_ref[...] + bias_ref[...]
            h_ref[0] = res.reshape(D, H, L).astype(h_ref.dtype)
            ssum_ref[0] = jnp.sum(res, axis=0, keepdims=True)
            ssq_ref[0] = jnp.sum(res * res, axis=0, keepdims=True)

    return kernel


def conv3d_cat(up, skip, wa, wb, bias, D, H, W, Co):
    # up/skip: (N, D, H, W*Co) bf16; wa/wb: (9, W*Co, W*Co) bf16; bias: (1, W*Co)
    N = up.shape[0]
    L = W * Co
    Ka, Kb = wa.shape[1], wb.shape[1]
    return pl.pallas_call(
        _make_conv_cat_kernel(D, H, W, Co, Co, Co),
        grid=(N, 3),
        in_specs=[
            pl.BlockSpec((1, D, H, L), lambda n, k: (n, 0, 0, 0)),
            pl.BlockSpec((1, D, H, L), lambda n, k: (n, 0, 0, 0)),
            pl.BlockSpec((3, Ka, L), lambda n, k: (k, 0, 0)),
            pl.BlockSpec((3, Kb, L), lambda n, k: (k, 0, 0)),
            pl.BlockSpec((1, L), lambda n, k: (0, 0)),
        ],
        out_specs=(
            pl.BlockSpec((1, D, H, L), lambda n, k: (n, 0, 0, 0)),
            pl.BlockSpec((1, 1, L), lambda n, k: (n, 0, 0)),
            pl.BlockSpec((1, 1, L), lambda n, k: (n, 0, 0)),
        ),
        out_shape=(
            jax.ShapeDtypeStruct((N, D, H, L), jnp.bfloat16),
            jax.ShapeDtypeStruct((N, 1, L), jnp.float32),
            jax.ShapeDtypeStruct((N, 1, L), jnp.float32),
        ),
        scratch_shapes=[
            pltpu.VMEM((D + 2, H + 2, Ka), jnp.bfloat16),
            pltpu.VMEM((D + 2, H + 2, Kb), jnp.bfloat16),
            pltpu.VMEM((D * H, L), jnp.float32),
        ],
        compiler_params=pltpu.CompilerParams(
            dimension_semantics=("parallel", "arbitrary")),
    )(up, skip, wa, wb, bias)


# ---------------------------------------------------------------------------
# Conv3d 3x3x3 pad=1 with BN1+ReLU fused into the input path.
# Grid = (N, 3).  Outputs h2 (bf16) plus per-batch column sum / sumsq (f32).
# ---------------------------------------------------------------------------
def _make_conv_bn_kernel(D, H, W, Ci, Co):
    K, L = W * Ci, W * Co
    DH = D * H

    def kernel(h_ref, sc_ref, sh_ref, wt_ref, bias_ref,
               o_ref, ssum_ref, ssq_ref, pad_ref, acc_ref):
        kd = pl.program_id(1)

        @pl.when(kd == 0)
        def _init():
            pad_ref[0:1] = jnp.zeros((1, H + 2, K), jnp.bfloat16)
            pad_ref[D + 1:D + 2] = jnp.zeros((1, H + 2, K), jnp.bfloat16)
            pad_ref[1:D + 1, 0:1] = jnp.zeros((D, 1, K), jnp.bfloat16)
            pad_ref[1:D + 1, H + 1:H + 2] = jnp.zeros((D, 1, K), jnp.bfloat16)
            act = jnp.maximum(
                h_ref[0].astype(jnp.float32) * sc_ref[...] + sh_ref[...], 0.0)
            pad_ref[1:D + 1, 1:H + 1, :] = act.astype(jnp.bfloat16)
            acc_ref[...] = jnp.zeros((DH, L), jnp.float32)

        for kh in range(3):
            l = pad_ref[pl.ds(kd, D), pl.ds(kh, H), :].reshape(DH, K)
            acc_ref[...] += jnp.dot(l, wt_ref[kh],
                                    preferred_element_type=jnp.float32)

        @pl.when(kd == pl.num_programs(1) - 1)
        def _fin():
            res = acc_ref[...] + bias_ref[...]
            o_ref[0] = res.reshape(D, H, L).astype(o_ref.dtype)
            ssum_ref[0] = jnp.sum(res, axis=0, keepdims=True)
            ssq_ref[0] = jnp.sum(res * res, axis=0, keepdims=True)

    return kernel


def conv3d_bn(h, sc, sh, wt, bias, D, H, W, Ci, Co):
    # h: (N, D, H, W*Ci) bf16; sc/sh: (1,1,W*Ci) f32; wt: (9, W*Ci, W*Co) bf16
    N = h.shape[0]
    K, L = W * Ci, W * Co
    return pl.pallas_call(
        _make_conv_bn_kernel(D, H, W, Ci, Co),
        grid=(N, 3),
        in_specs=[
            pl.BlockSpec((1, D, H, K), lambda n, k: (n, 0, 0, 0)),
            pl.BlockSpec((1, 1, K), lambda n, k: (0, 0, 0)),
            pl.BlockSpec((1, 1, K), lambda n, k: (0, 0, 0)),
            pl.BlockSpec((3, K, L), lambda n, k: (k, 0, 0)),
            pl.BlockSpec((1, L), lambda n, k: (0, 0)),
        ],
        out_specs=(
            pl.BlockSpec((1, D, H, L), lambda n, k: (n, 0, 0, 0)),
            pl.BlockSpec((1, 1, L), lambda n, k: (n, 0, 0)),
            pl.BlockSpec((1, 1, L), lambda n, k: (n, 0, 0)),
        ),
        out_shape=(
            jax.ShapeDtypeStruct((N, D, H, L), jnp.bfloat16),
            jax.ShapeDtypeStruct((N, 1, L), jnp.float32),
            jax.ShapeDtypeStruct((N, 1, L), jnp.float32),
        ),
        scratch_shapes=[
            pltpu.VMEM((D + 2, H + 2, K), jnp.bfloat16),
            pltpu.VMEM((D * H, L), jnp.float32),
        ],
        compiler_params=pltpu.CompilerParams(
            dimension_semantics=("parallel", "arbitrary")),
    )(h, sc, sh, wt, bias)


# ---------------------------------------------------------------------------
# Final BN + ReLU: lane-dense elementwise kernel.
# ---------------------------------------------------------------------------
def _affine_relu_kernel(x_ref, sc_ref, sh_ref, o_ref):
    o_ref[...] = jnp.maximum(
        x_ref[...].astype(jnp.float32) * sc_ref[...] + sh_ref[...], 0.0)


def bn_relu_lane_dense(x, scale, shift, c):
    # x: (N, D, H, W*c) bf16; scale/shift: (c,) f32 -> f32 output, same shape
    shp = x.shape
    total = int(np.prod(shp))
    lanes = 128 if (total % 128 == 0 and 128 % c == 0) else shp[-1]
    rows = total // lanes
    block_rows = rows
    for cand in (8192, 4096, 2048, 1024, 512, 256, 128, 64, 32, 16, 8, 4, 2, 1):
        if cand <= rows and rows % cand == 0:
            block_rows = cand
            break
    xr = x.reshape(rows, lanes)
    sc = jnp.tile(scale, lanes // c).reshape(1, lanes).astype(jnp.float32)
    sh = jnp.tile(shift, lanes // c).reshape(1, lanes).astype(jnp.float32)
    y = pl.pallas_call(
        _affine_relu_kernel,
        grid=(rows // block_rows,),
        in_specs=[
            pl.BlockSpec((block_rows, lanes), lambda i: (i, 0)),
            pl.BlockSpec((1, lanes), lambda i: (0, 0)),
            pl.BlockSpec((1, lanes), lambda i: (0, 0)),
        ],
        out_specs=pl.BlockSpec((block_rows, lanes), lambda i: (i, 0)),
        out_shape=jax.ShapeDtypeStruct((rows, lanes), jnp.float32),
        compiler_params=pltpu.CompilerParams(dimension_semantics=("parallel",)),
    )(xr, sc, sh)
    return y.reshape(shp)


# ---------------------------------------------------------------------------
# BN statistics from the kernels' per-batch column sums (biased variance,
# PyTorch training-mode normalization).
# ---------------------------------------------------------------------------
def _bn_scale_shift(ssum, ssq, gamma, beta, count, Co, eps):
    W = ssum.shape[-1] // Co
    tot = jnp.sum(ssum.reshape(-1, W, Co), axis=(0, 1))
    tot2 = jnp.sum(ssq.reshape(-1, W, Co), axis=(0, 1))
    mean = tot / count
    var = jnp.maximum(tot2 / count - mean * mean, 0.0)
    scale = gamma / jnp.sqrt(var + eps)
    shift = beta - mean * scale
    return scale, shift


# ---------------------------------------------------------------------------
# Weight preparation (hoisted out of the jitted forward; call once).
# ---------------------------------------------------------------------------
def prepare_params(p, W1):
    Cin = p["wt"].shape[0]
    Co = p["wt"].shape[1]
    return {
        "wt8": jnp.transpose(p["wt"], (0, 2, 3, 4, 1)).reshape(Cin, 8 * Co)
                  .astype(jnp.bfloat16),
        "bt8": jnp.tile(p["bt"], 8).reshape(1, 8 * Co).astype(jnp.float32),
        "wa": toeplitz_weights(p["w1"][:, :Co], W1).astype(jnp.bfloat16),
        "wb": toeplitz_weights(p["w1"][:, Co:], W1).astype(jnp.bfloat16),
        "bias1": jnp.tile(p["b1"], W1).reshape(1, W1 * Co).astype(jnp.float32),
        "w2t": toeplitz_weights(p["w2"], W1).astype(jnp.bfloat16),
        "bias2": jnp.tile(p["b2"], W1).reshape(1, W1 * Co).astype(jnp.float32),
        "g1": p["g1"].astype(jnp.float32), "be1": p["be1"].astype(jnp.float32),
        "g2": p["g2"].astype(jnp.float32), "be2": p["be2"].astype(jnp.float32),
    }


# ---------------------------------------------------------------------------
# DecoderBlock forward (NCDHW in / NCDHW out)
# ---------------------------------------------------------------------------
def decoder_block_forward(x_ncdhw, skip_ncdhw, prep, eps=EPS):
    N, _, D, H, W = x_ncdhw.shape
    Co = prep["wt8"].shape[1] // 8
    D1, H1, W1 = 2 * D, 2 * H, 2 * W
    count = N * D1 * H1 * W1

    # ConvTranspose3d -> channels-last dense bf16 layout
    up = conv_transpose3d_k2s2(x_ncdhw, prep["wt8"], prep["bt8"])   # (N,D1,H1,W1*Co)
    skip = jnp.transpose(skip_ncdhw, (0, 2, 3, 4, 1)) \
              .reshape(N, D1, H1, W1 * Co).astype(jnp.bfloat16)

    # conv1 with concat fused; BN1 stats come back as small side outputs
    h1, s1, q1 = conv3d_cat(up, skip, prep["wa"], prep["wb"], prep["bias1"],
                            D1, H1, W1, Co)
    scale1, shift1 = _bn_scale_shift(s1, q1, prep["g1"], prep["be1"],
                                     count, Co, eps)

    # conv2 with BN1+ReLU fused into its input path
    sc1 = jnp.tile(scale1, W1).reshape(1, 1, W1 * Co).astype(jnp.float32)
    sh1 = jnp.tile(shift1, W1).reshape(1, 1, W1 * Co).astype(jnp.float32)
    h2, s2, q2 = conv3d_bn(h1, sc1, sh1, prep["w2t"], prep["bias2"],
                           D1, H1, W1, Co, Co)
    scale2, shift2 = _bn_scale_shift(s2, q2, prep["g2"], prep["be2"],
                                     count, Co, eps)

    # BN2 + ReLU (lane-dense elementwise kernel)
    out = bn_relu_lane_dense(h2, scale2, shift2, Co)                 # f32
    out = out.reshape(N, D1, H1, W1, Co)
    # TODO(synk): fuse this NDHWC->NCDHW relayout into the BN2+ReLU kernel.
    return jnp.transpose(out, (0, 4, 1, 2, 3))


# ---------------------------------------------------------------------------
# Pure-JAX reference (f32, HIGHEST precision) for correctness check
# ---------------------------------------------------------------------------
def ref_forward(x, skip, p, eps=EPS):
    N, Cin, D, H, W = x.shape
    Cout = p["wt"].shape[1]
    up = jnp.einsum("ncdhw,coijk->nodihjwk", x, p["wt"],
                    precision=lax.Precision.HIGHEST)
    up = up.reshape(N, Cout, 2 * D, 2 * H, 2 * W) + p["bt"][None, :, None, None, None]
    cat = jnp.concatenate([up, skip], axis=1)

    def conv_bn_relu(h, w, b, g, be):
        y = lax.conv_general_dilated(
            h, w, window_strides=(1, 1, 1), padding="SAME",
            dimension_numbers=("NCDHW", "OIDHW", "NCDHW"),
            precision=lax.Precision.HIGHEST,
        ) + b[None, :, None, None, None]
        mean = jnp.mean(y, axis=(0, 2, 3, 4), keepdims=True)
        var = jnp.var(y, axis=(0, 2, 3, 4), keepdims=True)
        yn = (y - mean) / jnp.sqrt(var + eps)
        yn = yn * g[None, :, None, None, None] + be[None, :, None, None, None]
        return jnp.maximum(yn, 0.0)

    h = conv_bn_relu(cat, p["w1"], p["b1"], p["g1"], p["be1"])
    return conv_bn_relu(h, p["w2"], p["b2"], p["g2"], p["be2"])


if __name__ == "__main__":
    in_channels, out_channels = 8, 4
    N, D, H, W = 2, 4, 8, 8

    key = jax.random.PRNGKey(0)
    ks = jax.random.split(key, 8)
    params = {
        "wt": 0.1 * jax.random.normal(ks[0], (in_channels, out_channels, 2, 2, 2), jnp.float32),
        "bt": 0.1 * jax.random.normal(ks[1], (out_channels,), jnp.float32),
        "w1": 0.1 * jax.random.normal(ks[2], (out_channels, 2 * out_channels, 3, 3, 3), jnp.float32),
        "b1": 0.1 * jax.random.normal(ks[3], (out_channels,), jnp.float32),
        "g1": jnp.ones((out_channels,), jnp.float32),
        "be1": jnp.zeros((out_channels,), jnp.float32),
        "w2": 0.1 * jax.random.normal(ks[4], (out_channels, out_channels, 3, 3, 3), jnp.float32),
        "b2": 0.1 * jax.random.normal(ks[5], (out_channels,), jnp.float32),
        "g2": jnp.ones((out_channels,), jnp.float32),
        "be2": jnp.zeros((out_channels,), jnp.float32),
    }

    x = jax.random.normal(ks[6], (N, in_channels, D, H, W), jnp.float32)
    skip = jax.random.normal(ks[7], (N, out_channels, 2 * D, 2 * H, 2 * W), jnp.float32)

    # weight layout / Toeplitz prep done once, outside the per-step jit
    prep = prepare_params(params, 2 * W)

    fwd = jax.jit(decoder_block_forward)
    out = jax.block_until_ready(fwd(x, skip, prep))
    assert out.shape == (N, out_channels, 2 * D, 2 * H, 2 * W), out.shape

    ref = jax.block_until_ready(ref_forward(x, skip, params))
    np.testing.assert_allclose(np.asarray(out, dtype=np.float32), np.asarray(ref),
                               rtol=2e-2, atol=2e-2)

    print("KERNEL_OK")
</pallas_src>

<mosaic_0001>
module attributes {stable_mosaic.version = 11 : i64} {
  func.func @_convt_kernel(%arg0: i32, %arg1: i32, %arg2: memref<1x1x64x8xbf16, #tpu.memory_space<vmem>>, %arg3: memref<8x32xbf16, #tpu.memory_space<vmem>>, %arg4: memref<1x32xf32, #tpu.memory_space<vmem>>, %arg5: memref<1x1x64x32xbf16, #tpu.memory_space<vmem>>) attributes {dimension_semantics = [#tpu.dimension_semantics<parallel>, #tpu.dimension_semantics<parallel>], iteration_bounds = array<i64: 2, 4>, scalar_prefetch = 0 : i64, scratch_operands = 0 : i64, tpu.core_type = #tpu.core_type<tc>, window_params = [{transform_indices = @transform_0, window_bounds = array<i64: 1, 1, 64, 8>}, {pipeline_mode = #tpu.pipeline_mode<synchronous>, transform_indices = @transform_1, window_bounds = array<i64: 8, 32>}, {pipeline_mode = #tpu.pipeline_mode<synchronous>, transform_indices = @transform_2, window_bounds = array<i64: 1, 32>}, {transform_indices = @transform_3, window_bounds = array<i64: 1, 1, 64, 32>}]} {
    %c0 = arith.constant 0 : index
    %c0_0 = arith.constant 0 : index
    %c0_1 = arith.constant 0 : index
    %c0_2 = arith.constant 0 : index
    %0 = vector.load %arg2[%c0, %c0_0, %c0_1, %c0_2] : memref<1x1x64x8xbf16, #tpu.memory_space<vmem>>, vector<1x1x64x8xbf16>
    %1 = vector.shape_cast %0 : vector<1x1x64x8xbf16> to vector<64x8xbf16>
    %c0_3 = arith.constant 0 : index
    %c0_4 = arith.constant 0 : index
    %2 = vector.load %arg3[%c0_3, %c0_4] : memref<8x32xbf16, #tpu.memory_space<vmem>>, vector<8x32xbf16>
    %cst = arith.constant dense<0.000000e+00> : vector<64x32xf32>
    %3 = tpu.matmul %1, %2, %cst {dimension_numbers = #tpu.dot_dimension_numbers<[1], [0], [0], [1], [0, 0, 1, 1], [], []>} : vector<64x8xbf16>, vector<8x32xbf16>, vector<64x32xf32> -> vector<64x32xf32>
    %c0_5 = arith.constant 0 : index
    %c0_6 = arith.constant 0 : index
    %4 = vector.load %arg4[%c0_5, %c0_6] : memref<1x32xf32, #tpu.memory_space<vmem>>, vector<1x32xf32>
    %5 = vector.broadcast %4 : vector<1x32xf32> to vector<64x32xf32>
    %6 = arith.addf %3, %5 : vector<64x32xf32>
    %7 = arith.truncf %6 : vector<64x32xf32> to vector<64x32xbf16>
    %c0_7 = arith.constant 0 : index
    %c0_8 = arith.constant 0 : index
    %c0_9 = arith.constant 0 : index
    %c0_10 = arith.constant 0 : index
    %8 = vector.load %arg5[%c0_7, %c0_8, %c0_9, %c0_10] : memref<1x1x64x32xbf16, #tpu.memory_space<vmem>>, vector<1x1x64x32xbf16>
    %9 = vector.shape_cast %8 : vector<1x1x64x32xbf16> to vector<64x32xbf16>
    %10 = vector.shape_cast %7 : vector<64x32xbf16> to vector<1x1x64x32xbf16>
    tpu.vector_store %arg5[%c0_7, %c0_8, %c0_9, %c0_10], %10 {strides = array<i32>} : memref<1x1x64x32xbf16, #tpu.memory_space<vmem>>, vector<1x1x64x32xbf16>,
    return
  }
  func.func @transform_0(%arg0: i32, %arg1: i32) -> (i32, i32, i32, i32) {
    %c0_i32 = arith.constant 0 : i32
    %c0_i32_0 = arith.constant 0 : i32
    %c0_i32_1 = arith.constant 0 : i32
    return %arg0, %arg1, %c0_i32, %c0_i32_0 : i32, i32, i32, i32
  }
  func.func @transform_1(%arg0: i32, %arg1: i32) -> (i32, i32) {
    %c0_i32 = arith.constant 0 : i32
    %c0_i32_0 = arith.constant 0 : i32
    %c0_i32_1 = arith.constant 0 : i32
    return %c0_i32, %c0_i32_0 : i32, i32
  }
  func.func @transform_2(%arg0: i32, %arg1: i32) -> (i32, i32) {
    %c0_i32 = arith.constant 0 : i32
    %c0_i32_0 = arith.constant 0 : i32
    %c0_i32_1 = arith.constant 0 : i32
    return %c0_i32, %c0_i32_0 : i32, i32
  }
  func.func @transform_3(%arg0: i32, %arg1: i32) -> (i32, i32, i32, i32) {
    %c0_i32 = arith.constant 0 : i32
    %c0_i32_0 = arith.constant 0 : i32
    %c0_i32_1 = arith.constant 0 : i32
    return %arg0, %arg1, %c0_i32, %c0_i32_0 : i32, i32, i32, i32
  }
}

module attributes {stable_mosaic.version = 11 : i64} {
  func.func @kernel(%arg0: i32, %arg1: i32, %arg2: memref<1x8x16x64xbf16, #tpu.memory_space<vmem>>, %arg3: memref<1x8x16x64xbf16, #tpu.memory_space<vmem>>, %arg4: memref<3x64x64xbf16, #tpu.memory_space<vmem>>, %arg5: memref<3x64x64xbf16, #tpu.memory_space<vmem>>, %arg6: memref<1x64xf32, #tpu.memory_space<vmem>>, %arg7: memref<1x8x16x64xbf16, #tpu.memory_space<vmem>>, %arg8: memref<1x1x64xf32, #tpu.memory_space<vmem>>, %arg9: memref<1x1x64xf32, #tpu.memory_space<vmem>>, %arg10: memref<10x18x64xbf16, #tpu.memory_space<vmem>>, %arg11: memref<10x18x64xbf16, #tpu.memory_space<vmem>>, %arg12: memref<128x64xf32, #tpu.memory_space<vmem>>) attributes {dimension_semantics = [#tpu.dimension_semantics<parallel>, #tpu.dimension_semantics<arbitrary>], iteration_bounds = array<i64: 2, 3>, scalar_prefetch = 0 : i64, scratch_operands = 3 : i64, tpu.core_type = #tpu.core_type<tc>, window_params = [{transform_indices = @transform_0, window_bounds = array<i64: 1, 8, 16, 64>}, {transform_indices = @transform_1, window_bounds = array<i64: 1, 8, 16, 64>}, {transform_indices = @transform_2, window_bounds = array<i64: 3, 64, 64>}, {transform_indices = @transform_3, window_bounds = array<i64: 3, 64, 64>}, {pipeline_mode = #tpu.pipeline_mode<synchronous>, transform_indices = @transform_4, window_bounds = array<i64: 1, 64>}, {transform_indices = @transform_5, window_bounds = array<i64: 1, 8, 16, 64>}, {transform_indices = @transform_6, window_bounds = array<i64: 1, 1, 64>}, {transform_indices = @transform_7, window_bounds = array<i64: 1, 1, 64>}]} {
    %c0_i32 = arith.constant 0 : i32
    %0 = arith.cmpi eq, %arg1, %c0_i32 : i32
    %1 = arith.extui %0 : i1 to i32
    %c0_i32_0 = arith.constant 0 : i32
    %2 = arith.cmpi ne, %1, %c0_i32_0 : i32
    scf.if %2 {
      %cst_58 = arith.constant 0.000000e+00 : bf16
      %60 = vector.broadcast %cst_58 : bf16 to vector<1x18x64xbf16>
      %c0_59 = arith.constant 0 : index
      %c0_60 = arith.constant 0 : index
      %c0_61 = arith.constant 0 : index
      %61 = vector.load %arg10[%c0_59, %c0_60, %c0_61] : memref<10x18x64xbf16, #tpu.memory_space<vmem>>, vector<1x18x64xbf16>
      tpu.vector_store %arg10[%c0_59, %c0_60, %c0_61], %60 {strides = array<i32>} : memref<10x18x64xbf16, #tpu.memory_space<vmem>>, vector<1x18x64xbf16>,
      %cst_62 = arith.constant 0.000000e+00 : bf16
      %62 = vector.broadcast %cst_62 : bf16 to vector<1x18x64xbf16>
      %c9 = arith.constant 9 : index
      %c0_63 = arith.constant 0 : index
      %c0_64 = arith.constant 0 : index
      %63 = vector.load %arg10[%c9, %c0_63, %c0_64] : memref<10x18x64xbf16, #tpu.memory_space<vmem>>, vector<1x18x64xbf16>
      tpu.vector_store %arg10[%c9, %c0_63, %c0_64], %62 {strides = array<i32>} : memref<10x18x64xbf16, #tpu.memory_space<vmem>>, vector<1x18x64xbf16>,
      %cst_65 = arith.constant 0.000000e+00 : bf16
      %64 = vector.broadcast %cst_65 : bf16 to vector<8x1x64xbf16>
      %c1_66 = arith.constant 1 : index
      %c0_67 = arith.constant 0 : index
      %c0_68 = arith.constant 0 : index
      %65 = vector.load %arg10[%c1_66, %c0_67, %c0_68] : memref<10x18x64xbf16, #tpu.memory_space<vmem>>, vector<8x1x64xbf16>
      tpu.vector_store %arg10[%c1_66, %c0_67, %c0_68], %64 {strides = array<i32>} : memref<10x18x64xbf16, #tpu.memory_space<vmem>>, vector<8x1x64xbf16>,
      %cst_69 = arith.constant 0.000000e+00 : bf16
      %66 = vector.broadcast %cst_69 : bf16 to vector<8x1x64xbf16>
      %c1_70 = arith.constant 1 : index
      %c17 = arith.constant 17 : index
      %c0_71 = arith.constant 0 : index
      %67 = vector.load %arg10[%c1_70, %c17, %c0_71] : memref<10x18x64xbf16, #tpu.memory_space<vmem>>, vector<8x1x64xbf16>
      tpu.vector_store %arg10[%c1_70, %c17, %c0_71], %66 {strides = array<i32>} : memref<10x18x64xbf16, #tpu.memory_space<vmem>>, vector<8x1x64xbf16>,
      %cst_72 = arith.constant 0.000000e+00 : bf16
      %68 = vector.broadcast %cst_72 : bf16 to vector<1x18x64xbf16>
      %c0_73 = arith.constant 0 : index
      %c0_74 = arith.constant 0 : index
      %c0_75 = arith.constant 0 : index
      %69 = vector.load %arg11[%c0_73, %c0_74, %c0_75] : memref<10x18x64xbf16, #tpu.memory_space<vmem>>, vector<1x18x64xbf16>
      tpu.vector_store %arg11[%c0_73, %c0_74, %c0_75], %68 {strides = array<i32>} : memref<10x18x64xbf16, #tpu.memory_space<vmem>>, vector<1x18x64xbf16>,
      %cst_76 = arith.constant 0.000000e+00 : bf16
      %70 = vector.broadcast %cst_76 : bf16 to vector<1x18x64xbf16>
      %c9_77 = arith.constant 9 : index
      %c0_78 = arith.constant 0 : index
      %c0_79 = arith.constant 0 : index
      %71 = vector.load %arg11[%c9_77, %c0_78, %c0_79] : memref<10x18x64xbf16, #tpu.memory_space<vmem>>, vector<1x18x64xbf16>
      tpu.vector_store %arg11[%c9_77, %c0_78, %c0_79], %70 {strides = array<i32>} : memref<10x18x64xbf16, #tpu.memory_space<vmem>>, vector<1x18x64xbf16>,
      %cst_80 = arith.constant 0.000000e+00 : bf16
      %72 = vector.broadcast %cst_80 : bf16 to vector<8x1x64xbf16>
      %c1_81 = arith.constant 1 : index
      %c0_82 = arith.constant 0 : index
      %c0_83 = arith.constant 0 : index
      %73 = vector.load %arg11[%c1_81, %c0_82, %c0_83] : memref<10x18x64xbf16, #tpu.memory_space<vmem>>, vector<8x1x64xbf16>
      tpu.vector_store %arg11[%c1_81, %c0_82, %c0_83], %72 {strides = array<i32>} : memref<10x18x64xbf16, #tpu.memory_space<vmem>>, vector<8x1x64xbf16>,
      %cst_84 = arith.constant 0.000000e+00 : bf16
      %74 = vector.broadcast %cst_84 : bf16 to vector<8x1x64xbf16>
      %c1_85 = arith.constant 1 : index
      %c17_86 = arith.constant 17 : index
      %c0_87 = arith.constant 0 : index
      %75 = vector.load %arg11[%c1_85, %c17_86, %c0_87] : memref<10x18x64xbf16, #tpu.memory_space<vmem>>, vector<8x1x64xbf16>
      tpu.vector_store %arg11[%c1_85, %c17_86, %c0_87], %74 {strides = array<i32>} : memref<10x18x64xbf16, #tpu.memory_space<vmem>>, vector<8x1x64xbf16>,
      %c0_88 = arith.constant 0 : index
      %c0_89 = arith.constant 0 : index
      %c0_90 = arith.constant 0 : index
      %c0_91 = arith.constant 0 : index
      %76 = vector.load %arg2[%c0_88, %c0_89, %c0_90, %c0_91] : memref<1x8x16x64xbf16, #tpu.memory_space<vmem>>, vector<1x8x16x64xbf16>
      %77 = vector.shape_cast %76 : vector<1x8x16x64xbf16> to vector<8x16x64xbf16>
      %c1_92 = arith.constant 1 : index
      %c1_93 = arith.constant 1 : index
      %c0_94 = arith.constant 0 : index
      %78 = vector.load %arg10[%c1_92, %c1_93, %c0_94] : memref<10x18x64xbf16, #tpu.memory_space<vmem>>, vector<8x16x64xbf16>
      tpu.vector_store %arg10[%c1_92, %c1_93, %c0_94], %77 {strides = array<i32>} : memref<10x18x64xbf16, #tpu.memory_space<vmem>>, vector<8x16x64xbf16>,
      %c0_95 = arith.constant 0 : index
      %c0_96 = arith.constant 0 : index
      %c0_97 = arith.constant 0 : index
      %c0_98 = arith.constant 0 : index
      %79 = vector.load %arg3[%c0_95, %c0_96, %c0_97, %c0_98] : memref<1x8x16x64xbf16, #tpu.memory_space<vmem>>, vector<1x8x16x64xbf16>
      %80 = vector.shape_cast %79 : vector<1x8x16x64xbf16> to vector<8x16x64xbf16>
      %c1_99 = arith.constant 1 : index
      %c1_100 = arith.constant 1 : index
      %c0_101 = arith.constant 0 : index
      %81 = vector.load %arg11[%c1_99, %c1_100, %c0_101] : memref<10x18x64xbf16, #tpu.memory_space<vmem>>, vector<8x16x64xbf16>
      tpu.vector_store %arg11[%c1_99, %c1_100, %c0_101], %80 {strides = array<i32>} : memref<10x18x64xbf16, #tpu.memory_space<vmem>>, vector<8x16x64xbf16>,
      %cst_102 = arith.constant 0.000000e+00 : f32
      %82 = vector.broadcast %cst_102 : f32 to vector<128x64xf32>
      %c0_103 = arith.constant 0 : index
      %c0_104 = arith.constant 0 : index
      %83 = vector.load %arg12[%c0_103, %c0_104] : memref<128x64xf32, #tpu.memory_space<vmem>>, vector<128x64xf32>
      tpu.vector_store %arg12[%c0_103, %c0_104], %82 {strides = array<i32>} : memref<128x64xf32, #tpu.memory_space<vmem>>, vector<128x64xf32>,
    } else {
    }
    %3 = arith.index_cast %arg1 : i32 to index
    %c0 = arith.constant 0 : index
    %c0_1 = arith.constant 0 : index
    %4 = vector.load %arg10[%3, %c0, %c0_1] : memref<10x18x64xbf16, #tpu.memory_space<vmem>>, vector<8x16x64xbf16>
    %5 = vector.shape_cast %4 : vector<8x16x64xbf16> to vector<128x64xbf16>
    %6 = arith.index_cast %arg1 : i32 to index
    %c0_2 = arith.constant 0 : index
    %c0_3 = arith.constant 0 : index
    %7 = vector.load %arg11[%6, %c0_2, %c0_3] : memref<10x18x64xbf16, #tpu.memory_space<vmem>>, vector<8x16x64xbf16>
    %8 = vector.shape_cast %7 : vector<8x16x64xbf16> to vector<128x64xbf16>
    %c0_4 = arith.constant 0 : index
    %c0_5 = arith.constant 0 : index
    %9 = vector.load %arg12[%c0_4, %c0_5] : memref<128x64xf32, #tpu.memory_space<vmem>>, vector<128x64xf32>
    %c0_6 = arith.constant 0 : index
    %c0_7 = arith.constant 0 : index
    %c0_8 = arith.constant 0 : index
    %10 = vector.load %arg4[%c0_6, %c0_7, %c0_8] : memref<3x64x64xbf16, #tpu.memory_space<vmem>>, vector<1x64x64xbf16>
    %11 = vector.shape_cast %10 : vector<1x64x64xbf16> to vector<64x64xbf16>
    %cst = arith.constant dense<0.000000e+00> : vector<128x64xf32>
    %12 = tpu.matmul %5, %11, %cst {dimension_numbers = #tpu.dot_dimension_numbers<[1], [0], [0], [1], [0, 0, 1, 1], [], []>} : vector<128x64xbf16>, vector<64x64xbf16>, vector<128x64xf32> -> vector<128x64xf32>
    %13 = arith.addf %9, %12 : vector<128x64xf32>
    %c0_9 = arith.constant 0 : index
    %c0_10 = arith.constant 0 : index
    %14 = vector.load %arg12[%c0_9, %c0_10] : memref<128x64xf32, #tpu.memory_space<vmem>>, vector<128x64xf32>
    tpu.vector_store %arg12[%c0_9, %c0_10], %13 {strides = array<i32>} : memref<128x64xf32, #tpu.memory_space<vmem>>, vector<128x64xf32>,
    %c0_11 = arith.constant 0 : index
    %c0_12 = arith.constant 0 : index
    %15 = vector.load %arg12[%c0_11, %c0_12] : memref<128x64xf32, #tpu.memory_space<vmem>>, vector<128x64xf32>
    %c0_13 = arith.constant 0 : index
    %c0_14 = arith.constant 0 : index
    %c0_15 = arith.constant 0 : index
    %16 = vector.load %arg5[%c0_13, %c0_14, %c0_15] : memref<3x64x64xbf16, #tpu.memory_space<vmem>>, vector<1x64x64xbf16>
    %17 = vector.shape_cast %16 : vector<1x64x64xbf16> to vector<64x64xbf16>
    %cst_16 = arith.constant dense<0.000000e+00> : vector<128x64xf32>
    %18 = tpu.matmul %8, %17, %cst_16 {dimension_numbers = #tpu.dot_dimension_numbers<[1], [0], [0], [1], [0, 0, 1, 1], [], []>} : vector<128x64xbf16>, vector<64x64xbf16>, vector<128x64xf32> -> vector<128x64xf32>
    %19 = arith.addf %15, %18 : vector<128x64xf32>
    %c0_17 = arith.constant 0 : index
    %c0_18 = arith.constant 0 : index
    %20 = vector.load %arg12[%c0_17, %c0_18] : memref<128x64xf32, #tpu.memory_space<vmem>>, vector<128x64xf32>
    tpu.vector_store %arg12[%c0_17, %c0_18], %19 {strides = array<i32>} : memref<128x64xf32, #tpu.memory_space<vmem>>, vector<128x64xf32>,
    %21 = arith.index_cast %arg1 : i32 to index
    %c1 = arith.constant 1 : index
    %c0_19 = arith.constant 0 : index
    %22 = vector.load %arg10[%21, %c1, %c0_19] : memref<10x18x64xbf16, #tpu.memory_space<vmem>>, vector<8x16x64xbf16>
    %23 = vector.shape_cast %22 : vector<8x16x64xbf16> to vector<128x64xbf16>
    %24 = arith.index_cast %arg1 : i32 to index
    %c1_20 = arith.constant 1 : index
    %c0_21 = arith.constant 0 : index
    %25 = vector.load %arg11[%24, %c1_20, %c0_21] : memref<10x18x64xbf16, #tpu.memory_space<vmem>>, vector<8x16x64xbf16>
    %26 = vector.shape_cast %25 : vector<8x16x64xbf16> to vector<128x64xbf16>
    %c0_22 = arith.constant 0 : index
    %c0_23 = arith.constant 0 : index
    %27 = vector.load %arg12[%c0_22, %c0_23] : memref<128x64xf32, #tpu.memory_space<vmem>>, vector<128x64xf32>
    %c1_24 = arith.constant 1 : index
    %c0_25 = arith.constant 0 : index
    %c0_26 = arith.constant 0 : index
    %28 = vector.load %arg4[%c1_24, %c0_25, %c0_26] : memref<3x64x64xbf16, #tpu.memory_space<vmem>>, vector<1x64x64xbf16>
    %29 = vector.shape_cast %28 : vector<1x64x64xbf16> to vector<64x64xbf16>
    %cst_27 = arith.constant dense<0.000000e+00> : vector<128x64xf32>
    %30 = tpu.matmul %23, %29, %cst_27 {dimension_numbers = #tpu.dot_dimension_numbers<[1], [0], [0], [1], [0, 0, 1, 1], [], []>} : vector<128x64xbf16>, vector<64x64xbf16>, vector<128x64xf32> -> vector<128x64xf32>
    %31 = arith.addf %27, %30 : vector<128x64xf32>
    %c0_28 = arith.constant 0 : index
    %c0_29 = arith.constant 0 : index
    %32 = vector.load %arg12[%c0_28, %c0_29] : memref<128x64xf32, #tpu.memory_space<vmem>>, vector<128x64xf32>
    tpu.vector_store %arg12[%c0_28, %c0_29], %31 {strides = array<i32>} : memref<128x64xf32, #tpu.memory_space<vmem>>, vector<128x64xf32>,
    %c0_30 = arith.constant 0 : index
    %c0_31 = arith.constant 0 : index
    %33 = vector.load %arg12[%c0_30, %c0_31] : memref<128x64xf32, #tpu.memory_space<vmem>>, vector<128x64xf32>
    %c1_32 = arith.constant 1 : index
    %c0_33 = arith.constant 0 : index
    %c0_34 = arith.constant 0 : index
    %34 = vector.load %arg5[%c1_32, %c0_33, %c0_34] : memref<3x64x64xbf16, #tpu.memory_space<vmem>>, vector<1x64x64xbf16>
    %35 = vector.shape_cast %34 : vector<1x64x64xbf16> to vector<64x64xbf16>
    %cst_35 = arith.constant dense<0.000000e+00> : vector<128x64xf32>
    %36 = tpu.matmul %26, %35, %cst_35 {dimension_numbers = #tpu.dot_dimension_numbers<[1], [0], [0], [1], [0, 0, 1, 1], [], []>} : vector<128x64xbf16>, vector<64x64xbf16>, vector<128x64xf32> -> vector<128x64xf32>
    %37 = arith.addf %33, %36 : vector<128x64xf32>
    %c0_36 = arith.constant 0 : index
    %c0_37 = arith.constant 0 : index
    %38 = vector.load %arg12[%c0_36, %c0_37] : memref<128x64xf32, #tpu.memory_space<vmem>>, vector<128x64xf32>
    tpu.vector_store %arg12[%c0_36, %c0_37], %37 {strides = array<i32>} : memref<128x64xf32, #tpu.memory_space<vmem>>, vector<128x64xf32>,
    %39 = arith.index_cast %arg1 : i32 to index
    %c2 = arith.constant 2 : index
    %c0_38 = arith.constant 0 : index
    %40 = vector.load %arg10[%39, %c2, %c0_38] : memref<10x18x64xbf16, #tpu.memory_space<vmem>>, vector<8x16x64xbf16>
    %41 = vector.shape_cast %40 : vector<8x16x64xbf16> to vector<128x64xbf16>
    %42 = arith.index_cast %arg1 : i32 to index
    %c2_39 = arith.constant 2 : index
    %c0_40 = arith.constant 0 : index
    %43 = vector.load %arg11[%42, %c2_39, %c0_40] : memref<10x18x64xbf16, #tpu.memory_space<vmem>>, vector<8x16x64xbf16>
    %44 = vector.shape_cast %43 : vector<8x16x64xbf16> to vector<128x64xbf16>
    %c0_41 = arith.constant 0 : index
    %c0_42 = arith.constant 0 : index
    %45 = vector.load %arg12[%c0_41, %c0_42] : memref<128x64xf32, #tpu.memory_space<vmem>>, vector<128x64xf32>
    %c2_43 = arith.constant 2 : index
    %c0_44 = arith.constant 0 : index
    %c0_45 = arith.constant 0 : index
    %46 = vector.load %arg4[%c2_43, %c0_44, %c0_45] : memref<3x64x64xbf16, #tpu.memory_space<vmem>>, vector<1x64x64xbf16>
    %47 = vector.shape_cast %46 : vector<1x64x64xbf16> to vector<64x64xbf16>
    %cst_46 = arith.constant dense<0.000000e+00> : vector<128x64xf32>
    %48 = tpu.matmul %41, %47, %cst_46 {dimension_numbers = #tpu.dot_dimension_numbers<[1], [0], [0], [1], [0, 0, 1, 1], [], []>} : vector<128x64xbf16>, vector<64x64xbf16>, vector<128x64xf32> -> vector<128x64xf32>
    %49 = arith.addf %45, %48 : vector<128x64xf32>
    %c0_47 = arith.constant 0 : index
    %c0_48 = arith.constant 0 : index
    %50 = vector.load %arg12[%c0_47, %c0_48] : memref<128x64xf32, #tpu.memory_space<vmem>>, vector<128x64xf32>
    tpu.vector_store %arg12[%c0_47, %c0_48], %49 {strides = array<i32>} : memref<128x64xf32, #tpu.memory_space<vmem>>, vector<128x64xf32>,
    %c0_49 = arith.constant 0 : index
    %c0_50 = arith.constant 0 : index
    %51 = vector.load %arg12[%c0_49, %c0_50] : memref<128x64xf32, #tpu.memory_space<vmem>>, vector<128x64xf32>
    %c2_51 = arith.constant 2 : index
    %c0_52 = arith.constant 0 : index
    %c0_53 = arith.constant 0 : index
    %52 = vector.load %arg5[%c2_51, %c0_52, %c0_53] : memref<3x64x64xbf16, #tpu.memory_space<vmem>>, vector<1x64x64xbf16>
    %53 = vector.shape_cast %52 : vector<1x64x64xbf16> to vector<64x64xbf16>
    %cst_54 = arith.constant dense<0.000000e+00> : vector<128x64xf32>
    %54 = tpu.matmul %44, %53, %cst_54 {dimension_numbers = #tpu.dot_dimension_numbers<[1], [0], [0], [1], [0, 0, 1, 1], [], []>} : vector<128x64xbf16>, vector<64x64xbf16>, vector<128x64xf32> -> vector<128x64xf32>
    %55 = arith.addf %51, %54 : vector<128x64xf32>
    %c0_55 = arith.constant 0 : index
    %c0_56 = arith.constant 0 : index
    %56 = vector.load %arg12[%c0_55, %c0_56] : memref<128x64xf32, #tpu.memory_space<vmem>>, vector<128x64xf32>
    tpu.vector_store %arg12[%c0_55, %c0_56], %55 {strides = array<i32>} : memref<128x64xf32, #tpu.memory_space<vmem>>, vector<128x64xf32>,
    %c2_i32 = arith.constant 2 : i32
    %57 = arith.cmpi eq, %arg1, %c2_i32 : i32
    %58 = arith.extui %57 : i1 to i32
    %c0_i32_57 = arith.constant 0 : i32
    %59 = arith.cmpi ne, %58, %c0_i32_57 : i32
    scf.if %59 {
      %c0_58 = arith.constant 0 : index
      %c0_59 = arith.constant 0 : index
      %60 = vector.load %arg12[%c0_58, %c0_59] : memref<128x64xf32, #tpu.memory_space<vmem>>, vector<128x64xf32>
      %c0_60 = arith.constant 0 : index
      %c0_61 = arith.constant 0 : index
      %61 = vector.load %arg6[%c0_60, %c0_61] : memref<1x64xf32, #tpu.memory_space<vmem>>, vector<1x64xf32>
      %62 = vector.broadcast %61 : vector<1x64xf32> to vector<128x64xf32>
      %63 = arith.addf %60, %62 : vector<128x64xf32>
      %64 = vector.shape_cast %63 : vector<128x64xf32> to vector<8x16x64xf32>
      %65 = arith.truncf %64 : vector<8x16x64xf32> to vector<8x16x64xbf16>
      %c0_62 = arith.constant 0 : index
      %c0_63 = arith.constant 0 : index
      %c0_64 = arith.constant 0 : index
      %c0_65 = arith.constant 0 : index
      %66 = vector.load %arg7[%c0_62, %c0_63, %c0_64, %c0_65] : memref<1x8x16x64xbf16, #tpu.memory_space<vmem>>, vector<1x8x16x64xbf16>
      %67 = vector.shape_cast %66 : vector<1x8x16x64xbf16> to vector<8x16x64xbf16>
      %68 = vector.shape_cast %65 : vector<8x16x64xbf16> to vector<1x8x16x64xbf16>
      tpu.vector_store %arg7[%c0_62, %c0_63, %c0_64, %c0_65], %68 {strides = array<i32>} : memref<1x8x16x64xbf16, #tpu.memory_space<vmem>>, vector<1x8x16x64xbf16>,
      %cst_66 = arith.constant dense<0.000000e+00> : vector<64xf32>
      %69 = vector.multi_reduction <add>, %63, %cst_66 [0] : vector<128x64xf32> to vector<64xf32>
      %70 = vector.shape_cast %69 : vector<64xf32> to vector<1x64xf32>
      %c0_67 = arith.constant 0 : index
      %c0_68 = arith.constant 0 : index
      %c0_69 = arith.constant 0 : index
      %71 = vector.load %arg8[%c0_67, %c0_68, %c0_69] : memref<1x1x64xf32, #tpu.memory_space<vmem>>, vector<1x1x64xf32>
      %72 = vector.shape_cast %71 : vector<1x1x64xf32> to vector<1x64xf32>
      %73 = vector.shape_cast %70 : vector<1x64xf32> to vector<1x1x64xf32>
      tpu.vector_store %arg8[%c0_67, %c0_68, %c0_69], %73 {strides = array<i32>} : memref<1x1x64xf32, #tpu.memory_space<vmem>>, vector<1x1x64xf32>,
      %74 = arith.mulf %63, %63 : vector<128x64xf32>
      %cst_70 = arith.constant dense<0.000000e+00> : vector<64xf32>
      %75 = vector.multi_reduction <add>, %74, %cst_70 [0] : vector<128x64xf32> to vector<64xf32>
      %76 = vector.shape_cast %75 : vector<64xf32> to vector<1x64xf32>
      %c0_71 = arith.constant 0 : index
      %c0_72 = arith.constant 0 : index
      %c0_73 = arith.constant 0 : index
      %77 = vector.load %arg9[%c0_71, %c0_72, %c0_73] : memref<1x1x64xf32, #tpu.memory_space<vmem>>, vector<1x1x64xf32>
      %78 = vector.shape_cast %77 : vector<1x1x64xf32> to vector<1x64xf32>
      %79 = vector.shape_cast %76 : vector<1x64xf32> to vector<1x1x64xf32>
      tpu.vector_store %arg9[%c0_71, %c0_72, %c0_73], %79 {strides = array<i32>} : memref<1x1x64xf32, #tpu.memory_space<vmem>>, vector<1x1x64xf32>,
    } else {
    }
    return
  }
  func.func @transform_0(%arg0: i32, %arg1: i32) -> (i32, i32, i32, i32) {
    %c0_i32 = arith.constant 0 : i32
    %c0_i32_0 = arith.constant 0 : i32
    %c0_i32_1 = arith.constant 0 : i32
    %c0_i32_2 = arith.constant 0 : i32
    return %arg0, %c0_i32, %c0_i32_0, %c0_i32_1 : i32, i32, i32, i32
  }
  func.func @transform_1(%arg0: i32, %arg1: i32) -> (i32, i32, i32, i32) {
    %c0_i32 = arith.constant 0 : i32
    %c0_i32_0 = arith.constant 0 : i32
    %c0_i32_1 = arith.constant 0 : i32
    %c0_i32_2 = arith.constant 0 : i32
    return %arg0, %c0_i32, %c0_i32_0, %c0_i32_1 : i32, i32, i32, i32
  }
  func.func @transform_2(%arg0: i32, %arg1: i32) -> (i32, i32, i32) {
    %c0_i32 = arith.constant 0 : i32
    %c0_i32_0 = arith.constant 0 : i32
    %c0_i32_1 = arith.constant 0 : i32
    return %arg1, %c0_i32, %c0_i32_0 : i32, i32, i32
  }
  func.func @transform_3(%arg0: i32, %arg1: i32) -> (i32, i32, i32) {
    %c0_i32 = arith.constant 0 : i32
    %c0_i32_0 = arith.constant 0 : i32
    %c0_i32_1 = arith.constant 0 : i32
    return %arg1, %c0_i32, %c0_i32_0 : i32, i32, i32
  }
  func.func @transform_4(%arg0: i32, %arg1: i32) -> (i32, i32) {
    %c0_i32 = arith.constant 0 : i32
    %c0_i32_0 = arith.constant 0 : i32
    %c0_i32_1 = arith.constant 0 : i32
    return %c0_i32, %c0_i32_0 : i32, i32
  }
  func.func @transform_5(%arg0: i32, %arg1: i32) -> (i32, i32, i32, i32) {
    %c0_i32 = arith.constant 0 : i32
    %c0_i32_0 = arith.constant 0 : i32
    %c0_i32_1 = arith.constant 0 : i32
    %c0_i32_2 = arith.constant 0 : i32
    return %arg0, %c0_i32, %c0_i32_0, %c0_i32_1 : i32, i32, i32, i32
  }
  func.func @transform_6(%arg0: i32, %arg1: i32) -> (i32, i32, i32) {
    %c0_i32 = arith.constant 0 : i32
    %c0_i32_0 = arith.constant 0 : i32
    %c0_i32_1 = arith.constant 0 : i32
    return %arg0, %c0_i32, %c0_i32_0 : i32, i32, i32
  }
  func.func @transform_7(%arg0: i32, %arg1: i32) -> (i32, i32, i32) {
    %c0_i32 = arith.constant 0 : i32
    %c0_i32_0 = arith.constant 0 : i32
    %c0_i32_1 = arith.constant 0 : i32
    return %arg0, %c0_i32, %c0_i32_0 : i32, i32, i32
  }
}

module attributes {stable_mosaic.version = 11 : i64} {
  func.func @kernel(%arg0: i32, %arg1: i32, %arg2: memref<1x8x16x64xbf16, #tpu.memory_space<vmem>>, %arg3: memref<1x1x64xf32, #tpu.memory_space<vmem>>, %arg4: memref<1x1x64xf32, #tpu.memory_space<vmem>>, %arg5: memref<3x64x64xbf16, #tpu.memory_space<vmem>>, %arg6: memref<1x64xf32, #tpu.memory_space<vmem>>, %arg7: memref<1x8x16x64xbf16, #tpu.memory_space<vmem>>, %arg8: memref<1x1x64xf32, #tpu.memory_space<vmem>>, %arg9: memref<1x1x64xf32, #tpu.memory_space<vmem>>, %arg10: memref<10x18x64xbf16, #tpu.memory_space<vmem>>, %arg11: memref<128x64xf32, #tpu.memory_space<vmem>>) attributes {dimension_semantics = [#tpu.dimension_semantics<parallel>, #tpu.dimension_semantics<arbitrary>], iteration_bounds = array<i64: 2, 3>, scalar_prefetch = 0 : i64, scratch_operands = 2 : i64, tpu.core_type = #tpu.core_type<tc>, window_params = [{transform_indices = @transform_0, window_bounds = array<i64: 1, 8, 16, 64>}, {pipeline_mode = #tpu.pipeline_mode<synchronous>, transform_indices = @transform_1, window_bounds = array<i64: 1, 1, 64>}, {pipeline_mode = #tpu.pipeline_mode<synchronous>, transform_indices = @transform_2, window_bounds = array<i64: 1, 1, 64>}, {transform_indices = @transform_3, window_bounds = array<i64: 3, 64, 64>}, {pipeline_mode = #tpu.pipeline_mode<synchronous>, transform_indices = @transform_4, window_bounds = array<i64: 1, 64>}, {transform_indices = @transform_5, window_bounds = array<i64: 1, 8, 16, 64>}, {transform_indices = @transform_6, window_bounds = array<i64: 1, 1, 64>}, {transform_indices = @transform_7, window_bounds = array<i64: 1, 1, 64>}]} {
    %c0_i32 = arith.constant 0 : i32
    %0 = arith.cmpi eq, %arg1, %c0_i32 : i32
    %1 = arith.extui %0 : i1 to i32
    %c0_i32_0 = arith.constant 0 : i32
    %2 = arith.cmpi ne, %1, %c0_i32_0 : i32
    scf.if %2 {
      %cst_28 = arith.constant 0.000000e+00 : bf16
      %33 = vector.broadcast %cst_28 : bf16 to vector<1x18x64xbf16>
      %c0_29 = arith.constant 0 : index
      %c0_30 = arith.constant 0 : index
      %c0_31 = arith.constant 0 : index
      %34 = vector.load %arg10[%c0_29, %c0_30, %c0_31] : memref<10x18x64xbf16, #tpu.memory_space<vmem>>, vector<1x18x64xbf16>
      tpu.vector_store %arg10[%c0_29, %c0_30, %c0_31], %33 {strides = array<i32>} : memref<10x18x64xbf16, #tpu.memory_space<vmem>>, vector<1x18x64xbf16>,
      %cst_32 = arith.constant 0.000000e+00 : bf16
      %35 = vector.broadcast %cst_32 : bf16 to vector<1x18x64xbf16>
      %c9 = arith.constant 9 : index
      %c0_33 = arith.constant 0 : index
      %c0_34 = arith.constant 0 : index
      %36 = vector.load %arg10[%c9, %c0_33, %c0_34] : memref<10x18x64xbf16, #tpu.memory_space<vmem>>, vector<1x18x64xbf16>
      tpu.vector_store %arg10[%c9, %c0_33, %c0_34], %35 {strides = array<i32>} : memref<10x18x64xbf16, #tpu.memory_space<vmem>>, vector<1x18x64xbf16>,
      %cst_35 = arith.constant 0.000000e+00 : bf16
      %37 = vector.broadcast %cst_35 : bf16 to vector<8x1x64xbf16>
      %c1_36 = arith.constant 1 : index
      %c0_37 = arith.constant 0 : index
      %c0_38 = arith.constant 0 : index
      %38 = vector.load %arg10[%c1_36, %c0_37, %c0_38] : memref<10x18x64xbf16, #tpu.memory_space<vmem>>, vector<8x1x64xbf16>
      tpu.vector_store %arg10[%c1_36, %c0_37, %c0_38], %37 {strides = array<i32>} : memref<10x18x64xbf16, #tpu.memory_space<vmem>>, vector<8x1x64xbf16>,
      %cst_39 = arith.constant 0.000000e+00 : bf16
      %39 = vector.broadcast %cst_39 : bf16 to vector<8x1x64xbf16>
      %c1_40 = arith.constant 1 : index
      %c17 = arith.constant 17 : index
      %c0_41 = arith.constant 0 : index
      %40 = vector.load %arg10[%c1_40, %c17, %c0_41] : memref<10x18x64xbf16, #tpu.memory_space<vmem>>, vector<8x1x64xbf16>
      tpu.vector_store %arg10[%c1_40, %c17, %c0_41], %39 {strides = array<i32>} : memref<10x18x64xbf16, #tpu.memory_space<vmem>>, vector<8x1x64xbf16>,
      %c0_42 = arith.constant 0 : index
      %c0_43 = arith.constant 0 : index
      %c0_44 = arith.constant 0 : index
      %c0_45 = arith.constant 0 : index
      %41 = vector.load %arg2[%c0_42, %c0_43, %c0_44, %c0_45] : memref<1x8x16x64xbf16, #tpu.memory_space<vmem>>, vector<1x8x16x64xbf16>
      %42 = vector.shape_cast %41 : vector<1x8x16x64xbf16> to vector<8x16x64xbf16>
      %43 = arith.extf %42 : vector<8x16x64xbf16> to vector<8x16x64xf32>
      %c0_46 = arith.constant 0 : index
      %c0_47 = arith.constant 0 : index
      %c0_48 = arith.constant 0 : index
      %44 = vector.load %arg3[%c0_46, %c0_47, %c0_48] : memref<1x1x64xf32, #tpu.memory_space<vmem>>, vector<1x1x64xf32>
      %45 = vector.broadcast %44 : vector<1x1x64xf32> to vector<8x16x64xf32>
      %46 = arith.mulf %43, %45 : vector<8x16x64xf32>
      %c0_49 = arith.constant 0 : index
      %c0_50 = arith.constant 0 : index
      %c0_51 = arith.constant 0 : index
      %47 = vector.load %arg4[%c0_49, %c0_50, %c0_51] : memref<1x1x64xf32, #tpu.memory_space<vmem>>, vector<1x1x64xf32>
      %48 = vector.broadcast %47 : vector<1x1x64xf32> to vector<8x16x64xf32>
      %49 = arith.addf %46, %48 : vector<8x16x64xf32>
      %cst_52 = arith.constant 0.000000e+00 : f32
      %50 = vector.broadcast %cst_52 : f32 to vector<8x16x64xf32>
      %51 = arith.maximumf %49, %50 : vector<8x16x64xf32>
      %52 = arith.truncf %51 : vector<8x16x64xf32> to vector<8x16x64xbf16>
      %c1_53 = arith.constant 1 : index
      %c1_54 = arith.constant 1 : index
      %c0_55 = arith.constant 0 : index
      %53 = vector.load %arg10[%c1_53, %c1_54, %c0_55] : memref<10x18x64xbf16, #tpu.memory_space<vmem>>, vector<8x16x64xbf16>
      tpu.vector_store %arg10[%c1_53, %c1_54, %c0_55], %52 {strides = array<i32>} : memref<10x18x64xbf16, #tpu.memory_space<vmem>>, vector<8x16x64xbf16>,
      %cst_56 = arith.constant 0.000000e+00 : f32
      %54 = vector.broadcast %cst_56 : f32 to vector<128x64xf32>
      %c0_57 = arith.constant 0 : index
      %c0_58 = arith.constant 0 : index
      %55 = vector.load %arg11[%c0_57, %c0_58] : memref<128x64xf32, #tpu.memory_space<vmem>>, vector<128x64xf32>
      tpu.vector_store %arg11[%c0_57, %c0_58], %54 {strides = array<i32>} : memref<128x64xf32, #tpu.memory_space<vmem>>, vector<128x64xf32>,
    } else {
    }
    %3 = arith.index_cast %arg1 : i32 to index
    %c0 = arith.constant 0 : index
    %c0_1 = arith.constant 0 : index
    %4 = vector.load %arg10[%3, %c0, %c0_1] : memref<10x18x64xbf16, #tpu.memory_space<vmem>>, vector<8x16x64xbf16>
    %5 = vector.shape_cast %4 : vector<8x16x64xbf16> to vector<128x64xbf16>
    %c0_2 = arith.constant 0 : index
    %c0_3 = arith.constant 0 : index
    %6 = vector.load %arg11[%c0_2, %c0_3] : memref<128x64xf32, #tpu.memory_space<vmem>>, vector<128x64xf32>
    %c0_4 = arith.constant 0 : index
    %c0_5 = arith.constant 0 : index
    %c0_6 = arith.constant 0 : index
    %7 = vector.load %arg5[%c0_4, %c0_5, %c0_6] : memref<3x64x64xbf16, #tpu.memory_space<vmem>>, vector<1x64x64xbf16>
    %8 = vector.shape_cast %7 : vector<1x64x64xbf16> to vector<64x64xbf16>
    %cst = arith.constant dense<0.000000e+00> : vector<128x64xf32>
    %9 = tpu.matmul %5, %8, %cst {dimension_numbers = #tpu.dot_dimension_numbers<[1], [0], [0], [1], [0, 0, 1, 1], [], []>} : vector<128x64xbf16>, vector<64x64xbf16>, vector<128x64xf32> -> vector<128x64xf32>
    %10 = arith.addf %6, %9 : vector<128x64xf32>
    %c0_7 = arith.constant 0 : index
    %c0_8 = arith.constant 0 : index
    %11 = vector.load %arg11[%c0_7, %c0_8] : memref<128x64xf32, #tpu.memory_space<vmem>>, vector<128x64xf32>
    tpu.vector_store %arg11[%c0_7, %c0_8], %10 {strides = array<i32>} : memref<128x64xf32, #tpu.memory_space<vmem>>, vector<128x64xf32>,
    %12 = arith.index_cast %arg1 : i32 to index
    %c1 = arith.constant 1 : index
    %c0_9 = arith.constant 0 : index
    %13 = vector.load %arg10[%12, %c1, %c0_9] : memref<10x18x64xbf16, #tpu.memory_space<vmem>>, vector<8x16x64xbf16>
    %14 = vector.shape_cast %13 : vector<8x16x64xbf16> to vector<128x64xbf16>
    %c0_10 = arith.constant 0 : index
    %c0_11 = arith.constant 0 : index
    %15 = vector.load %arg11[%c0_10, %c0_11] : memref<128x64xf32, #tpu.memory_space<vmem>>, vector<128x64xf32>
    %c1_12 = arith.constant 1 : index
    %c0_13 = arith.constant 0 : index
    %c0_14 = arith.constant 0 : index
    %16 = vector.load %arg5[%c1_12, %c0_13, %c0_14] : memref<3x64x64xbf16, #tpu.memory_space<vmem>>, vector<1x64x64xbf16>
    %17 = vector.shape_cast %16 : vector<1x64x64xbf16> to vector<64x64xbf16>
    %cst_15 = arith.constant dense<0.000000e+00> : vector<128x64xf32>
    %18 = tpu.matmul %14, %17, %cst_15 {dimension_numbers = #tpu.dot_dimension_numbers<[1], [0], [0], [1], [0, 0, 1, 1], [], []>} : vector<128x64xbf16>, vector<64x64xbf16>, vector<128x64xf32> -> vector<128x64xf32>
    %19 = arith.addf %15, %18 : vector<128x64xf32>
    %c0_16 = arith.constant 0 : index
    %c0_17 = arith.constant 0 : index
    %20 = vector.load %arg11[%c0_16, %c0_17] : memref<128x64xf32, #tpu.memory_space<vmem>>, vector<128x64xf32>
    tpu.vector_store %arg11[%c0_16, %c0_17], %19 {strides = array<i32>} : memref<128x64xf32, #tpu.memory_space<vmem>>, vector<128x64xf32>,
    %21 = arith.index_cast %arg1 : i32 to index
    %c2 = arith.constant 2 : index
    %c0_18 = arith.constant 0 : index
    %22 = vector.load %arg10[%21, %c2, %c0_18] : memref<10x18x64xbf16, #tpu.memory_space<vmem>>, vector<8x16x64xbf16>
    %23 = vector.shape_cast %22 : vector<8x16x64xbf16> to vector<128x64xbf16>
    %c0_19 = arith.constant 0 : index
    %c0_20 = arith.constant 0 : index
    %24 = vector.load %arg11[%c0_19, %c0_20] : memref<128x64xf32, #tpu.memory_space<vmem>>, vector<128x64xf32>
    %c2_21 = arith.constant 2 : index
    %c0_22 = arith.constant 0 : index
    %c0_23 = arith.constant 0 : index
    %25 = vector.load %arg5[%c2_21, %c0_22, %c0_23] : memref<3x64x64xbf16, #tpu.memory_space<vmem>>, vector<1x64x64xbf16>
    %26 = vector.shape_cast %25 : vector<1x64x64xbf16> to vector<64x64xbf16>
    %cst_24 = arith.constant dense<0.000000e+00> : vector<128x64xf32>
    %27 = tpu.matmul %23, %26, %cst_24 {dimension_numbers = #tpu.dot_dimension_numbers<[1], [0], [0], [1], [0, 0, 1, 1], [], []>} : vector<128x64xbf16>, vector<64x64xbf16>, vector<128x64xf32> -> vector<128x64xf32>
    %28 = arith.addf %24, %27 : vector<128x64xf32>
    %c0_25 = arith.constant 0 : index
    %c0_26 = arith.constant 0 : index
    %29 = vector.load %arg11[%c0_25, %c0_26] : memref<128x64xf32, #tpu.memory_space<vmem>>, vector<128x64xf32>
    tpu.vector_store %arg11[%c0_25, %c0_26], %28 {strides = array<i32>} : memref<128x64xf32, #tpu.memory_space<vmem>>, vector<128x64xf32>,
    %c2_i32 = arith.constant 2 : i32
    %30 = arith.cmpi eq, %arg1, %c2_i32 : i32
    %31 = arith.extui %30 : i1 to i32
    %c0_i32_27 = arith.constant 0 : i32
    %32 = arith.cmpi ne, %31, %c0_i32_27 : i32
    scf.if %32 {
      %c0_28 = arith.constant 0 : index
      %c0_29 = arith.constant 0 : index
      %33 = vector.load %arg11[%c0_28, %c0_29] : memref<128x64xf32, #tpu.memory_space<vmem>>, vector<128x64xf32>
      %c0_30 = arith.constant 0 : index
      %c0_31 = arith.constant 0 : index
      %34 = vector.load %arg6[%c0_30, %c0_31] : memref<1x64xf32, #tpu.memory_space<vmem>>, vector<1x64xf32>
      %35 = vector.broadcast %34 : vector<1x64xf32> to vector<128x64xf32>
      %36 = arith.addf %33, %35 : vector<128x64xf32>
      %37 = vector.shape_cast %36 : vector<128x64xf32> to vector<8x16x64xf32>
      %38 = arith.truncf %37 : vector<8x16x64xf32> to vector<8x16x64xbf16>
      %c0_32 = arith.constant 0 : index
      %c0_33 = arith.constant 0 : index
      %c0_34 = arith.constant 0 : index
      %c0_35 = arith.constant 0 : index
      %39 = vector.load %arg7[%c0_32, %c0_33, %c0_34, %c0_35] : memref<1x8x16x64xbf16, #tpu.memory_space<vmem>>, vector<1x8x16x64xbf16>
      %40 = vector.shape_cast %39 : vector<1x8x16x64xbf16> to vector<8x16x64xbf16>
      %41 = vector.shape_cast %38 : vector<8x16x64xbf16> to vector<1x8x16x64xbf16>
      tpu.vector_store %arg7[%c0_32, %c0_33, %c0_34, %c0_35], %41 {strides = array<i32>} : memref<1x8x16x64xbf16, #tpu.memory_space<vmem>>, vector<1x8x16x64xbf16>,
      %cst_36 = arith.constant dense<0.000000e+00> : vector<64xf32>
      %42 = vector.multi_reduction <add>, %36, %cst_36 [0] : vector<128x64xf32> to vector<64xf32>
      %43 = vector.shape_cast %42 : vector<64xf32> to vector<1x64xf32>
      %c0_37 = arith.constant 0 : index
      %c0_38 = arith.constant 0 : index
      %c0_39 = arith.constant 0 : index
      %44 = vector.load %arg8[%c0_37, %c0_38, %c0_39] : memref<1x1x64xf32, #tpu.memory_space<vmem>>, vector<1x1x64xf32>
      %45 = vector.shape_cast %44 : vector<1x1x64xf32> to vector<1x64xf32>
      %46 = vector.shape_cast %43 : vector<1x64xf32> to vector<1x1x64xf32>
      tpu.vector_store %arg8[%c0_37, %c0_38, %c0_39], %46 {strides = array<i32>} : memref<1x1x64xf32, #tpu.memory_space<vmem>>, vector<1x1x64xf32>,
      %47 = arith.mulf %36, %36 : vector<128x64xf32>
      %cst_40 = arith.constant dense<0.000000e+00> : vector<64xf32>
      %48 = vector.multi_reduction <add>, %47, %cst_40 [0] : vector<128x64xf32> to vector<64xf32>
      %49 = vector.shape_cast %48 : vector<64xf32> to vector<1x64xf32>
      %c0_41 = arith.constant 0 : index
      %c0_42 = arith.constant 0 : index
      %c0_43 = arith.constant 0 : index
      %50 = vector.load %arg9[%c0_41, %c0_42, %c0_43] : memref<1x1x64xf32, #tpu.memory_space<vmem>>, vector<1x1x64xf32>
      %51 = vector.shape_cast %50 : vector<1x1x64xf32> to vector<1x64xf32>
      %52 = vector.shape_cast %49 : vector<1x64xf32> to vector<1x1x64xf32>
      tpu.vector_store %arg9[%c0_41, %c0_42, %c0_43], %52 {strides = array<i32>} : memref<1x1x64xf32, #tpu.memory_space<vmem>>, vector<1x1x64xf32>,
    } else {
    }
    return
  }
  func.func @transform_0(%arg0: i32, %arg1: i32) -> (i32, i32, i32, i32) {
    %c0_i32 = arith.constant 0 : i32
    %c0_i32_0 = arith.constant 0 : i32
    %c0_i32_1 = arith.constant 0 : i32
    %c0_i32_2 = arith.constant 0 : i32
    return %arg0, %c0_i32, %c0_i32_0, %c0_i32_1 : i32, i32, i32, i32
  }
  func.func @transform_1(%arg0: i32, %arg1: i32) -> (i32, i32, i32) {
    %c0_i32 = arith.constant 0 : i32
    %c0_i32_0 = arith.constant 0 : i32
    %c0_i32_1 = arith.constant 0 : i32
    %c0_i32_2 = arith.constant 0 : i32
    return %c0_i32, %c0_i32_0, %c0_i32_1 : i32, i32, i32
  }
  func.func @transform_2(%arg0: i32, %arg1: i32) -> (i32, i32, i32) {
    %c0_i32 = arith.constant 0 : i32
    %c0_i32_0 = arith.constant 0 : i32
    %c0_i32_1 = arith.constant 0 : i32
    %c0_i32_2 = arith.constant 0 : i32
    return %c0_i32, %c0_i32_0, %c0_i32_1 : i32, i32, i32
  }
  func.func @transform_3(%arg0: i32, %arg1: i32) -> (i32, i32, i32) {
    %c0_i32 = arith.constant 0 : i32
    %c0_i32_0 = arith.constant 0 : i32
    %c0_i32_1 = arith.constant 0 : i32
    return %arg1, %c0_i32, %c0_i32_0 : i32, i32, i32
  }
  func.func @transform_4(%arg0: i32, %arg1: i32) -> (i32, i32) {
    %c0_i32 = arith.constant 0 : i32
    %c0_i32_0 = arith.constant 0 : i32
    %c0_i32_1 = arith.constant 0 : i32
    return %c0_i32, %c0_i32_0 : i32, i32
  }
  func.func @transform_5(%arg0: i32, %arg1: i32) -> (i32, i32, i32, i32) {
    %c0_i32 = arith.constant 0 : i32
    %c0_i32_0 = arith.constant 0 : i32
    %c0_i32_1 = arith.constant 0 : i32
    %c0_i32_2 = arith.constant 0 : i32
    return %arg0, %c0_i32, %c0_i32_0, %c0_i32_1 : i32, i32, i32, i32
  }
  func.func @transform_6(%arg0: i32, %arg1: i32) -> (i32, i32, i32) {
    %c0_i32 = arith.constant 0 : i32
    %c0_i32_0 = arith.constant 0 : i32
    %c0_i32_1 = arith.constant 0 : i32
    return %arg0, %c0_i32, %c0_i32_0 : i32, i32, i32
  }
  func.func @transform_7(%arg0: i32, %arg1: i32) -> (i32, i32, i32) {
    %c0_i32 = arith.constant 0 : i32
    %c0_i32_0 = arith.constant 0 : i32
    %c0_i32_1 = arith.constant 0 : i32
    return %arg0, %c0_i32, %c0_i32_0 : i32, i32, i32
  }
}

module attributes {stable_mosaic.version = 11 : i64} {
  func.func @_affine_relu_kernel(%arg0: i32, %arg1: memref<128x128xbf16, #tpu.memory_space<vmem>>, %arg2: memref<1x128xf32, #tpu.memory_space<vmem>>, %arg3: memref<1x128xf32, #tpu.memory_space<vmem>>, %arg4: memref<128x128xf32, #tpu.memory_space<vmem>>) attributes {dimension_semantics = [#tpu.dimension_semantics<parallel>], iteration_bounds = array<i64: 1>, scalar_prefetch = 0 : i64, scratch_operands = 0 : i64, tpu.core_type = #tpu.core_type<tc>, window_params = [{transform_indices = @transform_0, window_bounds = array<i64: 128, 128>}, {pipeline_mode = #tpu.pipeline_mode<synchronous>, transform_indices = @transform_1, window_bounds = array<i64: 1, 128>}, {pipeline_mode = #tpu.pipeline_mode<synchronous>, transform_indices = @transform_2, window_bounds = array<i64: 1, 128>}, {transform_indices = @transform_3, window_bounds = array<i64: 128, 128>}]} {
    %c0 = arith.constant 0 : index
    %c0_0 = arith.constant 0 : index
    %0 = vector.load %arg1[%c0, %c0_0] : memref<128x128xbf16, #tpu.memory_space<vmem>>, vector<128x128xbf16>
    %1 = arith.extf %0 : vector<128x128xbf16> to vector<128x128xf32>
    %c0_1 = arith.constant 0 : index
    %c0_2 = arith.constant 0 : index
    %2 = vector.load %arg2[%c0_1, %c0_2] : memref<1x128xf32, #tpu.memory_space<vmem>>, vector<1x128xf32>
    %3 = vector.broadcast %2 : vector<1x128xf32> to vector<128x128xf32>
    %4 = arith.mulf %1, %3 : vector<128x128xf32>
    %c0_3 = arith.constant 0 : index
    %c0_4 = arith.constant 0 : index
    %5 = vector.load %arg3[%c0_3, %c0_4] : memref<1x128xf32, #tpu.memory_space<vmem>>, vector<1x128xf32>
    %6 = vector.broadcast %5 : vector<1x128xf32> to vector<128x128xf32>
    %7 = arith.addf %4, %6 : vector<128x128xf32>
    %cst = arith.constant 0.000000e+00 : f32
    %8 = vector.broadcast %cst : f32 to vector<128x128xf32>
    %9 = arith.maximumf %7, %8 : vector<128x128xf32>
    %c0_5 = arith.constant 0 : index
    %c0_6 = arith.constant 0 : index
    %10 = vector.load %arg4[%c0_5, %c0_6] : memref<128x128xf32, #tpu.memory_space<vmem>>, vector<128x128xf32>
    tpu.vector_store %arg4[%c0_5, %c0_6], %9 {strides = array<i32>} : memref<128x128xf32, #tpu.memory_space<vmem>>, vector<128x128xf32>,
    return
  }
  func.func @transform_0(%arg0: i32) -> (i32, i32) {
    %c0_i32 = arith.constant 0 : i32
    %c0_i32_0 = arith.constant 0 : i32
    return %arg0, %c0_i32 : i32, i32
  }
  func.func @transform_1(%arg0: i32) -> (i32, i32) {
    %c0_i32 = arith.constant 0 : i32
    %c0_i32_0 = arith.constant 0 : i32
    %c0_i32_1 = arith.constant 0 : i32
    return %c0_i32, %c0_i32_0 : i32, i32
  }
  func.func @transform_2(%arg0: i32) -> (i32, i32) {
    %c0_i32 = arith.constant 0 : i32
    %c0_i32_0 = arith.constant 0 : i32
    %c0_i32_1 = arith.constant 0 : i32
    return %c0_i32, %c0_i32_0 : i32, i32
  }
  func.func @transform_3(%arg0: i32) -> (i32, i32) {
    %c0_i32 = arith.constant 0 : i32
    %c0_i32_0 = arith.constant 0 : i32
    return %arg0, %c0_i32 : i32, i32
  }
}

</mosaic_0001>

<bundles_post_ra>
// kernel: decoder_block_forward.4
= control target key start
LH: loop header
LB: loop body
LE: loop exit
PB: predicated region body
PF: predicated region fallthrough
CT: control target
= control target key end

     0   :  { %8 = vsyncpa [#allocation3], 0  ;;  %s871_s0 = inlined_call_operand.vmem [shape: bf16[2,4,64,8], index: 0, kind: input, shape index: {}]   ;;  %s872_s1 = inlined_call_operand.hbm [shape: bf16[8,32], index: 1, kind: input, shape index: {}]   ;;  %s873_s2 = inlined_call_operand.hbm [shape: f32[1,32], index: 2, kind: input, shape index: {}]   ;;  %s874_s3 = inlined_call_operand.vmem [shape: bf16[2,4,64,32], index: 3, kind: output, shape index: {}]  }
   0x1   :  { %9 = vsyncpa [#allocation5], 0  ;;  %s759_s12 = smov 0   ;;  %s761_s13 = smov 0  }
   0x2   :  { %s763_s14 = smov 0   ;;  %s765_s15 = smov 0  }
   0x3   :  { %s767_s16 = smov 0  }
   0x4 LB: > { %s511_s17 = sadd.s32 4294967295, %s735_s16   ;;  %s24_s18 = sadd.s32 1, %s727_s14  ;;  %s735_s16 = sphi %s767_s16, %s15_s16   ;;  %s731_s15 = sphi %s765_s15, %s881_s15   ;;  %s727_s14 = sphi %s763_s14, %s880_s14   ;;  %s723_s13 = sphi %s761_s13, %s879_s13   ;;  %s719_s12 = sphi %s759_s12, %s878_s12  }
   0x5   : > { %p25_p0 = scmp.ge.s32.totalorder %s24_s18, 4  ;;  %s27_s19 = sadd.s32 1, %s731_s15 }
   0x6   : > { %p513_p1 = scmp.ge.s32.totalorder %s735_s16, 1  ;;  %p130_p2 = scmp.lt.s32.totalorder %s735_s16, 9 }
   0x7   : > { %s883_s18 = smov (%p25_p0, %s24_s18), 0  ;;  %s885_s19 = smov (!%p25_p0, %s27_s19), %s731_s15 }
   0x8   : > { %p792_p3 = pnand %p513_p1, %p130_p2  ;;  %p29_p4 = scmp.ge.s32.totalorder %s885_s19, 2 }
   0x9   : > { %p796_p5 = scmp.eq.s32.totalorder %s511_s17, 0  ;;  %s737_s22 = smov [#allocation2]  }
   0xa   : > { %p580_p6 = pneg %p792_p3  ;;  %s887_s19 = smov (%p29_p4, %s885_s19), 0 }
   0xb   : > { %s143_s23 = sshll.u32 %s737_s22, 4  ;;  %s738_s25 = smov [#allocation4]   ;;  %s144_s23 = int_to_ptr.vmem [resolvable:$true] %s143_s23 }
   0xc   : > { %p806_p7 = pnand %p796_p5, %p580_p6  ;;  %s154_s26 = sshll.u32 %s738_s25, 4  ;;  %s155_s26 = int_to_ptr.vmem [resolvable:$true] %s154_s26 }
   0xd   : > { %s648_s27 = scalar_lea.vmem %s144_s23, 64  ;;  %p656_p12 = scmp.lt.s32.totalorder %s144_s23, %s144_s23 }
   0xe   : > { %p639_p8 = pneg %p806_p7  ;;  %p649_p9 = scmp.ne.s32.totalorder %s144_s23, %s648_s27 }
   0xf   : > { %p657_p13 = scmp.lt.s32.totalorder %s648_s27, %s648_s27 }
  0x10   : > { %p651_p10 = pnand %p649_p9, %p639_p8 }
  0x11   : > { %p658_p0 = por %p657_p13, %p656_p12 }
  0x12   : > { %p652_p11 = pneg %p651_p10 }
  0x14   : > { %p659_p1 = pnand %p658_p0, %p652_p11 }
  0x16   : > { %662 = shalt.err (!%p659_p1)
}
  0x17   : > { %583 = dma.hbm_to_vmem [thread:$0]  (!%p806_p7), %s872_s1, 64, %s144_s23, [#allocation3]  }
  0x18   : > { %s674_s30 = scalar_lea.vmem %s155_s26, 16  ;;  %s681_s4 = scalar_lea.vmem %s155_s26, 32 }
  0x19   : > { %p675_p2 = scmp.ne.s32.totalorder %s155_s26, %s674_s30  ;;  %p682_p9 = scmp.lt.s32.totalorder %s155_s26, %s155_s26 }
  0x1a   : > { %p683_p10 = scmp.lt.s32.totalorder %s681_s4, %s674_s30 }
  0x1b   : > { %p677_p4 = pnand %p675_p2, %p639_p8 }
  0x1c   : > { %p684_p12 = por %p683_p10, %p682_p9 }
  0x1d   : > { %p678_p6 = pneg %p677_p4 }
  0x1f   : > { %p685_p11 = pnand %p684_p12, %p678_p6 }
  0x21   : > { %688 = shalt.err (!%p685_p11)
}
  0x22   : > { %586 = dma.hbm_to_vmem [thread:$0]  (!%p806_p7), %s873_s2, 16, %s155_s26, [#allocation5]  }
  0x23   : > { %179 = sbr.rel (%p792_p3) target bundleno = 256 (0x100), region = 32 }
  0x28   : > { %710 = dma.done.wait (%p796_p5), [#allocation3], 64  }
  0x29   : > { %712 = vsyncadd (%p796_p5), [#allocation3], 4294967232 }
  0x2a   : > { %714 = dma.done.wait (%p796_p5), [#allocation5], 16  }
  0x2b   : > { %716 = vsyncadd (%p796_p5), [#allocation5], 4294967280  ;;  %p215_p7 = scmp.lt.s32.totalorder %s723_s13, 1  ;;  %p217_p8 = scmp.lt.s32.totalorder %s719_s12, 3  ;;  %vm283_vm0 = vcmask 1043456   ;;  %vm270_vm1 = vcmask 64512  }
  0x2c   : > { %v242_v0 = vld [vmem:[#allocation2] sm:$0xf]  ;;  %v526_v6 = vld [vmem:[#allocation4] ss:$0 sm:$0xff]  ;;  %vm384_vm2 = vcmask 257024  }
  0x2d   : > { %s889_s13 = smov (!%p215_p7, %s723_s13), 1  ;;  %s891_s12 = smov (!%p217_p8, %s719_s12), 3  ;;  %570 = vmatprep.subr.msk.bf16.mxu0 %vm283_vm0, %v242_v0  ;;  %571 = vmatprep.subr.msk.bf16.mxu1 %vm283_vm0, %v242_v0  ;;  %v285_v1 = vsel %vm283_vm0, %v242_v0, 0 }
  0x2e   : > { %s521_s7 = sshll.u32 %s889_s13, 5  ;;  %s520_s8 = sshll.u32 %s891_s12, 3  ;;  %559 = vmatpush3.bf16.msra.mxu0 %v285_v1  ;;  %569 = vmatpush3.bf16.msra.mxu1 %v285_v1 }
  0x2f   : > { %s221_s9 = sadd.s32 %s521_s7, %s520_s8 }
  0x30   : > { %s522_s10 = sshll.u32 %s221_s9, 2 }
  0x31   : > { %s223_s20 = scalar_lea.vmem %s871_s0, %s522_s10  ;;  %s232_s21 = scalar_lea.vmem %s874_s3, %s522_s10 }
  0x32   : > { %v633_v2 = vld [vmem:[%s223_s20] sm:$0xff]   ;;  %v634_v3 = vld [vmem:[%s223_s20 + $0x10] sm:$0xff]   ;;  %v635_v4 = vld [vmem:[%s223_s20 + $0x8] sm:$0xff]  }
  0x33   : > { %560 = vmatprep.mubr.msk.bf16.mxu0 %vm270_vm1, %v633_v2  ;;  %564 = vmatprep.mubr.msk.bf16.mxu1 %vm270_vm1, %v634_v3  ;;  %v636_v5 = vld [vmem:[%s223_s20 + $0x18] sm:$0xff]  }
  0x34   : > { %561 = vmatmul.mubr.msk.bf16.vlgmr.msra.gmra.mxu0 %vm270_vm1, %v635_v4  ;;  %565 = vmatmul.mubr.msk.bf16.vlgmr.msra.gmra.mxu1 %vm270_vm1, %v636_v5 }
  0xf4   : > { %v562_v7 = vpop.f32.mrf.mxu0  ;;  %v566_v9 = vpop.f32.mrf.mxu1 }
  0xf5   : > { %v330_v8 = vadd.f32 %v562_v7, %v526_v6  ;;  %v346_v10 = vadd.f32 %v566_v9, %v526_v6 }
  0xf6   : > { %v321_v11 = vpop.f32.mrf.mxu0  ;;  %v337_v14 = vpop.f32.mrf.mxu1 }
  0xf7   : > { %v547_v12 = vpack.c.bf16 %v330_v8, %v330_v8  ;;  %v322_v13 = vadd.f32 %v526_v6, %v321_v11  ;;  %v551_v15 = vpack.c.bf16 %v346_v10, %v346_v10  ;;  %v338_v16 = vadd.f32 %v526_v6, %v337_v14 }
  0xf8   : > { %v563_v17 = vpop.f32.mrf.mxu0  ;;  %v567_v20 = vpop.f32.mrf.mxu1 }
  0xf9   : > { %387 = vst.msk [vmem:[%s232_s21 + $0x8] sm:$0xf] %vm384_vm2, %v547_v12  ;;  %v545_v18 = vpack.c.bf16 %v322_v13, %v322_v13  ;;  %v333_v19 = vadd.f32 %v563_v17, %v526_v6  ;;  %391 = vst.msk [vmem:[%s232_s21 + $0x18] sm:$0xf] %vm384_vm2, %v551_v15  ;;  %v549_v21 = vpack.c.bf16 %v338_v16, %v338_v16 }
  0xfa   : > { %v349_v22 = vadd.f32 %v567_v20, %v526_v6  ;;  %v324_v23 = vpop.f32.mrf.mxu0  ;;  %v340_v26 = vpop.f32.mrf.mxu1 }
  0xfb   : > { %385 = vst.msk [vmem:[%s232_s21] sm:$0xf] %vm384_vm2, %v545_v18  ;;  %v548_v24 = vpack.c.bf16 %v333_v19, %v333_v19  ;;  %v325_v25 = vadd.f32 %v526_v6, %v324_v23  ;;  %389 = vst.msk [vmem:[%s232_s21 + $0x10] sm:$0xf] %vm384_vm2, %v549_v21  ;;  %v341_v28 = vadd.f32 %v526_v6, %v340_v26 }
  0xfc   : > { %v552_v27 = vpack.c.bf16 %v349_v22, %v349_v22 }
  0xfd   : > { %388 = vst.msk [vmem:[%s232_s21 + $0xc] sm:$0xf] %vm384_vm2, %v548_v24  ;;  %v546_v29 = vpack.c.bf16 %v325_v25, %v325_v25  ;;  %v550_v30 = vpack.c.bf16 %v341_v28, %v341_v28 }
  0xfe   : > { %392 = vst.msk [vmem:[%s232_s21 + $0x1c] sm:$0xf] %vm384_vm2, %v552_v27 }
  0xff   : > { %386 = vst.msk [vmem:[%s232_s21 + $0x4] sm:$0xf] %vm384_vm2, %v546_v29  ;;  %390 = vst.msk [vmem:[%s232_s21 + $0x14] sm:$0xf] %vm384_vm2, %v550_v30 }
 0x100 PF: > { %s15_s16 = sadd.s32 1, %s735_s16   ;;  %s878_s12 = smov %s727_s14 }
 0x101   : > { %p12_p3 = scmp.ge.s32.totalorder %s15_s16, 10   ;;  %s879_s13 = smov %s731_s15 }
 0x102   : > { %s880_s14 = smov %s883_s18  ;;  %s881_s15 = smov %s887_s19 }
 0x103   :  { %14 = sbr.rel (!%p12_p3) target bundleno = 4 (0x4), region = 71 }
 0x108   :  { %422 = vsyncpa [#allocation3], 1 }
 0x109   :  { %424 = vsyncpa [#allocation3 + $0x1], 1 }
 0x10a   :  { %425 = vsyncpa [#allocation5], 1 }

// kernel: tile.29
= control target key start
LH: loop header
LB: loop body
LE: loop exit
PB: predicated region body
PF: predicated region fallthrough
CT: control target
= control target key end

     0   :  { %s133_s10 = smov 60   ;;  %s134_s11 = smov 52   ;;  %vm3_vm0 = vcmask 31744   ;;  %vm9_vm1 = vcmask 523744   ;;  %vm15_vm2 = vcmask 490944   ;;  %vm21_vm3 = vcmask 458144   ;;  %s209_s0 = inlined_call_operand.vmem [shape: f32[16,4], index: 0, kind: input, shape index: {}]   ;;  %s210_s1 = inlined_call_operand.vmem [shape: f32[1,1,64], index: 1, kind: output, shape index: {}]  }
   0x1   :  { %v103_v0 = vld [vmem:[%s209_s0 + $0xf] sm:$0x1]   ;;  %v105_v1 = vld [vmem:[%s209_s0 + $0xd] sm:$0x1]   ;;  %v104_v2 = vld [vmem:[%s209_s0 + $0xe] sm:$0x1]  }
   0x2   :  { %7 = vrot.lane.b32.xlu0 %v103_v0, %s133_s10  ;;  %19 = vrot.lane.b32.xlu1 %v105_v1, %s134_s11  ;;  %v106_v3 = vld [vmem:[%s209_s0 + $0xc] sm:$0x1]   ;;  %s135_s16 = smov 56   ;;  %s136_s17 = smov 48   ;;  %v107_v4 = vld [vmem:[%s209_s0 + $0xb] sm:$0x1]  }
   0x3   :  { %v108_v5 = vld [vmem:[%s209_s0 + $0xa] sm:$0x1]   ;;  %v2_v6 = vld [vmem:[%s209_s0] sm:$0x1]   ;;  %s137_s24 = smov 44   ;;  %s138_s25 = smov 40  }
   0x4   :  { %4 = vst.msk [vmem:[#allocation0] sm:$0x1] %vm3_vm0, %v2_v6   ;;  %v109_v7 = vld [vmem:[%s209_s0 + $0x9] sm:$0x1]   ;;  %v110_v8 = vld [vmem:[%s209_s0 + $0x8] sm:$0x1]  }
   0x5   :  { %s139_s30 = smov 36   ;;  %s140_s2 = smov 32   ;;  %v111_v9 = vld [vmem:[%s209_s0 + $0x7] sm:$0x1]   ;;  %v112_v10 = vld [vmem:[%s209_s0 + $0x6] sm:$0x1]  }
   0x6   :  { %13 = vrot.lane.b32.xlu0 %v104_v2, %s135_s16  ;;  %25 = vrot.lane.b32.xlu1 %v106_v3, %s136_s17  ;;  %s141_s7 = smov 28   ;;  %s142_s8 = smov 24   ;;  %v113_v11 = vld [vmem:[%s209_s0 + $0x5] sm:$0x1]   ;;  %v114_v12 = vld [vmem:[%s209_s0 + $0x4] sm:$0x1]  }
   0x7   :  { %s143_s13 = smov 20   ;;  %s144_s14 = smov 16   ;;  %v115_v13 = vld [vmem:[%s209_s0 + $0x3] sm:$0x1]   ;;  %v116_v14 = vld [vmem:[%s209_s0 + $0x2] sm:$0x1]  }
   0x8   :  { %s145_s19 = smov 12   ;;  %s146_s20 = smov 8   ;;  %v117_v15 = vld [vmem:[%s209_s0 + $0x1] sm:$0x1]   ;;  %vm27_vm4 = vcmask 425344   ;;  %vm33_vm5 = vcmask 392544  }
   0x9   :  { %s147_s0 = smov 4   ;;  %vm39_vm6 = vcmask 359744   ;;  %vm45_vm7 = vcmask 326944   ;;  %vm51_vm8 = vcmask 294144   ;;  %vm57_vm9 = vcmask 261344  }
   0xa   :  { %31 = vrot.lane.b32.xlu0 %v107_v4, %s137_s24  ;;  %37 = vrot.lane.b32.xlu1 %v108_v5, %s138_s25  ;;  %vm63_vm10 = vcmask 228544   ;;  %vm69_vm11 = vcmask 195744   ;;  %vm75_vm12 = vcmask 162944   ;;  %vm81_vm13 = vcmask 130144  }
   0xb   :  { %vm87_vm14 = vcmask 97344   ;;  %vm93_vm15 = vcmask 64544  }
   0xe   :  { %43 = vrot.lane.b32.xlu0 %v109_v7, %s139_s30  ;;  %49 = vrot.lane.b32.xlu1 %v110_v8, %s140_s2 }
  0x12   :  { %55 = vrot.lane.b32.xlu0 %v111_v9, %s141_s7  ;;  %61 = vrot.lane.b32.xlu1 %v112_v10, %s142_s8 }
  0x16   :  { %67 = vrot.lane.b32.xlu0 %v113_v11, %s143_s13  ;;  %73 = vrot.lane.b32.xlu1 %v114_v12, %s144_s14 }
  0x1a   :  { %79 = vrot.lane.b32.xlu0 %v115_v13, %s145_s19  ;;  %85 = vrot.lane.b32.xlu1 %v116_v14, %s146_s20 }
  0x1e   :  { %91 = vrot.lane.b32.xlu0 %v117_v15, %s147_s0 }
  0x74   :  { %v8_v16 = vpop.permute.xlu0 %7   ;;  %v20_v17 = vpop.permute.xlu1 %19  }
  0x75   :  { %10 = vst.msk [vmem:[#allocation0] sm:$0x1] %vm9_vm1, %v8_v16  }
  0x78   :  { %v14_v18 = vpop.permute.xlu0 %13   ;;  %v26_v19 = vpop.permute.xlu1 %25  }
  0x79   :  { %16 = vst.msk [vmem:[#allocation0] sm:$0x1] %vm15_vm2, %v14_v18  }
  0x7a   :  { %22 = vst.msk [vmem:[#allocation0] sm:$0x1] %vm21_vm3, %v20_v17  }
  0x7b   :  { %28 = vst.msk [vmem:[#allocation0] sm:$0x1] %vm27_vm4, %v26_v19  }
  0x7c   :  { %v32_v20 = vpop.permute.xlu0 %31   ;;  %v38_v21 = vpop.permute.xlu1 %37  }
  0x7d   :  { %34 = vst.msk [vmem:[#allocation0] sm:$0x1] %vm33_vm5, %v32_v20  }
  0x7e   :  { %40 = vst.msk [vmem:[#allocation0] sm:$0x1] %vm39_vm6, %v38_v21  }
  0x80   :  { %v44_v22 = vpop.permute.xlu0 %43   ;;  %v50_v23 = vpop.permute.xlu1 %49  }
  0x81   :  { %46 = vst.msk [vmem:[#allocation0] sm:$0x1] %vm45_vm7, %v44_v22  }
  0x82   :  { %52 = vst.msk [vmem:[#allocation0] sm:$0x1] %vm51_vm8, %v50_v23  }
  0x84   :  { %v56_v24 = vpop.permute.xlu0 %55   ;;  %v62_v25 = vpop.permute.xlu1 %61  }
  0x85   :  { %58 = vst.msk [vmem:[#allocation0] sm:$0x1] %vm57_vm9, %v56_v24  }
  0x86   :  { %64 = vst.msk [vmem:[#allocation0] sm:$0x1] %vm63_vm10, %v62_v25  }
  0x88   :  { %v68_v26 = vpop.permute.xlu0 %67   ;;  %v74_v27 = vpop.permute.xlu1 %73  }
  0x89   :  { %70 = vst.msk [vmem:[#allocation0] sm:$0x1] %vm69_vm11, %v68_v26  }
  0x8a   :  { %76 = vst.msk [vmem:[#allocation0] sm:$0x1] %vm75_vm12, %v74_v27  }
  0x8c   :  { %v80_v28 = vpop.permute.xlu0 %79   ;;  %v86_v29 = vpop.permute.xlu1 %85  }
  0x8d   :  { %82 = vst.msk [vmem:[#allocation0] sm:$0x1] %vm81_vm13, %v80_v28  }
  0x8e   :  { %88 = vst.msk [vmem:[#allocation0] sm:$0x1] %vm87_vm14, %v86_v29  }
  0x90   :  { %v92_v30 = vpop.permute.xlu0 %91  }
  0x91   :  { %94 = vst.msk [vmem:[#allocation0] sm:$0x1] %vm93_vm15, %v92_v30  }
  0x98   :  { %v99_v31 = vld [vmem:[#allocation0] sm:$0x1] }
  0x99   :  { %102 = vst [vmem:[%s210_s1] sm:$0x1] %v99_v31 }

// kernel: tile.28
= control target key start
LH: loop header
LB: loop body
LE: loop exit
PB: predicated region body
PF: predicated region fallthrough
CT: control target
= control target key end

     0   :  { %s28_s0 = inlined_call_operand.vmem [shape: f32[4], index: 0, kind: input, shape index: {}]   ;;  %s29_s1 = inlined_call_operand.vmem [shape: f32[16,4], index: 1, kind: output, shape index: {}]  }
   0x1   :  { %v4_v0 = vld [vmem:[%s28_s0] ss:$0 sm:$0xff] }
   0x2   :  { %5 = vst [vmem:[%s29_s1] sm:$0xff] %v4_v0  ;;  %8 = vst [vmem:[%s29_s1 + $0x8] sm:$0xff] %v4_v0 }

// kernel: tile.38
= control target key start
LH: loop header
LB: loop body
LE: loop exit
PB: predicated region body
PF: predicated region fallthrough
CT: control target
= control target key end

     0   :  { %s40_s0 = inlined_call_operand.vmem [shape: f32[4], index: 0, kind: input, shape index: {}]   ;;  %s41_s1 = inlined_call_operand.vmem [shape: f32[32,4], index: 1, kind: output, shape index: {}]  }
   0x1   :  { %v4_v0 = vld [vmem:[%s40_s0] ss:$0 sm:$0xff] }
   0x2   :  { %5 = vst [vmem:[%s41_s1] sm:$0xff] %v4_v0  ;;  %12 = vst [vmem:[%s41_s1 + $0x8] sm:$0xff] %v4_v0 }
   0x3   :  { %13 = vst [vmem:[%s41_s1 + $0x10] sm:$0xff] %v4_v0  ;;  %14 = vst [vmem:[%s41_s1 + $0x18] sm:$0xff] %v4_v0 }

// kernel: tile.39
= control target key start
LH: loop header
LB: loop body
LE: loop exit
PB: predicated region body
PF: predicated region fallthrough
CT: control target
= control target key end

     0   :  { %s261_s10 = smov 124   ;;  %s262_s11 = smov 116   ;;  %vm3_vm0 = vcmask 31744   ;;  %vm9_vm1 = vcmask 1048544   ;;  %vm15_vm2 = vcmask 1015744   ;;  %vm21_vm3 = vcmask 982944   ;;  %s401_s0 = inlined_call_operand.vmem [shape: f32[32,4], index: 0, kind: input, shape index: {}]   ;;  %s402_s1 = inlined_call_operand.vmem [shape: f32[1,128], index: 1, kind: output, shape index: {}]  }
   0x1   :  { %v199_v0 = vld [vmem:[%s401_s0 + $0x1f] sm:$0x1]   ;;  %v201_v1 = vld [vmem:[%s401_s0 + $0x1d] sm:$0x1]   ;;  %v200_v2 = vld [vmem:[%s401_s0 + $0x1e] sm:$0x1]  }
   0x2   :  { %7 = vrot.lane.b32.xlu0 %v199_v0, %s261_s10  ;;  %19 = vrot.lane.b32.xlu1 %v201_v1, %s262_s11  ;;  %v202_v3 = vld [vmem:[%s401_s0 + $0x1c] sm:$0x1]   ;;  %s263_s16 = smov 120   ;;  %s264_s17 = smov 112   ;;  %v203_v4 = vld [vmem:[%s401_s0 + $0x1b] sm:$0x1]  }
   0x3   :  { %v204_v5 = vld [vmem:[%s401_s0 + $0x1a] sm:$0x1]   ;;  %s265_s22 = smov 108   ;;  %s266_s23 = smov 104   ;;  %v205_v6 = vld [vmem:[%s401_s0 + $0x19] sm:$0x1]  }
   0x4   :  { %v206_v7 = vld [vmem:[%s401_s0 + $0x18] sm:$0x1]   ;;  %s267_s28 = smov 100   ;;  %s268_s29 = smov 96   ;;  %v207_v8 = vld [vmem:[%s401_s0 + $0x17] sm:$0x1]  }
   0x5   :  { %v208_v9 = vld [vmem:[%s401_s0 + $0x16] sm:$0x1]   ;;  %v2_v10 = vld [vmem:[%s401_s0] sm:$0x1]   ;;  %s269_s7 = smov 92   ;;  %s270_s8 = smov 88  }
   0x6   :  { %13 = vrot.lane.b32.xlu0 %v200_v2, %s263_s16  ;;  %25 = vrot.lane.b32.xlu1 %v202_v3, %s264_s17  ;;  %4 = vst.msk [vmem:[#allocation0] sm:$0x1] %vm3_vm0, %v2_v10   ;;  %v209_v11 = vld [vmem:[%s401_s0 + $0x15] sm:$0x1]   ;;  %v210_v12 = vld [vmem:[%s401_s0 + $0x14] sm:$0x1]  }
   0x7   :  { %s271_s13 = smov 84   ;;  %s272_s14 = smov 80   ;;  %v211_v13 = vld [vmem:[%s401_s0 + $0x13] sm:$0x1]   ;;  %v212_v14 = vld [vmem:[%s401_s0 + $0x12] sm:$0x1]  }
   0x8   :  { %s273_s19 = smov 76   ;;  %s274_s20 = smov 72   ;;  %v213_v15 = vld [vmem:[%s401_s0 + $0x11] sm:$0x1]   ;;  %v214_v16 = vld [vmem:[%s401_s0 + $0x10] sm:$0x1]  }
   0x9   :  { %s275_s25 = smov 68   ;;  %s276_s26 = smov 64   ;;  %v215_v17 = vld [vmem:[%s401_s0 + $0xf] sm:$0x1]   ;;  %v216_v18 = vld [vmem:[%s401_s0 + $0xe] sm:$0x1]  }
   0xa   :  { %31 = vrot.lane.b32.xlu0 %v203_v4, %s265_s22  ;;  %37 = vrot.lane.b32.xlu1 %v204_v5, %s266_s23  ;;  %s277_s2 = smov 60   ;;  %s278_s3 = smov 56   ;;  %v217_v19 = vld [vmem:[%s401_s0 + $0xd] sm:$0x1]   ;;  %v218_v20 = vld [vmem:[%s401_s0 + $0xc] sm:$0x1]  }
   0xb   :  { %s280_s9 = smov 48   ;;  %v219_v21 = vld [vmem:[%s401_s0 + $0xb] sm:$0x1]   ;;  %v220_v22 = vld [vmem:[%s401_s0 + $0xa] sm:$0x1]   ;;  %s282_s15 = smov 40  }
   0xc   :  { %v221_v23 = vld [vmem:[%s401_s0 + $0x9] sm:$0x1]   ;;  %v222_v24 = vld [vmem:[%s401_s0 + $0x8] sm:$0x1]   ;;  %s284_s21 = smov 32   ;;  %s286_s27 = smov 24  }
   0xd   :  { %v223_v25 = vld [vmem:[%s401_s0 + $0x7] sm:$0x1]   ;;  %v224_v26 = vld [vmem:[%s401_s0 + $0x6] sm:$0x1]   ;;  %v225_v27 = vld [vmem:[%s401_s0 + $0x5] sm:$0x1]  }
   0xe   :  { %43 = vrot.lane.b32.xlu0 %v205_v6, %s267_s28  ;;  %49 = vrot.lane.b32.xlu1 %v206_v7, %s268_s29  ;;  %v226_v28 = vld [vmem:[%s401_s0 + $0x4] sm:$0x1]   ;;  %s288_s4 = smov 16   ;;  %v227_v29 = vld [vmem:[%s401_s0 + $0x3] sm:$0x1]   ;;  %s290_s10 = smov 8  }
   0xf   :  { %v228_v30 = vld [vmem:[%s401_s0 + $0x2] sm:$0x1]   ;;  %v229_v31 = vld [vmem:[%s401_s0 + $0x1] sm:$0x1]   ;;  %s291_s0 = smov 4   ;;  %vm27_vm4 = vcmask 950144  }
  0x10   :  { %vm33_vm5 = vcmask 917344   ;;  %vm39_vm6 = vcmask 884544   ;;  %vm45_vm7 = vcmask 851744   ;;  %vm51_vm8 = vcmask 818944  }
  0x11   :  { %vm57_vm9 = vcmask 786144   ;;  %vm63_vm10 = vcmask 753344   ;;  %vm69_vm11 = vcmask 720544   ;;  %vm75_vm12 = vcmask 687744  }
  0x12   :  { %55 = vrot.lane.b32.xlu0 %v207_v8, %s269_s7  ;;  %61 = vrot.lane.b32.xlu1 %v208_v9, %s270_s8  ;;  %s279_s8 = smov 52   ;;  %vm81_vm13 = vcmask 654944   ;;  %vm87_vm14 = vcmask 622144   ;;  %vm93_vm15 = vcmask 589344   ;;  %vm99_vm0 = vcmask 556544  }
  0x16   :  { %67 = vrot.lane.b32.xlu0 %v209_v11, %s271_s13  ;;  %73 = vrot.lane.b32.xlu1 %v210_v12, %s272_s14  ;;  %s281_s14 = smov 44  }
  0x1a   :  { %79 = vrot.lane.b32.xlu0 %v211_v13, %s273_s19  ;;  %85 = vrot.lane.b32.xlu1 %v212_v14, %s274_s20  ;;  %s283_s20 = smov 36  }
  0x1e   :  { %91 = vrot.lane.b32.xlu0 %v213_v15, %s275_s25  ;;  %97 = vrot.lane.b32.xlu1 %v214_v16, %s276_s26  ;;  %s285_s26 = smov 28  }
  0x22   :  { %103 = vrot.lane.b32.xlu0 %v215_v17, %s277_s2  ;;  %109 = vrot.lane.b32.xlu1 %v216_v18, %s278_s3  ;;  %s287_s3 = smov 20  }
  0x26   :  { %115 = vrot.lane.b32.xlu0 %v217_v19, %s279_s8  ;;  %121 = vrot.lane.b32.xlu1 %v218_v20, %s280_s9  ;;  %s289_s9 = smov 12  }
  0x2a   :  { %127 = vrot.lane.b32.xlu0 %v219_v21, %s281_s14  ;;  %133 = vrot.lane.b32.xlu1 %v220_v22, %s282_s15 }
  0x2e   :  { %139 = vrot.lane.b32.xlu0 %v221_v23, %s283_s20  ;;  %145 = vrot.lane.b32.xlu1 %v222_v24, %s284_s21 }
  0x32   :  { %151 = vrot.lane.b32.xlu0 %v223_v25, %s285_s26  ;;  %157 = vrot.lane.b32.xlu1 %v224_v26, %s286_s27 }
  0x36   :  { %163 = vrot.lane.b32.xlu0 %v225_v27, %s287_s3  ;;  %169 = vrot.lane.b32.xlu1 %v226_v28, %s288_s4 }
  0x3a   :  { %175 = vrot.lane.b32.xlu0 %v227_v29, %s289_s9  ;;  %181 = vrot.lane.b32.xlu1 %v228_v30, %s290_s10 }
  0x3e   :  { %187 = vrot.lane.b32.xlu0 %v229_v31, %s291_s0 }
  0x74   :  { %v8_v32 = vpop.permute.xlu0 %7   ;;  %v20_v33 = vpop.permute.xlu1 %19  }
  0x75   :  { %10 = vst.msk [vmem:[#allocation0] sm:$0x1] %vm9_vm1, %v8_v32   ;;  %vm105_vm1 = vcmask 523744  }
  0x78   :  { %v14_v34 = vpop.permute.xlu0 %13   ;;  %v26_v35 = vpop.permute.xlu1 %25  }
  0x79   :  { %16 = vst.msk [vmem:[#allocation0] sm:$0x1] %vm15_vm2, %v14_v34   ;;  %vm111_vm2 = vcmask 490944  }
  0x7a   :  { %22 = vst.msk [vmem:[#allocation0] sm:$0x1] %vm21_vm3, %v20_v33   ;;  %vm117_vm3 = vcmask 458144  }
  0x7b   :  { %28 = vst.msk [vmem:[#allocation0] sm:$0x1] %vm27_vm4, %v26_v35   ;;  %vm123_vm4 = vcmask 425344  }
  0x7c   :  { %v32_v36 = vpop.permute.xlu0 %31   ;;  %v38_v37 = vpop.permute.xlu1 %37  }
  0x7d   :  { %34 = vst.msk [vmem:[#allocation0] sm:$0x1] %vm33_vm5, %v32_v36   ;;  %vm129_vm5 = vcmask 392544  }
  0x7e   :  { %40 = vst.msk [vmem:[#allocation0] sm:$0x1] %vm39_vm6, %v38_v37   ;;  %vm135_vm6 = vcmask 359744  }
  0x80   :  { %v44_v38 = vpop.permute.xlu0 %43   ;;  %v50_v39 = vpop.permute.xlu1 %49  }
  0x81   :  { %46 = vst.msk [vmem:[#allocation0] sm:$0x1] %vm45_vm7, %v44_v38   ;;  %vm141_vm7 = vcmask 326944  }
  0x82   :  { %52 = vst.msk [vmem:[#allocation0] sm:$0x1] %vm51_vm8, %v50_v39   ;;  %vm147_vm8 = vcmask 294144  }
  0x84   :  { %v56_v40 = vpop.permute.xlu0 %55   ;;  %v62_v41 = vpop.permute.xlu1 %61  }
  0x85   :  { %58 = vst.msk [vmem:[#allocation0] sm:$0x1] %vm57_vm9, %v56_v40   ;;  %vm153_vm9 = vcmask 261344  }
  0x86   :  { %64 = vst.msk [vmem:[#allocation0] sm:$0x1] %vm63_vm10, %v62_v41   ;;  %vm159_vm10 = vcmask 228544  }
  0x88   :  { %v68_v42 = vpop.permute.xlu0 %67   ;;  %v74_v43 = vpop.permute.xlu1 %73  }
  0x89   :  { %70 = vst.msk [vmem:[#allocation0] sm:$0x1] %vm69_vm11, %v68_v42   ;;  %vm165_vm11 = vcmask 195744  }
  0x8a   :  { %76 = vst.msk [vmem:[#allocation0] sm:$0x1] %vm75_vm12, %v74_v43   ;;  %vm171_vm12 = vcmask 162944  }
  0x8c   :  { %v80_v44 = vpop.permute.xlu0 %79   ;;  %v86_v45 = vpop.permute.xlu1 %85  }
  0x8d   :  { %82 = vst.msk [vmem:[#allocation0] sm:$0x1] %vm81_vm13, %v80_v44   ;;  %vm177_vm13 = vcmask 130144  }
  0x8e   :  { %88 = vst.msk [vmem:[#allocation0] sm:$0x1] %vm87_vm14, %v86_v45   ;;  %vm183_vm14 = vcmask 97344  }
  0x90   :  { %v92_v46 = vpop.permute.xlu0 %91   ;;  %v98_v47 = vpop.permute.xlu1 %97  }
  0x91   :  { %94 = vst.msk [vmem:[#allocation0] sm:$0x1] %vm93_vm15, %v92_v46   ;;  %vm189_vm15 = vcmask 64544  }
  0x92   :  { %100 = vst.msk [vmem:[#allocation0] sm:$0x1] %vm99_vm0, %v98_v47  }
  0x94   :  { %v104_v48 = vpop.permute.xlu0 %103   ;;  %v110_v49 = vpop.permute.xlu1 %109  }
  0x95   :  { %106 = vst.msk [vmem:[#allocation0] sm:$0x1] %vm105_vm1, %v104_v48  }
  0x96   :  { %112 = vst.msk [vmem:[#allocation0] sm:$0x1] %vm111_vm2, %v110_v49  }
  0x98   :  { %v116_v50 = vpop.permute.xlu0 %115   ;;  %v122_v51 = vpop.permute.xlu1 %121  }
  0x99   :  { %118 = vst.msk [vmem:[#allocation0] sm:$0x1] %vm117_vm3, %v116_v50  }
  0x9a   :  { %124 = vst.msk [vmem:[#allocation0] sm:$0x1] %vm123_vm4, %v122_v51  }
  0x9c   :  { %v128_v52 = vpop.permute.xlu0 %127   ;;  %v134_v53 = vpop.permute.xlu1 %133  }
  0x9d   :  { %130 = vst.msk [vmem:[#allocation0] sm:$0x1] %vm129_vm5, %v128_v52  }
  0x9e   :  { %136 = vst.msk [vmem:[#allocation0] sm:$0x1] %vm135_vm6, %v134_v53  }
  0xa0   :  { %v140_v54 = vpop.permute.xlu0 %139   ;;  %v146_v55 = vpop.permute.xlu1 %145  }
  0xa1   :  { %142 = vst.msk [vmem:[#allocation0] sm:$0x1] %vm141_vm7, %v140_v54  }
  0xa2   :  { %148 = vst.msk [vmem:[#allocation0] sm:$0x1] %vm147_vm8, %v146_v55  }
  0xa4   :  { %v152_v56 = vpop.permute.xlu0 %151   ;;  %v158_v57 = vpop.permute.xlu1 %157  }
  0xa5   :  { %154 = vst.msk [vmem:[#allocation0] sm:$0x1] %vm153_vm9, %v152_v56  }
  0xa6   :  { %160 = vst.msk [vmem:[#allocation0] sm:$0x1] %vm159_vm10, %v158_v57  }
  0xa8   :  { %v164_v58 = vpop.permute.xlu0 %163   ;;  %v170_v59 = vpop.permute.xlu1 %169  }
  0xa9   :  { %166 = vst.msk [vmem:[#allocation0] sm:$0x1] %vm165_vm11, %v164_v58  }
  0xaa   :  { %172 = vst.msk [vmem:[#allocation0] sm:$0x1] %vm171_vm12, %v170_v59  }
  0xac   :  { %v176_v60 = vpop.permute.xlu0 %175   ;;  %v182_v61 = vpop.permute.xlu1 %181  }
  0xad   :  { %178 = vst.msk [vmem:[#allocation0] sm:$0x1] %vm177_vm13, %v176_v60  }
  0xae   :  { %184 = vst.msk [vmem:[#allocation0] sm:$0x1] %vm183_vm14, %v182_v61  }
  0xb0   :  { %v188_v62 = vpop.permute.xlu0 %187  }
  0xb1   :  { %190 = vst.msk [vmem:[#allocation0] sm:$0x1] %vm189_vm15, %v188_v62  }
  0xb8   :  { %v195_v63 = vld [vmem:[#allocation0] sm:$0x1] }
  0xb9   :  { %198 = vst [vmem:[%s402_s1] sm:$0x1] %v195_v63 }

// kernel: decoder_block_forward.7
= control target key start
LH: loop header
LB: loop body
LE: loop exit
PB: predicated region body
PF: predicated region fallthrough
CT: control target
= control target key end

     0   :  { %s303_s0 = inlined_call_operand.vmem [shape: bf16[128,128], index: 0, kind: input, shape index: {}]   ;;  %s304_s1 = inlined_call_operand.vmem [shape: f32[1,128], index: 1, kind: input, shape index: {}]   ;;  %s305_s2 = inlined_call_operand.vmem [shape: f32[1,128], index: 2, kind: input, shape index: {}]   ;;  %s306_s3 = inlined_call_operand.vmem [shape: f32[128,128], index: 3, kind: output, shape index: {}]  }
   0x1   :  { %v131_v0 = vld [vmem:[%s303_s0] sm:$0xff]   ;;  %v162_v4 = vld [vmem:[%s303_s0 + $0x8] sm:$0xff]   ;;  %v163_v5 = vld [vmem:[%s303_s0 + $0x10] sm:$0xff]  }
   0x2   :  { %v195_v1 = vld [vmem:[%s304_s1] ss:$0 sm:$0xff]  ;;  %v132_v2 = vunpack.c.l.bf16 %v131_v0  ;;  %v133_v3 = vunpack.c.h.bf16 %v131_v0  ;;  %v164_v6 = vld [vmem:[%s303_s0 + $0x18] sm:$0xff]   ;;  %v136_v8 = vunpack.c.l.bf16 %v162_v4  ;;  %v137_v9 = vunpack.c.h.bf16 %v162_v4  ;;  %v166_v33 = vld [vmem:[%s303_s0 + $0x28] sm:$0xff]  }
   0x3   :  { %v209_v7 = vld [vmem:[%s305_s2] ss:$0 sm:$0xff]  ;;  %v140_v10 = vunpack.c.l.bf16 %v163_v5  ;;  %v141_v11 = vunpack.c.h.bf16 %v163_v5  ;;  %v144_v14 = vunpack.c.l.bf16 %v164_v6  ;;  %v145_v15 = vunpack.c.h.bf16 %v164_v6  ;;  %v167_v34 = vld [vmem:[%s303_s0 + $0x30] sm:$0xff]   ;;  %v168_v39 = vld [vmem:[%s303_s0 + $0x38] sm:$0xff]  }
   0x4   :  { %v53_v12 = vmul.f32 %v132_v2, %v195_v1  ;;  %v54_v13 = vmul.f32 %v133_v3, %v195_v1  ;;  %v55_v16 = vmul.f32 %v136_v8, %v195_v1  ;;  %v56_v17 = vmul.f32 %v137_v9, %v195_v1  ;;  %v165_v28 = vld [vmem:[%s303_s0 + $0x20] sm:$0xff]  }
   0x5   :  { %v57_v18 = vmul.f32 %v140_v10, %v195_v1  ;;  %v58_v19 = vmul.f32 %v141_v11, %v195_v1  ;;  %v59_v22 = vmul.f32 %v144_v14, %v195_v1  ;;  %v60_v23 = vmul.f32 %v145_v15, %v195_v1 }
   0x6   :  { %v76_v20 = vadd.f32 %v209_v7, %v53_v12  ;;  %v77_v21 = vadd.f32 %v209_v7, %v54_v13  ;;  %v78_v24 = vadd.f32 %v209_v7, %v55_v16  ;;  %v79_v25 = vadd.f32 %v209_v7, %v56_v17 }
   0x7   :  { %v80_v26 = vadd.f32 %v209_v7, %v57_v18  ;;  %v81_v27 = vadd.f32 %v209_v7, %v58_v19  ;;  %v82_v31 = vadd.f32 %v209_v7, %v59_v22  ;;  %v83_v32 = vadd.f32 %v209_v7, %v60_v23 }
   0x8   :  { %v92_v29 = vmax.f32 %v76_v20, 0.0  ;;  %v93_v30 = vmax.f32 %v77_v21, 0.0  ;;  %v94_v35 = vmax.f32 %v78_v24, 0.0  ;;  %v95_v36 = vmax.f32 %v79_v25, 0.0 }
   0x9   :  { %v96_v37 = vmax.f32 %v80_v26, 0.0  ;;  %v97_v38 = vmax.f32 %v81_v27, 0.0  ;;  %v98_v40 = vmax.f32 %v82_v31, 0.0  ;;  %v99_v41 = vmax.f32 %v83_v32, 0.0 }
   0xa   :  { %108 = vst [vmem:[%s306_s3] sm:$0xff] %v92_v29  ;;  %109 = vst [vmem:[%s306_s3 + $0x8] sm:$0xff] %v93_v30  ;;  %v148_v42 = vunpack.c.l.bf16 %v165_v28  ;;  %v149_v43 = vunpack.c.h.bf16 %v165_v28  ;;  %v152_v44 = vunpack.c.l.bf16 %v166_v33  ;;  %v153_v45 = vunpack.c.h.bf16 %v166_v33 }
   0xb   :  { %110 = vst [vmem:[%s306_s3 + $0x10] sm:$0xff] %v94_v35  ;;  %111 = vst [vmem:[%s306_s3 + $0x18] sm:$0xff] %v95_v36  ;;  %v156_v46 = vunpack.c.l.bf16 %v167_v34  ;;  %v157_v47 = vunpack.c.h.bf16 %v167_v34  ;;  %v160_v50 = vunpack.c.l.bf16 %v168_v39  ;;  %v161_v51 = vunpack.c.h.bf16 %v168_v39 }
   0xc   :  { %112 = vst [vmem:[%s306_s3 + $0x20] sm:$0xff] %v96_v37  ;;  %113 = vst [vmem:[%s306_s3 + $0x28] sm:$0xff] %v97_v38  ;;  %v61_v48 = vmul.f32 %v148_v42, %v195_v1  ;;  %v62_v49 = vmul.f32 %v149_v43, %v195_v1  ;;  %v63_v52 = vmul.f32 %v152_v44, %v195_v1 }
   0xd   :  { %114 = vst [vmem:[%s306_s3 + $0x30] sm:$0xff] %v98_v40  ;;  %115 = vst [vmem:[%s306_s3 + $0x38] sm:$0xff] %v99_v41  ;;  %v64_v53 = vmul.f32 %v153_v45, %v195_v1  ;;  %v65_v54 = vmul.f32 %v156_v46, %v195_v1  ;;  %v66_v55 = vmul.f32 %v157_v47, %v195_v1 }
   0xe   :  { %v84_v56 = vadd.f32 %v209_v7, %v61_v48  ;;  %v85_v57 = vadd.f32 %v209_v7, %v62_v49  ;;  %v67_v58 = vmul.f32 %v160_v50, %v195_v1  ;;  %v68_v59 = vmul.f32 %v161_v51, %v195_v1 }
   0xf   :  { %v86_v60 = vadd.f32 %v209_v7, %v63_v52  ;;  %v87_v61 = vadd.f32 %v209_v7, %v64_v53  ;;  %v88_v62 = vadd.f32 %v209_v7, %v65_v54  ;;  %v89_v63 = vadd.f32 %v209_v7, %v66_v55 }
  0x10   :  { %v100_v0 = vmax.f32 %v84_v56, 0.0  ;;  %v101_v2 = vmax.f32 %v85_v57, 0.0  ;;  %v90_v3 = vadd.f32 %v209_v7, %v67_v58  ;;  %v91_v4 = vadd.f32 %v209_v7, %v68_v59 }
  0x11   :  { %v102_v5 = vmax.f32 %v86_v60, 0.0  ;;  %v103_v6 = vmax.f32 %v87_v61, 0.0  ;;  %v104_v8 = vmax.f32 %v88_v62, 0.0  ;;  %v105_v9 = vmax.f32 %v89_v63, 0.0 }
  0x12   :  { %116 = vst [vmem:[%s306_s3 + $0x40] sm:$0xff] %v100_v0  ;;  %117 = vst [vmem:[%s306_s3 + $0x48] sm:$0xff] %v101_v2  ;;  %v106_v1 = vmax.f32 %v90_v3, 0.0  ;;  %v107_v10 = vmax.f32 %v91_v4, 0.0 }
  0x13   :  { %118 = vst [vmem:[%s306_s3 + $0x50] sm:$0xff] %v102_v5  ;;  %119 = vst [vmem:[%s306_s3 + $0x58] sm:$0xff] %v103_v6 }
  0x14   :  { %120 = vst [vmem:[%s306_s3 + $0x60] sm:$0xff] %v104_v8  ;;  %121 = vst [vmem:[%s306_s3 + $0x68] sm:$0xff] %v105_v9 }
  0x15   :  { %122 = vst [vmem:[%s306_s3 + $0x70] sm:$0xff] %v106_v1  ;;  %123 = vst [vmem:[%s306_s3 + $0x78] sm:$0xff] %v107_v10 }

// kernel: decoder_block_forward.6
= control target key start
LH: loop header
LB: loop body
LE: loop exit
PB: predicated region body
PF: predicated region fallthrough
CT: control target
= control target key end

     0   :  { %s2636_s24 = smov 0   ;;  %s2638_s25 = smov 0   ;;  %s3210_s0 = inlined_call_operand.vmem [shape: bf16[2,8,16,64], index: 0, kind: input, shape index: {}]   ;;  %s3211_s1 = inlined_call_operand.vmem [shape: f32[1,1,64], index: 1, kind: input, shape index: {}]   ;;  %s3212_s2 = inlined_call_operand.vmem [shape: f32[1,1,64], index: 2, kind: input, shape index: {}]   ;;  %s3213_s3 = inlined_call_operand.vmem [shape: bf16[9,64,64], index: 3, kind: input, shape index: {}]   ;;  %s3214_s4 = inlined_call_operand.vmem [shape: f32[1,64], index: 4, kind: input, shape index: {}]   ;;  %s3215_s5 = inlined_call_operand.vmem [shape: bf16[2,8,16,64], index: 5, kind: output, shape index: {0}]   ;;  %s3216_s6 = inlined_call_operand.vmem [shape: f32[2,1,64], index: 6, kind: output, shape index: {1}]   ;;  %s3217_s7 = inlined_call_operand.vmem [shape: f32[2,1,64], index: 7, kind: output, shape index: {2}]  }
   0x1   :  { %s2640_s26 = smov 0   ;;  %s2642_s27 = smov 0  }
   0x2   :  { %s2644_s28 = smov 0  }
   0x3 LB: > { %s27_s29 = sadd.s32 1, %s2584_s26  ;;  %s30_s30 = sadd.s32 1, %s2588_s27  ;;  %s2592_s28 = sphi %s2644_s28, %s18_s28   ;;  %s2588_s27 = sphi %s2642_s27, %s3235_s27   ;;  %s2584_s26 = sphi %s2640_s26, %s3234_s26   ;;  %s2580_s25 = sphi %s2638_s25, %s3233_s25   ;;  %s2576_s24 = sphi %s2636_s24, %s3232_s24  }
   0x4   : > { %p28_p0 = scmp.ge.s32.totalorder %s27_s29, 3  ;;  %p2170_p1 = scmp.ge.s32.totalorder %s2592_s28, 1 }
   0x5   : > { %p266_p2 = scmp.lt.s32.totalorder %s2592_s28, 7 }
   0x6   : > { %s3237_s29 = smov (%p28_p0, %s27_s29), 0  ;;  %s3239_s30 = smov (!%p28_p0, %s30_s30), %s2588_s27 }
   0x7   : > { %p267_p3 = pnand %p2170_p1, %p266_p2  ;;  %p32_p4 = scmp.ge.s32.totalorder %s3239_s30, 2 }
   0x8   : > { %p310_p5 = scmp.lt.s32.totalorder (!%p267_p3), %s2580_s25, 1  ;;  %s315_s8 = smul.u32 (!%p267_p3), 3, %s2576_s24 }
   0x9   : > { %s3241_s30 = smov (%p32_p4, %s3239_s30), 0  ;;  %270 = sbr.rel (%p267_p3) target bundleno = 414 (0x19e), region = 40 }
   0xa   : > { %3218 = sst [smem:[#allocation4_spill]] %s3241_s30  ;;  %p316_p6 = scmp.lt.s32.totalorder (!%p267_p3), %s315_s8, 8 }
   0xb   : > { %p2177_p7 = scmp.ne.s32.totalorder (!%p267_p3), %s2576_s24, 0 }
   0xe   : > { %s3243_s25 = smov (!%p310_p5, %s2580_s25), 1  ;;  %s3245_s8 = smov (!%p316_p6, %s315_s8), 8 }
   0xf   : > { %s2301_s9 = sshll.u32 %s3243_s25, 6  ;;  %s329_s12 = scalar_lea.vmem %s3216_s6, %s3243_s25 }
  0x10   : > { %s2679_s15 = scalar_lea.vmem %s3210_s0, %s2301_s9  ;;  %s2684_s18 = scalar_lea.vmem %s3215_s5, %s2301_s9 }
  0x11   : > { %s332_s21 = scalar_lea.vmem %s3217_s7, %s3243_s25  ;;  %s2302_s22 = sshll.u32 %s3245_s8, 5 }
  0x12   : > { %s2693_s10 = scalar_lea.vmem %s3213_s3, %s2302_s22  ;;  %337 = sbr.rel (%p2177_p7) target bundleno = 92 (0x5c), region = 44 }
  0x17   : > { %vm341_vm0 = vcmask 516096   ;;  %vm349_vm1 = vsmask.f32 256  ;;  %v351_v0 = vld [vmem:[#allocation2 + $0xc] sm:$0x1]  ;;  %vm338_vm2 = vcmask 519168  }
  0x18   : > { %vm2698_vm3 = vmand %vm341_vm0, %vm349_vm1  ;;  %v354_v2 = vld [vmem:[#allocation2 + $0x18] sm:$0x1]  ;;  %v357_v3 = vld [vmem:[#allocation2 + $0x24] sm:$0x1]  ;;  %vm375_vm4 = vsmask.f32 7938 }
  0x19   : > { %v352_v4 = vsel %vm2698_vm3, 0, %v351_v0  ;;  %v355_v5 = vsel %vm2698_vm3, 0, %v354_v2  ;;  %v358_v6 = vsel %vm2698_vm3, 0, %v357_v3  ;;  %v360_v7 = vld [vmem:[#allocation2 + $0x30] sm:$0x1]  ;;  %vm2712_vm5 = vmand %vm341_vm0, %vm375_vm4  ;;  %v2594_v12 = vmov 0  }
  0x1a   : > { %353 = vst [vmem:[#allocation2 + $0xc] sm:$0x1] %v352_v4  ;;  %356 = vst [vmem:[#allocation2 + $0x18] sm:$0x1] %v355_v5  ;;  %v361_v8 = vsel %vm2698_vm3, 0, %v360_v7  ;;  %vm763_vm6 = vcmask 523264  }
  0x1b   : > { %359 = vst [vmem:[#allocation2 + $0x24] sm:$0x1] %v358_v6  ;;  %v363_v9 = vld [vmem:[#allocation2 + $0x3c] sm:$0x1]  ;;  %v366_v10 = vld [vmem:[#allocation2 + $0x48] sm:$0x1]  ;;  %vm2794_vm8 = vmand %vm338_vm2, %vm375_vm4 }
  0x1c   : > { %339 = vst.msk [vmem:[#allocation2] sm:$0xf] %vm338_vm2, %v2594_v12  ;;  %340 = vst.msk [vmem:[#allocation2 + $0x4] sm:$0xf] %vm338_vm2, %v2594_v12  ;;  %v364_v13 = vsel %vm2698_vm3, 0, %v363_v9  ;;  %v367_v14 = vsel %vm2698_vm3, 0, %v366_v10 }
  0x1d   : > { %342 = vst.msk [vmem:[#allocation2 + $0x8] sm:$0x1] %vm341_vm0, %v2594_v12  ;;  %346 = vst.msk [vmem:[#allocation2 + $0x74] sm:$0x1] %vm341_vm0, %v2594_v12  ;;  %v369_v15 = vld [vmem:[#allocation2 + $0x54] sm:$0x1] }
  0x1e   : > { %344 = vst.msk [vmem:[#allocation2 + $0x6c] sm:$0xf] %vm338_vm2, %v2594_v12  ;;  %345 = vst.msk [vmem:[#allocation2 + $0x70] sm:$0xf] %vm338_vm2, %v2594_v12  ;;  %v372_v16 = vld [vmem:[#allocation2 + $0x60] sm:$0x1] }
  0x1f   : > { %362 = vst [vmem:[#allocation2 + $0x30] sm:$0x1] %v361_v8  ;;  %365 = vst [vmem:[#allocation2 + $0x3c] sm:$0x1] %v364_v13  ;;  %v370_v17 = vsel %vm2698_vm3, 0, %v369_v15  ;;  %v373_v18 = vsel %vm2698_vm3, 0, %v372_v16 }
  0x20   : > { %368 = vst [vmem:[#allocation2 + $0x48] sm:$0x1] %v367_v14  ;;  %v377_v19 = vld [vmem:[#allocation2 + $0x14] sm:$0x1]  ;;  %v380_v20 = vld [vmem:[#allocation2 + $0x20] sm:$0x1] }
  0x21   : > { %371 = vst [vmem:[#allocation2 + $0x54] sm:$0x1] %v370_v17  ;;  %374 = vst [vmem:[#allocation2 + $0x60] sm:$0x1] %v373_v18  ;;  %v378_v21 = vsel %vm2712_vm5, 0, %v377_v19  ;;  %v381_v22 = vsel %vm2712_vm5, 0, %v380_v20 }
  0x22   : > { %v383_v23 = vld [vmem:[#allocation2 + $0x2c] sm:$0x1]  ;;  %v386_v24 = vld [vmem:[#allocation2 + $0x38] sm:$0x1]  ;;  %379 = vst [vmem:[#allocation2 + $0x14] sm:$0x1] %v378_v21 }
  0x23   : > { %382 = vst [vmem:[#allocation2 + $0x20] sm:$0x1] %v381_v22  ;;  %v384_v25 = vsel %vm2712_vm5, 0, %v383_v23  ;;  %v387_v26 = vsel %vm2712_vm5, 0, %v386_v24  ;;  %v389_v27 = vld [vmem:[#allocation2 + $0x44] sm:$0x1] }
  0x24   : > { %v392_v28 = vld [vmem:[#allocation2 + $0x50] sm:$0x1]  ;;  %385 = vst [vmem:[#allocation2 + $0x2c] sm:$0x1] %v384_v25  ;;  %388 = vst [vmem:[#allocation2 + $0x38] sm:$0x1] %v387_v26 }
  0x25   : > { %v390_v29 = vsel %vm2712_vm5, 0, %v389_v27  ;;  %v393_v30 = vsel %vm2712_vm5, 0, %v392_v28  ;;  %v395_v31 = vld [vmem:[#allocation2 + $0x5c] sm:$0x1]  ;;  %v398_v32 = vld [vmem:[#allocation2 + $0x68] sm:$0x1] }
  0x26   : > { %391 = vst [vmem:[#allocation2 + $0x44] sm:$0x1] %v390_v29  ;;  %394 = vst [vmem:[#allocation2 + $0x50] sm:$0x1] %v393_v30  ;;  %v396_v33 = vsel %vm2712_vm5, 0, %v395_v31  ;;  %v399_v34 = vsel %vm2712_vm5, 0, %v398_v32 }
  0x27   : > { %v2338_v35 = vld [vmem:[%s2679_s15] sm:$0xff]   ;;  %v2369_v37 = vld [vmem:[%s2679_s15 + $0x8] sm:$0xff]   ;;  %397 = vst [vmem:[#allocation2 + $0x5c] sm:$0x1] %v396_v33  ;;  %400 = vst [vmem:[#allocation2 + $0x68] sm:$0x1] %v399_v34 }
  0x28   : > { %v2750_v36 = vld [vmem:[%s3211_s1] ss:$0 sm:$0xff]  ;;  %v2339_v38 = vunpack.c.l.bf16 %v2338_v35  ;;  %v2340_v39 = vunpack.c.h.bf16 %v2338_v35  ;;  %v2343_v40 = vunpack.c.l.bf16 %v2369_v37  ;;  %v2344_v42 = vunpack.c.h.bf16 %v2369_v37  ;;  %v2370_v43 = vld [vmem:[%s2679_s15 + $0x10] sm:$0xff]   ;;  %v2371_v48 = vld [vmem:[%s2679_s15 + $0x18] sm:$0xff]  }
  0x29   : > { %v2756_v41 = vld [vmem:[%s3212_s2] ss:$0 sm:$0xff]  ;;  %vm543_vm7 = vsmask.f32 4368  ;;  %v2347_v47 = vunpack.c.l.bf16 %v2370_v43  ;;  %v2595_v49 = vmov 0.0   ;;  %v2348_v51 = vunpack.c.h.bf16 %v2370_v43 }
  0x2a   : > { %v440_v44 = vmul.f32 %v2339_v38, %v2750_v36  ;;  %v441_v45 = vmul.f32 %v2340_v39, %v2750_v36  ;;  %v442_v46 = vmul.f32 %v2343_v40, %v2750_v36  ;;  %764 = vst.msk [vmem:[#allocation3] sm:$0xff] %vm763_vm6, %v2595_v49  ;;  %765 = vst.msk [vmem:[#allocation3 + $0x8] sm:$0xff] %vm763_vm6, %v2595_v49  ;;  %v2351_v52 = vunpack.c.l.bf16 %v2371_v48  ;;  %v707_v28 = vld [vmem:[#allocation2 + $0xc] sm:$0xf]  ;;  %v711_v30 = vld [vmem:[#allocation2 + $0x14] sm:$0x1] }
  0x2b   : > { %766 = vst.msk [vmem:[#allocation3 + $0x10] sm:$0xff] %vm763_vm6, %v2595_v49  ;;  %767 = vst.msk [vmem:[#allocation3 + $0x18] sm:$0xff] %vm763_vm6, %v2595_v49  ;;  %v443_v50 = vmul.f32 %v2344_v42, %v2750_v36  ;;  %v2352_v53 = vunpack.c.h.bf16 %v2371_v48  ;;  %v444_v57 = vmul.f32 %v2347_v47, %v2750_v36  ;;  %v445_v59 = vmul.f32 %v2348_v51, %v2750_v36  ;;  %v714_v40 = vld [vmem:[#allocation2 + $0x18] sm:$0xf]  ;;  %v718_v42 = vld [vmem:[#allocation2 + $0x20] sm:$0x1] }
  0x2c   : > { %768 = vst.msk [vmem:[#allocation3 + $0x20] sm:$0xff] %vm763_vm6, %v2595_v49  ;;  %769 = vst.msk [vmem:[#allocation3 + $0x28] sm:$0xff] %vm763_vm6, %v2595_v49  ;;  %v463_v54 = vadd.f32 %v2756_v41, %v440_v44  ;;  %v464_v55 = vadd.f32 %v2756_v41, %v441_v45  ;;  %v465_v56 = vadd.f32 %v2756_v41, %v442_v46  ;;  %v2372_v51 = vld [vmem:[%s2679_s15 + $0x20] sm:$0xff]  }
  0x2d   : > { %770 = vst.msk [vmem:[#allocation3 + $0x30] sm:$0xff] %vm763_vm6, %v2595_v49  ;;  %771 = vst.msk [vmem:[#allocation3 + $0x38] sm:$0xff] %vm763_vm6, %v2595_v49  ;;  %v466_v58 = vadd.f32 %v2756_v41, %v443_v50  ;;  %v446_v60 = vmul.f32 %v2351_v52, %v2750_v36  ;;  %v447_v61 = vmul.f32 %v2352_v53, %v2750_v36 }
  0x2e   : > { %772 = vst.msk [vmem:[#allocation3 + $0x40] sm:$0xff] %vm763_vm6, %v2595_v49  ;;  %773 = vst.msk [vmem:[#allocation3 + $0x48] sm:$0xff] %vm763_vm6, %v2595_v49  ;;  %v479_v62 = vmax.f32 %v463_v54, 0.0  ;;  %v480_v63 = vmax.f32 %v464_v55, 0.0  ;;  %v481_v0 = vmax.f32 %v465_v56, 0.0  ;;  %v467_v2 = vadd.f32 %v2756_v41, %v444_v57 }
  0x2f   : > { %774 = vst.msk [vmem:[#allocation3 + $0x50] sm:$0xff] %vm763_vm6, %v2595_v49  ;;  %775 = vst.msk [vmem:[#allocation3 + $0x58] sm:$0xff] %vm763_vm6, %v2595_v49  ;;  %v482_v3 = vmax.f32 %v466_v58, 0.0  ;;  %v468_v4 = vadd.f32 %v2756_v41, %v445_v59  ;;  %v469_v5 = vadd.f32 %v2756_v41, %v446_v60  ;;  %v470_v6 = vadd.f32 %v2756_v41, %v447_v61  ;;  %v2373_v60 = vld [vmem:[%s2679_s15 + $0x28] sm:$0xff]   ;;  %v721_v61 = vld [vmem:[#allocation2 + $0x24] sm:$0xf] }
  0x30   : > { %776 = vst.msk [vmem:[#allocation3 + $0x60] sm:$0xff] %vm763_vm6, %v2595_v49  ;;  %777 = vst.msk [vmem:[#allocation3 + $0x68] sm:$0xff] %vm763_vm6, %v2595_v49  ;;  %v2304_v7 = vpack.c.bf16 %v479_v62, %v479_v62  ;;  %v2305_v8 = vpack.c.bf16 %v480_v63, %v480_v63  ;;  %v2306_v9 = vpack.c.bf16 %v481_v0, %v481_v0  ;;  %v483_v10 = vmax.f32 %v467_v2, 0.0 }
  0x31   : > { %778 = vst.msk [vmem:[#allocation3 + $0x70] sm:$0xff] %vm763_vm6, %v2595_v49  ;;  %779 = vst.msk [vmem:[#allocation3 + $0x78] sm:$0xff] %vm763_vm6, %v2595_v49  ;;  %v2307_v11 = vpack.c.bf16 %v482_v3, %v482_v3  ;;  %v484_v12 = vmax.f32 %v468_v4, 0.0  ;;  %v485_v13 = vmax.f32 %v469_v5, 0.0  ;;  %v486_v14 = vmax.f32 %v470_v6, 0.0 }
  0x32   : > { %v546_v15 = vshrl.u32 %v2304_v7, 16  ;;  %v549_v16 = vshll.u32 %v2304_v7, 16  ;;  %v554_v17 = vshrl.u32 %v2305_v8, 16  ;;  %v557_v18 = vshll.u32 %v2305_v8, 16  ;;  %vm2800_vm9 = vmor %vm349_vm1, %vm543_vm7  ;;  %v725_v7 = vld [vmem:[#allocation2 + $0x2c] sm:$0x1] }
  0x33   : > { %v563_v19 = vshrl.u32 %v2306_v9, 16  ;;  %v566_v20 = vshll.u32 %v2306_v9, 16  ;;  %v571_v21 = vshrl.u32 %v2307_v11, 16  ;;  %v574_v22 = vshll.u32 %v2307_v11, 16  ;;  %v728_v8 = vld [vmem:[#allocation2 + $0x30] sm:$0xf] }
  0x34   : > { %v548_v24 = vrot.slane %v546_v15, 7  ;;  %v556_v25 = vrot.slane %v554_v17, 7  ;;  %v2308_v26 = vpack.c.bf16 %v483_v10, %v483_v10  ;;  %v2309_v27 = vpack.c.bf16 %v484_v12, %v484_v12  ;;  %v732_v17 = vld [vmem:[#allocation2 + $0x38] sm:$0x1] }
  0x35   : > { %v565_v31 = vrot.slane %v563_v19, 7  ;;  %v573_v32 = vrot.slane %v571_v21, 7  ;;  %v2310_v33 = vpack.c.bf16 %v485_v13, %v485_v13  ;;  %v2311_v34 = vpack.c.bf16 %v486_v14, %v486_v14 }
  0x36   : > { %v551_v35 = vor.u32 %v549_v16, %v548_v24  ;;  %v552_v37 = vrot.slane %v548_v24, 4  ;;  %v559_v38 = vor.u32 %v557_v18, %v556_v25  ;;  %v561_v39 = vrot.slane %v556_v25, 4 }
  0x37   : > { %v568_v43 = vor.u32 %v566_v20, %v565_v31  ;;  %v569_v44 = vrot.slane %v565_v31, 4  ;;  %v576_v45 = vor.u32 %v574_v22, %v573_v32  ;;  %v578_v46 = vrot.slane %v573_v32, 4  ;;  %v2374_v22 = vld [vmem:[%s2679_s15 + $0x30] sm:$0xff]  }
  0x38   : > { %v708_v47 = vsel %vm2794_vm8, %v551_v35, %v707_v28  ;;  %v560_v48 = vsel %vm2800_vm9, %v552_v37, %v559_v38  ;;  %v712_v49 = vsel %vm2698_vm3, %v561_v39, %v711_v30  ;;  %v580_v50 = vshrl.u32 %v2308_v26, 16  ;;  %v2375_v28 = vld [vmem:[%s2679_s15 + $0x38] sm:$0xff]  }
  0x39   : > { %709 = vst [vmem:[#allocation2 + $0xc] sm:$0xf] %v708_v47  ;;  %710 = vst.msk [vmem:[#allocation2 + $0x10] sm:$0xf] %vm338_vm2, %v560_v48  ;;  %v715_v52 = vsel %vm2794_vm8, %v568_v43, %v714_v40  ;;  %v577_v53 = vsel %vm2800_vm9, %v569_v44, %v576_v45  ;;  %v719_v54 = vsel %vm2698_vm3, %v578_v46, %v718_v42  ;;  %v583_v55 = vshll.u32 %v2308_v26, 16 }
  0x3a   : > { %713 = vst [vmem:[#allocation2 + $0x14] sm:$0x1] %v712_v49  ;;  %716 = vst [vmem:[#allocation2 + $0x18] sm:$0xf] %v715_v52  ;;  %v582_v56 = vrot.slane %v580_v50, 7  ;;  %v588_v57 = vshrl.u32 %v2309_v27, 16  ;;  %v2355_v2 = vunpack.c.l.bf16 %v2372_v51  ;;  %v2356_v11 = vunpack.c.h.bf16 %v2372_v51 }
  0x3b   : > { %717 = vst.msk [vmem:[#allocation2 + $0x1c] sm:$0xf] %vm338_vm2, %v577_v53  ;;  %720 = vst [vmem:[#allocation2 + $0x20] sm:$0x1] %v719_v54  ;;  %v591_v58 = vshll.u32 %v2309_v27, 16  ;;  %v597_v59 = vshrl.u32 %v2310_v33, 16  ;;  %v2359_v12 = vunpack.c.l.bf16 %v2373_v60  ;;  %v2360_v35 = vunpack.c.h.bf16 %v2373_v60 }
  0x3c   : > { %v600_v62 = vshll.u32 %v2310_v33, 16  ;;  %v605_v63 = vshrl.u32 %v2311_v34, 16  ;;  %v608_v0 = vshll.u32 %v2311_v34, 16  ;;  %v585_v3 = vor.u32 %v583_v55, %v582_v56  ;;  %v735_v60 = vld [vmem:[#allocation2 + $0x3c] sm:$0xf] }
  0x3d   : > { %v586_v4 = vrot.slane %v582_v56, 4  ;;  %v590_v5 = vrot.slane %v588_v57, 7  ;;  %v599_v6 = vrot.slane %v597_v59, 7  ;;  %v448_v10 = vmul.f32 %v2355_v2, %v2750_v36 }
  0x3e   : > { %v607_v9 = vrot.slane %v605_v63, 7  ;;  %v722_v13 = vsel %vm2794_vm8, %v585_v3, %v721_v61  ;;  %v449_v27 = vmul.f32 %v2356_v11, %v2750_v36  ;;  %v450_v33 = vmul.f32 %v2359_v12, %v2750_v36  ;;  %v739_v11 = vld [vmem:[#allocation2 + $0x44] sm:$0x1] }
  0x3f   : > { %v593_v14 = vor.u32 %v591_v58, %v590_v5  ;;  %v595_v15 = vrot.slane %v590_v5, 4  ;;  %v602_v16 = vor.u32 %v600_v62, %v599_v6  ;;  %723 = vst [vmem:[#allocation2 + $0x24] sm:$0xf] %v722_v13  ;;  %v603_v18 = vrot.slane %v599_v6, 4 }
  0x40   : > { %v610_v19 = vor.u32 %v608_v0, %v607_v9  ;;  %v612_v20 = vrot.slane %v607_v9, 4  ;;  %v471_v21 = vadd.f32 %v2756_v41, %v448_v10  ;;  %v472_v34 = vadd.f32 %v2756_v41, %v449_v27 }
  0x41   : > { %v594_v24 = vsel %vm2800_vm9, %v586_v4, %v593_v14  ;;  %v726_v25 = vsel %vm2698_vm3, %v595_v15, %v725_v7  ;;  %v729_v26 = vsel %vm2794_vm8, %v602_v16, %v728_v8  ;;  %v2363_v37 = vunpack.c.l.bf16 %v2374_v22  ;;  %v742_v16 = vld [vmem:[#allocation2 + $0x48] sm:$0xf] }
  0x42   : > { %724 = vst.msk [vmem:[#allocation2 + $0x28] sm:$0xf] %vm338_vm2, %v594_v24  ;;  %727 = vst [vmem:[#allocation2 + $0x2c] sm:$0x1] %v726_v25  ;;  %v611_v30 = vsel %vm2800_vm9, %v603_v18, %v610_v19  ;;  %v733_v31 = vsel %vm2698_vm3, %v612_v20, %v732_v17  ;;  %v487_v32 = vmax.f32 %v471_v21, 0.0  ;;  %v2364_v38 = vunpack.c.h.bf16 %v2374_v22 }
  0x43   : > { %730 = vst [vmem:[#allocation2 + $0x30] sm:$0xf] %v729_v26  ;;  %731 = vst.msk [vmem:[#allocation2 + $0x34] sm:$0xf] %vm338_vm2, %v611_v30  ;;  %v473_v40 = vadd.f32 %v2756_v41, %v450_v33  ;;  %v2367_v42 = vunpack.c.l.bf16 %v2375_v28  ;;  %v2368_v43 = vunpack.c.h.bf16 %v2375_v28  ;;  %v488_v44 = vmax.f32 %v472_v34, 0.0 }
  0x44   : > { %734 = vst [vmem:[#allocation2 + $0x38] sm:$0x1] %v733_v31  ;;  %v2312_v39 = vpack.c.bf16 %v487_v32, %v487_v32  ;;  %v451_v45 = vmul.f32 %v2360_v35, %v2750_v36  ;;  %v452_v46 = vmul.f32 %v2363_v37, %v2750_v36  ;;  %v453_v47 = vmul.f32 %v2364_v38, %v2750_v36  ;;  %v746_v28 = vld [vmem:[#allocation2 + $0x50] sm:$0x1]  ;;  %v749_v35 = vld [vmem:[#allocation2 + $0x54] sm:$0xf] }
  0x45   : > { %v489_v50 = vmax.f32 %v473_v40, 0.0  ;;  %v454_v51 = vmul.f32 %v2367_v42, %v2750_v36  ;;  %v2313_v52 = vpack.c.bf16 %v488_v44, %v488_v44  ;;  %v455_v59 = vmul.f32 %v2368_v43, %v2750_v36 }
  0x46   : > { %v614_v48 = vshrl.u32 %v2312_v39, 16  ;;  %v617_v49 = vshll.u32 %v2312_v39, 16  ;;  %v474_v53 = vadd.f32 %v2756_v41, %v451_v45  ;;  %v475_v54 = vadd.f32 %v2756_v41, %v452_v46 }
  0x47   : > { %v476_v55 = vadd.f32 %v2756_v41, %v453_v47  ;;  %v2314_v57 = vpack.c.bf16 %v489_v50, %v489_v50  ;;  %v477_v58 = vadd.f32 %v2756_v41, %v454_v51  ;;  %v622_v61 = vshrl.u32 %v2313_v52, 16 }
  0x48   : > { %v616_v56 = vrot.slane %v614_v48, 7  ;;  %v625_v62 = vshll.u32 %v2313_v52, 16  ;;  %v490_v63 = vmax.f32 %v474_v53, 0.0  ;;  %v491_v0 = vmax.f32 %v475_v54, 0.0  ;;  %v756_v53 = vld [vmem:[#allocation2 + $0x60] sm:$0xf] }
  0x49   : > { %v631_v4 = vshrl.u32 %v2314_v57, 16  ;;  %v634_v5 = vshll.u32 %v2314_v57, 16  ;;  %v624_v6 = vrot.slane %v622_v61, 7  ;;  %v492_v9 = vmax.f32 %v476_v55, 0.0 }
  0x4a   : > { %v619_v2 = vor.u32 %v617_v49, %v616_v56  ;;  %v620_v3 = vrot.slane %v616_v56, 4  ;;  %v2315_v7 = vpack.c.bf16 %v490_v63, %v490_v63  ;;  %v2316_v8 = vpack.c.bf16 %v491_v0, %v491_v0  ;;  %v753_v49 = vld [vmem:[#allocation2 + $0x5c] sm:$0x1] }
  0x4b   : > { %v633_v12 = vrot.slane %v631_v4, 7  ;;  %v493_v13 = vmax.f32 %v477_v58, 0.0  ;;  %v478_v36 = vadd.f32 %v2756_v41, %v455_v59  ;;  %v627_v14 = vor.u32 %v625_v62, %v624_v6  ;;  %v760_v62 = vld [vmem:[#allocation2 + $0x68] sm:$0x1] }
  0x4c   : > { %v736_v10 = vsel %vm2794_vm8, %v619_v2, %v735_v60  ;;  %v629_v15 = vrot.slane %v624_v6, 4  ;;  %v639_v17 = vshrl.u32 %v2315_v7, 16  ;;  %v642_v18 = vshll.u32 %v2315_v7, 16 }
  0x4d   : > { %737 = vst [vmem:[#allocation2 + $0x3c] sm:$0xf] %v736_v10  ;;  %v636_v19 = vor.u32 %v634_v5, %v633_v12  ;;  %v637_v20 = vrot.slane %v633_v12, 4  ;;  %v648_v21 = vshrl.u32 %v2316_v8, 16  ;;  %v651_v22 = vshll.u32 %v2316_v8, 16 }
  0x4e   : > { %v628_v24 = vsel %vm2800_vm9, %v620_v3, %v627_v14  ;;  %v740_v25 = vsel %vm2698_vm3, %v629_v15, %v739_v11  ;;  %v641_v26 = vrot.slane %v639_v17, 7  ;;  %v2317_v27 = vpack.c.bf16 %v492_v9, %v492_v9 }
  0x4f   : > { %738 = vst.msk [vmem:[#allocation2 + $0x40] sm:$0xf] %vm338_vm2, %v628_v24  ;;  %741 = vst [vmem:[#allocation2 + $0x44] sm:$0x1] %v740_v25  ;;  %v743_v41 = vsel %vm2794_vm8, %v636_v19, %v742_v16  ;;  %v650_v30 = vrot.slane %v648_v21, 7  ;;  %v2318_v31 = vpack.c.bf16 %v493_v13, %v493_v13  ;;  %v494_v32 = vmax.f32 %v478_v36, 0.0 }
  0x50   : > { %744 = vst [vmem:[#allocation2 + $0x48] sm:$0xf] %v743_v41  ;;  %v644_v33 = vor.u32 %v642_v18, %v641_v26  ;;  %v646_v34 = vrot.slane %v641_v26, 4  ;;  %v656_v37 = vshrl.u32 %v2317_v27, 16  ;;  %v659_v38 = vshll.u32 %v2317_v27, 16 }
  0x51   : > { %v653_v39 = vor.u32 %v651_v22, %v650_v30  ;;  %v654_v40 = vrot.slane %v650_v30, 4  ;;  %v665_v42 = vshrl.u32 %v2318_v31, 16  ;;  %v668_v43 = vshll.u32 %v2318_v31, 16 }
  0x52   : > { %v645_v44 = vsel %vm2800_vm9, %v637_v20, %v644_v33  ;;  %v747_v45 = vsel %vm2698_vm3, %v646_v34, %v746_v28  ;;  %v658_v46 = vrot.slane %v656_v37, 7  ;;  %v2319_v47 = vpack.c.bf16 %v494_v32, %v494_v32 }
  0x53   : > { %745 = vst.msk [vmem:[#allocation2 + $0x4c] sm:$0xf] %vm338_vm2, %v645_v44  ;;  %748 = vst [vmem:[#allocation2 + $0x50] sm:$0x1] %v747_v45  ;;  %v750_v48 = vsel %vm2794_vm8, %v653_v39, %v749_v35  ;;  %v667_v50 = vrot.slane %v665_v42, 7 }
  0x54   : > { %751 = vst [vmem:[#allocation2 + $0x54] sm:$0xf] %v750_v48  ;;  %v661_v51 = vor.u32 %v659_v38, %v658_v46  ;;  %v663_v52 = vrot.slane %v658_v46, 4  ;;  %v673_v54 = vshrl.u32 %v2319_v47, 16  ;;  %v676_v55 = vshll.u32 %v2319_v47, 16 }
  0x55   : > { %v670_v56 = vor.u32 %v668_v43, %v667_v50  ;;  %v671_v59 = vrot.slane %v667_v50, 4 }
  0x56   : > { %v662_v57 = vsel %vm2800_vm9, %v654_v40, %v661_v51  ;;  %v754_v58 = vsel %vm2698_vm3, %v663_v52, %v753_v49  ;;  %v675_v60 = vrot.slane %v673_v54, 7 }
  0x57   : > { %752 = vst.msk [vmem:[#allocation2 + $0x58] sm:$0xf] %vm338_vm2, %v662_v57  ;;  %755 = vst [vmem:[#allocation2 + $0x5c] sm:$0x1] %v754_v58  ;;  %v757_v61 = vsel %vm2794_vm8, %v670_v56, %v756_v53 }
  0x58   : > { %758 = vst [vmem:[#allocation2 + $0x60] sm:$0xf] %v757_v61  ;;  %v678_v63 = vor.u32 %v676_v55, %v675_v60  ;;  %v680_v0 = vrot.slane %v675_v60, 4 }
  0x5a   : > { %v679_v2 = vsel %vm2800_vm9, %v671_v59, %v678_v63  ;;  %v761_v3 = vsel %vm2698_vm3, %v680_v0, %v760_v62 }
  0x5b   : > { %759 = vst.msk [vmem:[#allocation2 + $0x64] sm:$0xf] %vm338_vm2, %v679_v2  ;;  %762 = vst [vmem:[#allocation2 + $0x68] sm:$0x1] %v761_v3 }
  0x5c PF: > { %v2534_v23 = vld [vmem:[%s2693_s10 + $0x18] sm:$0xff]   ;;  %s2320_s13 = smul.u32 12, %s2576_s24  ;;  %v2535_v4 = vld [vmem:[%s2693_s10 + $0x10] sm:$0xff]   ;;  %v2536_v29 = vld [vmem:[%s2693_s10 + $0x8] sm:$0xff]   ;;  %vm887_vm10 = vcmask 523264   ;;  %vm1534_vm11 = vcmask 1042432  }
  0x5d   : > { %2484 = vmatprep.subr.bf16.mxu1 %v2534_v23  ;;  %2412 = vmatprep.subr.bf16.mxu0 %v2534_v23  ;;  %v2537_v6 = vld [vmem:[%s2693_s10] sm:$0xff]   ;;  %v2540_v7 = vld [vmem:[%s2693_s10 + $0x38] sm:$0xff]   ;;  %v2542_v10 = vld [vmem:[%s2693_s10 + $0x30] sm:$0xff]   ;;  %vm1535_vm12 = vcmask 1046532   ;;  %vm1065_vm13 = vsmask.f32 3328 }
  0x5e   : > { %2488 = vmatpush3.bf16.msra.mxu1 %v2534_v23  ;;  %2413 = vmatpush3.bf16.msra.mxu0 %v2534_v23  ;;  %s2884_s14 = scalar_lea.vmem [#allocation2], %s2320_s13  ;;  %v2544_v8 = vld [vmem:[%s2693_s10 + $0x58] sm:$0xff]   ;;  %v2548_v13 = vld [vmem:[%s2693_s10 + $0x50] sm:$0xff]   ;;  %v2547_v14 = vld [vmem:[%s2693_s10 + $0x28] sm:$0xff]   ;;  %vm1066_vm14 = vsmask.f32 7440 }
  0x5f   : > { %2485 = vmatprep.subr.bf16.mxu1 %v2535_v4  ;;  %2414 = vmatprep.subr.bf16.mxu0 %v2535_v4  ;;  %v2552_v15 = vld [vmem:[%s2693_s10 + $0x48] sm:$0xff]   ;;  %v2550_v41 = vld [vmem:[%s2693_s10 + $0x20] sm:$0xff]   ;;  %vm2917_vm15 = vmor %vm1065_vm13, %vm1066_vm14  ;;  %p2281_p8 = scmp.ne.s32.totalorder %s2576_s24, 2 }
  0x60   : > { %v2553_v43 = vld [vmem:[%s2693_s10 + $0x40] sm:$0xff]   ;;  %vm2928_vm0 = vmor %vm1534_vm11, %vm1535_vm12 }
  0x62   : > { %v2538_v1 = vld [vmem:[%s2884_s14 + $0x30] sm:$0xff]   ;;  %2489 = vmatpush3.bf16.msra.mxu1 %v2535_v4  ;;  %2415 = vmatpush3.bf16.msra.mxu0 %v2535_v4  ;;  %v2541_v5 = vld [vmem:[%s2884_s14] sm:$0xff]   ;;  %v2545_v12 = vld [vmem:[%s2884_s14 + $0x48] sm:$0xff]  }
  0x63   : > { %2428 = vmatprep.mubr.msk.bf16.mxu1 %vm887_vm10, %v2538_v1  ;;  %2486 = vmatprep.subr.bf16.mxu1 %v2536_v29  ;;  %v2539_v9 = vld [vmem:[%s2884_s14 + $0x3c] sm:$0xff]   ;;  %v2543_v11 = vld [vmem:[%s2884_s14 + $0xc] sm:$0xff]   ;;  %v1042_v17 = vld [vmem:[%s2884_s14 + $0x4] sm:$0xf] }
  0x64   : > { %2416 = vmatprep.subr.bf16.mxu0 %v2536_v29  ;;  %2420 = vmatprep.mubr.msk.bf16.mxu0 %vm887_vm10, %v2541_v5  ;;  %v2549_v36 = vld [vmem:[%s2884_s14 + $0x18] sm:$0xff]   ;;  %v1041_v16 = vld [vmem:[%s2884_s14] sm:$0xf]  ;;  %v1043_v18 = vld [vmem:[%s2884_s14 + $0x8] sm:$0x1]  ;;  %v1078_v24 = vshll.u32 %v1042_v17, 16 }
  0x65   : > { %v2546_v19 = vld [vmem:[%s2884_s14 + $0x54] sm:$0xff]   ;;  %v1069_v20 = vshrl.u32 %v1041_v16, 16  ;;  %v1072_v21 = vshll.u32 %v1041_v16, 16  ;;  %v2551_v22 = vld [vmem:[%s2884_s14 + $0x24] sm:$0xff]   ;;  %v1082_v25 = vshrl.u32 %v1042_v17, 16  ;;  %v1088_v26 = vshll.u32 %v1043_v18, 16 }
  0x66   : > { %2490 = vmatpush3.bf16.msra.mxu1 %v2536_v29  ;;  %2417 = vmatpush3.bf16.msra.mxu0 %v2536_v29  ;;  %v1044_v27 = vld [vmem:[%s2884_s14 + $0xc] sm:$0xf]  ;;  %v1045_v31 = vld [vmem:[%s2884_s14 + $0x10] sm:$0xf]  ;;  %v1046_v32 = vld [vmem:[%s2884_s14 + $0x14] sm:$0x1] }
  0x67   : > { %2487 = vmatprep.subr.bf16.mxu1 %v2537_v6  ;;  %2418 = vmatprep.subr.bf16.mxu0 %v2537_v6  ;;  %v1071_v28 = vrot.slane %v1069_v20, 4  ;;  %v1074_v30 = vrot.slane %v1072_v21, 5  ;;  %v1080_v33 = vrot.slane %v1078_v24, 5  ;;  %v1084_v34 = vrot.slane %v1082_v25, 4  ;;  %v1486_v48 = vld [vmem:[%s2884_s14] sm:$0xe] }
  0x68   : > { %v1090_v35 = vrot.slane %v1088_v26, 5  ;;  %v1093_v37 = vshrl.u32 %v1044_v27, 16  ;;  %v1096_v39 = vshll.u32 %v1044_v27, 16  ;;  %v1102_v40 = vshll.u32 %v1045_v31, 16  ;;  %v1487_v49 = vld [vmem:[%s2884_s14 + $0x4] sm:$0xf] }
  0x69   : > { %v1075_v38 = vor.u32 %v1074_v30, %v1071_v28  ;;  %v1106_v42 = vshrl.u32 %v1045_v31, 16  ;;  %v1085_v45 = vor.u32 %v1084_v34, %v1080_v33  ;;  %v1112_v47 = vshll.u32 %v1046_v32, 16  ;;  %v1488_v54 = vld [vmem:[%s2884_s14 + $0x8] sm:$0x1]  ;;  %v1489_v60 = vld [vmem:[%s2884_s14 + $0xc] sm:$0xe] }
  0x6a   : > { %2491 = vmatpush3.bf16.msra.mxu1 %v2537_v6  ;;  %2419 = vmatpush3.bf16.msra.mxu0 %v2537_v6  ;;  %v1095_v46 = vrot.slane %v1093_v37, 4  ;;  %v1098_v51 = vrot.slane %v1096_v39, 5  ;;  %v1104_v52 = vrot.slane %v1102_v40, 5  ;;  %v2245_v58 = vrot.slane %v1486_v48, 9  ;;  %v1490_v2 = vld [vmem:[%s2884_s14 + $0x10] sm:$0xf] }
  0x6b   : > { %2436 = vmatprep.subr.bf16.mxu1 %v2540_v7  ;;  %2460 = vmatprep.subr.bf16.mxu0 %v2544_v8  ;;  %v1076_v50 = vrot.slane %v1075_v38, 4  ;;  %v1108_v53 = vrot.slane %v1106_v42, 4  ;;  %v1086_v56 = vrot.slane %v1085_v45, 4  ;;  %v1114_v57 = vrot.slane %v1112_v47, 5  ;;  %v1491_v3 = vld [vmem:[%s2884_s14 + $0x14] sm:$0x1] }
  0x6c   : > { %v1539_v59 = vrot.slane %v1487_v49, 5  ;;  %v1099_v62 = vor.u32 %v1098_v51, %v1095_v46  ;;  %v1542_v0 = vrot.slane %v1488_v54, 5  ;;  %v2246_v1 = vrot.slane %v1489_v60, 9  ;;  %v1047_v5 = vld [vmem:[%s2884_s14 + $0x18] sm:$0xf] }
  0x6d   : > { %2429 = vmatmul.mubr.msk.bf16.vlgmr.msra.gmra.mxu1 %vm887_vm10, %v2539_v9  ;;  %2421 = vmatmul.mubr.msk.bf16.vlgmr.msra.gmra.mxu0 %vm887_vm10, %v2543_v11  ;;  %v1081_v61 = vsel %vm2917_vm15, %v1076_v50, %v1080_v33  ;;  %v1109_v63 = vor.u32 %v1108_v53, %v1104_v52  ;;  %v1091_v23 = vsel %vm2917_vm15, %v1086_v56, %v1090_v35  ;;  %v1048_v6 = vld [vmem:[%s2884_s14 + $0x1c] sm:$0xf]  ;;  %v1049_v11 = vld [vmem:[%s2884_s14 + $0x20] sm:$0x1]  ;;  %v1051_v20 = vld [vmem:[%s2884_s14 + $0x28] sm:$0xf] }
  0x6e   : > { %2437 = vmatpush3.bf16.msra.mxu1 %v2540_v7  ;;  %2461 = vmatpush3.bf16.msra.mxu0 %v2544_v8  ;;  %v1540_v4 = vsel %vm2928_vm0, %v2245_v58, %v1539_v59  ;;  %v1541_v29 = vrot.slane %v1539_v59, 4  ;;  %v2225_v7 = vcombine.low %v1081_v61, %v1091_v23  ;;  %v1100_v8 = vrot.slane %v1099_v62, 4  ;;  %v1052_v28 = vld [vmem:[%s2884_s14 + $0x2c] sm:$0x1]  ;;  %v1492_v35 = vld [vmem:[%s2884_s14 + $0x18] sm:$0xe] }
  0x6f   : > { %2438 = vmatprep.subr.bf16.mxu1 %v2542_v10  ;;  %2432 = vmatprep.mubr.msk.bf16.mxu1 %vm887_vm10, %v2545_v12  ;;  %v1110_v9 = vrot.slane %v1109_v63, 4  ;;  %v1126_v26 = vshll.u32 %v1048_v6, 16  ;;  %v1130_v27 = vshrl.u32 %v1048_v6, 16  ;;  %v1150_v34 = vshll.u32 %v1051_v20, 16  ;;  %v1493_v37 = vld [vmem:[%s2884_s14 + $0x1c] sm:$0xf] }
  0x70   : > { %2462 = vmatprep.subr.bf16.mxu0 %v2548_v13  ;;  %2424 = vmatprep.mubr.msk.bf16.mxu0 %vm887_vm10, %v2549_v36  ;;  %v1543_v12 = vsel %vm2928_vm0, %v1541_v29, %v1542_v0  ;;  %v1117_v36 = vshrl.u32 %v1047_v5, 16  ;;  %v1105_v16 = vsel %vm2917_vm15, %v1100_v8, %v1104_v52  ;;  %v1495_v49 = vld [vmem:[%s2884_s14 + $0x24] sm:$0xe]  ;;  %v1154_v51 = vshrl.u32 %v1051_v20, 16  ;;  %v1496_v54 = vld [vmem:[%s2884_s14 + $0x28] sm:$0xf] }
  0x71   : > { %v1115_v17 = vsel %vm2917_vm15, %v1110_v9, %v1114_v57  ;;  %v2261_v18 = vcombine.low %v1540_v4, %v1543_v12  ;;  %v1128_v39 = vrot.slane %v1126_v26, 5  ;;  %v1132_v40 = vrot.slane %v1130_v27, 4  ;;  %v1497_v60 = vld [vmem:[%s2884_s14 + $0x2c] sm:$0x1]  ;;  %v1053_v61 = vld [vmem:[%s2884_s14 + $0x30] sm:$0xf] }
  0x72   : > { %2439 = vmatpush3.bf16.msra.mxu1 %v2542_v10  ;;  %2463 = vmatpush3.bf16.msra.mxu0 %v2548_v13  ;;  %v1546_v10 = vrot.slane %v1490_v2, 5  ;;  %v1549_v13 = vrot.slane %v1491_v3, 5  ;;  %v2226_v21 = vcombine.low %v1105_v16, %v1115_v17  ;;  %v1119_v24 = vrot.slane %v1117_v36, 4  ;;  %v1055_v8 = vld [vmem:[%s2884_s14 + $0x38] sm:$0x1] }
  0x73   : > { %2440 = vmatprep.subr.bf16.mxu1 %v2547_v14  ;;  %2464 = vmatprep.subr.bf16.mxu0 %v2552_v15  ;;  %v1152_v48 = vrot.slane %v1150_v34, 5  ;;  %v1133_v50 = vor.u32 %v1132_v40, %v1128_v39  ;;  %v1160_v52 = vshll.u32 %v1052_v28, 16  ;;  %v2247_v53 = vrot.slane %v1492_v35, 9  ;;  %v1056_v36 = vld [vmem:[%s2884_s14 + $0x3c] sm:$0xf] }
  0x74   : > { %v1553_v58 = vrot.slane %v1493_v37, 5  ;;  %v1156_v63 = vrot.slane %v1154_v51, 4  ;;  %v2248_v2 = vrot.slane %v1495_v49, 9  ;;  %v1560_v29 = vrot.slane %v1496_v54, 5  ;;  %v1058_v26 = vld [vmem:[%s2884_s14 + $0x44] sm:$0x1] }
  0x75   : > { %2433 = vmatmul.mubr.msk.bf16.gmra.mxu1 %vm887_vm10, %v2546_v19  ;;  %2425 = vmatmul.mubr.msk.bf16.gmra.mxu0 %vm887_vm10, %v2551_v22  ;;  %v1547_v19 = vsel %vm2928_vm0, %v2246_v1, %v1546_v10  ;;  %v1548_v22 = vrot.slane %v1546_v10, 4  ;;  %v1134_v62 = vrot.slane %v1133_v50, 4  ;;  %v1162_v0 = vrot.slane %v1160_v52, 5  ;;  %v1499_v34 = vld [vmem:[%s2884_s14 + $0x34] sm:$0xf] }
  0x76   : > { %2441 = vmatpush3.bf16.msra.mxu1 %v2547_v14  ;;  %2465 = vmatpush3.bf16.msra.mxu0 %v2552_v15  ;;  %v1120_v14 = vshll.u32 %v1047_v5, 16  ;;  %v1050_v15 = vld [vmem:[%s2884_s14 + $0x24] sm:$0xf]  ;;  %v1554_v23 = vsel %vm2928_vm0, %v2247_v53, %v1553_v58  ;;  %v1555_v4 = vrot.slane %v1553_v58, 4  ;;  %v1157_v5 = vor.u32 %v1156_v63, %v1152_v48  ;;  %v1501_v51 = vld [vmem:[%s2884_s14 + $0x3c] sm:$0xe] }
  0x77   : > { %2442 = vmatprep.subr.bf16.mxu1 %v2550_v41  ;;  %2466 = vmatprep.subr.bf16.mxu0 %v2553_v43  ;;  %v1141_v30 = vshrl.u32 %v1050_v15, 16  ;;  %v1550_v31 = vsel %vm2928_vm0, %v1548_v22, %v1549_v13  ;;  %v1144_v33 = vshll.u32 %v1050_v15, 16  ;;  %v1563_v6 = vrot.slane %v1497_v60, 5  ;;  %v1502_v52 = vld [vmem:[%s2884_s14 + $0x40] sm:$0xf] }
  0x78   : > { %2444 = vmatprep.mubr.msk.bf16.mxu1 %vm887_vm10, %v2225_v7  ;;  %v1122_v25 = vrot.slane %v1120_v14, 5  ;;  %2468 = vmatprep.mubr.msk.bf16.mxu0 %vm887_vm10, %v2261_v18  ;;  %v2262_v38 = vcombine.low %v1547_v19, %v1550_v31  ;;  %v1054_v7 = vld [vmem:[%s2884_s14 + $0x34] sm:$0xf]  ;;  %v1165_v9 = vshrl.u32 %v1053_v61, 16  ;;  %v1561_v13 = vsel %vm2928_vm0, %v2248_v2, %v1560_v29  ;;  %v1503_v58 = vld [vmem:[%s2884_s14 + $0x44] sm:$0x1] }
  0x79   : > { %v1143_v46 = vrot.slane %v1141_v30, 4  ;;  %v1146_v47 = vrot.slane %v1144_v33, 5  ;;  %v1158_v14 = vrot.slane %v1157_v5, 4  ;;  %v1562_v16 = vrot.slane %v1560_v29, 4  ;;  %v1498_v33 = vld [vmem:[%s2884_s14 + $0x30] sm:$0xe] }
  0x7a   : > { %2443 = vmatpush3.bf16.msra.mxu1 %v2550_v41  ;;  %2467 = vmatpush3.bf16.msra.mxu0 %v2553_v43  ;;  %v1136_v41 = vshll.u32 %v1049_v11, 16  ;;  %v1123_v32 = vor.u32 %v1122_v25, %v1119_v24  ;;  %v1494_v43 = vld [vmem:[%s2884_s14 + $0x20] sm:$0x1]  ;;  %v1167_v17 = vrot.slane %v1165_v9, 4  ;;  %v1168_v18 = vshll.u32 %v1053_v61, 16 }
  0x7b   : > { %v1147_v57 = vor.u32 %v1146_v47, %v1143_v46  ;;  %v1556_v59 = vrot.slane %v1494_v43, 5  ;;  %v1174_v19 = vshll.u32 %v1054_v7, 16  ;;  %v1178_v20 = vshrl.u32 %v1054_v7, 16  ;;  %v1057_v25 = vld [vmem:[%s2884_s14 + $0x40] sm:$0xf] }
  0x7c   : > { %v1138_v42 = vrot.slane %v1136_v41, 5  ;;  %v1124_v45 = vrot.slane %v1123_v32, 4  ;;  %v1163_v22 = vsel %vm2917_vm15, %v1158_v14, %v1162_v0  ;;  %v1564_v24 = vsel %vm2928_vm0, %v1562_v16, %v1563_v6  ;;  %v1500_v46 = vld [vmem:[%s2884_s14 + $0x38] sm:$0x1]  ;;  %v1059_v63 = vld [vmem:[%s2884_s14 + $0x48] sm:$0xf] }
  0x7d   : > { %2445 = vmatmul.mubr.msk.bf16.vlgmr.msra.gmra.mxu1 %vm887_vm10, %v2226_v21  ;;  %2469 = vmatmul.mubr.msk.bf16.vlgmr.msra.gmra.mxu0 %vm887_vm10, %v2262_v38  ;;  %v1148_v3 = vrot.slane %v1147_v57, 4  ;;  %v1557_v12 = vsel %vm2928_vm0, %v1555_v4, %v1556_v59  ;;  %v1184_v21 = vshll.u32 %v1055_v8, 16  ;;  %v1189_v27 = vshrl.u32 %v1056_v36, 16  ;;  %v1060_v6 = vld [vmem:[%s2884_s14 + $0x4c] sm:$0xf] }
  0x7e   : > { %v1129_v56 = vsel %vm2917_vm15, %v1124_v45, %v1128_v39  ;;  %v1139_v1 = vsel %vm2917_vm15, %v1134_v62, %v1138_v42  ;;  %v2263_v15 = vcombine.low %v1554_v23, %v1557_v12  ;;  %v1192_v41 = vshll.u32 %v1056_v36, 16 }
  0x7f   : > { %v2227_v10 = vcombine.low %v1129_v56, %v1139_v1  ;;  %v1153_v11 = vsel %vm2917_vm15, %v1148_v3, %v1152_v48  ;;  %v2264_v30 = vcombine.low %v1561_v13, %v1564_v24  ;;  %v1170_v31 = vrot.slane %v1168_v18, 5 }
  0x80   : > { %2472 = vmatprep.mubr.msk.bf16.mxu0 %vm887_vm10, %v2263_v15  ;;  %v2228_v28 = vcombine.low %v1153_v11, %v1163_v22  ;;  %v1176_v32 = vrot.slane %v1174_v19, 5  ;;  %v1180_v35 = vrot.slane %v1178_v20, 4  ;;  %v1186_v37 = vrot.slane %v1184_v21, 5  ;;  %v1062_v15 = vld [vmem:[%s2884_s14 + $0x54] sm:$0xf] }
  0x81   : > { %2448 = vmatprep.mubr.msk.bf16.mxu1 %vm887_vm10, %v2227_v10  ;;  %v1191_v38 = vrot.slane %v1189_v27, 4  ;;  %v1194_v39 = vrot.slane %v1192_v41, 5  ;;  %v1171_v40 = vor.u32 %v1170_v31, %v1167_v17  ;;  %v1198_v42 = vshll.u32 %v1057_v25, 16  ;;  %v1061_v10 = vld [vmem:[%s2884_s14 + $0x50] sm:$0x1] }
  0x82   : > { %v1202_v43 = vshrl.u32 %v1057_v25, 16  ;;  %v1208_v45 = vshll.u32 %v1058_v26, 16  ;;  %v1181_v47 = vor.u32 %v1180_v35, %v1176_v32  ;;  %v2249_v49 = vrot.slane %v1498_v33, 9  ;;  %v1063_v20 = vld [vmem:[%s2884_s14 + $0x58] sm:$0xf] }
  0x83   : > { %v1195_v48 = vor.u32 %v1194_v39, %v1191_v38  ;;  %v1567_v50 = vrot.slane %v1499_v34, 5  ;;  %v1172_v53 = vrot.slane %v1171_v40, 4  ;;  %v1200_v54 = vrot.slane %v1198_v42, 5  ;;  %v1064_v26 = vld [vmem:[%s2884_s14 + $0x5c] sm:$0x1] }
  0x84   : > { %v1204_v56 = vrot.slane %v1202_v43, 4  ;;  %v1210_v57 = vrot.slane %v1208_v45, 5  ;;  %v1182_v59 = vrot.slane %v1181_v47, 4  ;;  %v1570_v3 = vrot.slane %v1500_v46, 5  ;;  %v1504_v27 = vld [vmem:[%s2884_s14 + $0x48] sm:$0xe] }
  0x85   : > { %2449 = vmatmul.mubr.msk.bf16.gmra.mxu1 %vm887_vm10, %v2228_v28  ;;  %2473 = vmatmul.mubr.msk.bf16.gmra.mxu0 %vm887_vm10, %v2264_v30  ;;  %v1196_v60 = vrot.slane %v1195_v48, 4  ;;  %v1568_v61 = vsel %vm2928_vm0, %v2249_v49, %v1567_v50  ;;  %v1569_v62 = vrot.slane %v1567_v50, 4  ;;  %v1177_v0 = vsel %vm2917_vm15, %v1172_v53, %v1176_v32  ;;  %v1505_v32 = vld [vmem:[%s2884_s14 + $0x4c] sm:$0xf]  ;;  %v1506_v38 = vld [vmem:[%s2884_s14 + $0x50] sm:$0x1] }
  0x86   : > { %v1205_v2 = vor.u32 %v1204_v56, %v1200_v54  ;;  %v2250_v23 = vrot.slane %v1501_v51, 9  ;;  %v1187_v4 = vsel %vm2917_vm15, %v1182_v59, %v1186_v37  ;;  %v1574_v1 = vrot.slane %v1502_v52, 5  ;;  %v1507_v45 = vld [vmem:[%s2884_s14 + $0x54] sm:$0xe]  ;;  %v1508_v50 = vld [vmem:[%s2884_s14 + $0x58] sm:$0xf] }
  0x87   : > { %v1201_v29 = vsel %vm2917_vm15, %v1196_v60, %v1200_v54  ;;  %v1577_v5 = vrot.slane %v1503_v58, 5  ;;  %v2229_v7 = vcombine.low %v1177_v0, %v1187_v4  ;;  %v1571_v9 = vsel %vm2928_vm0, %v1569_v62, %v1570_v3  ;;  %v1509_v56 = vld [vmem:[%s2884_s14 + $0x5c] sm:$0x1] }
  0x88   : > { %v1206_v8 = vrot.slane %v1205_v2, 4  ;;  %v1213_v11 = vshrl.u32 %v1059_v63, 16  ;;  %v2265_v12 = vcombine.low %v1568_v61, %v1571_v9  ;;  %v1575_v13 = vsel %vm2928_vm0, %v2250_v23, %v1574_v1 }
  0x89   : > { %v1576_v36 = vrot.slane %v1574_v1, 4  ;;  %v1216_v14 = vshll.u32 %v1059_v63, 16  ;;  %2452 = vmatprep.mubr.msk.bf16.mxu1 %vm887_vm10, %v2229_v7  ;;  %v1222_v18 = vshll.u32 %v1060_v6, 16  ;;  %v1226_v19 = vshrl.u32 %v1060_v6, 16 }
  0x8a   : > { %v1211_v16 = vsel %vm2917_vm15, %v1206_v8, %v1210_v57  ;;  %v1215_v17 = vrot.slane %v1213_v11, 4  ;;  %2476 = vmatprep.mubr.msk.bf16.mxu0 %vm887_vm10, %v2265_v12  ;;  %v1232_v25 = vshll.u32 %v1061_v10, 16  ;;  %v1237_v31 = vshrl.u32 %v1062_v15, 16 }
  0x8b   : > { %v2230_v21 = vcombine.low %v1201_v29, %v1211_v16  ;;  %v1578_v22 = vsel %vm2928_vm0, %v1576_v36, %v1577_v5  ;;  %v1218_v24 = vrot.slane %v1216_v14, 5  ;;  %v1224_v28 = vrot.slane %v1222_v18, 5  ;;  %v801_v36 = vld [vmem:[#allocation3 + $0x10] sm:$0xff] }
  0x8c   : > { %v2266_v41 = vcombine.low %v1575_v13, %v1578_v22  ;;  %v1228_v30 = vrot.slane %v1226_v19, 4  ;;  %v1234_v34 = vrot.slane %v1232_v25, 5  ;;  %v1240_v35 = vshll.u32 %v1062_v15, 16  ;;  %v809_v13 = vld [vmem:[#allocation3 + $0x50] sm:$0xff]  ;;  %v807_v15 = vld [vmem:[#allocation3 + $0x40] sm:$0xff]  ;;  %v802_v22 = vld [vmem:[#allocation3 + $0x18] sm:$0xff] }
  0x8d   : > { %2453 = vmatmul.mubr.msk.bf16.gmra.mxu1 %vm887_vm10, %v2230_v21  ;;  %v1219_v33 = vor.u32 %v1218_v24, %v1215_v17  ;;  %v1246_v37 = vshll.u32 %v1063_v20, 16  ;;  %v1239_v40 = vrot.slane %v1237_v31, 4  ;;  %v1250_v42 = vshrl.u32 %v1063_v20, 16  ;;  %v799_v17 = vld [vmem:[#allocation3] sm:$0xff]  ;;  %v810_v20 = vld [vmem:[#allocation3 + $0x58] sm:$0xff] }
  0x8e   : > { %2477 = vmatmul.mubr.msk.bf16.gmra.mxu0 %vm887_vm10, %v2266_v41  ;;  %v1229_v39 = vor.u32 %v1228_v30, %v1224_v28  ;;  %v1256_v43 = vshll.u32 %v1064_v26, 16  ;;  %v1242_v47 = vrot.slane %v1240_v35, 5  ;;  %v2251_v49 = vrot.slane %v1504_v27, 9  ;;  %v808_v26 = vld [vmem:[#allocation3 + $0x48] sm:$0xff] }
  0x8f   : > { %v1220_v46 = vrot.slane %v1219_v33, 4  ;;  %v1248_v48 = vrot.slane %v1246_v37, 5  ;;  %v1252_v52 = vrot.slane %v1250_v42, 4  ;;  %v1581_v54 = vrot.slane %v1505_v32, 5  ;;  %v800_v41 = vld [vmem:[#allocation3 + $0x8] sm:$0xff]  ;;  %v813_v32 = vld [vmem:[#allocation3 + $0x70] sm:$0xff] }
  0x90   : > { %v1230_v51 = vrot.slane %v1229_v39, 4  ;;  %v1258_v53 = vrot.slane %v1256_v43, 5  ;;  %v1243_v58 = vor.u32 %v1242_v47, %v1239_v40  ;;  %v1584_v59 = vrot.slane %v1506_v38, 5  ;;  %v811_v39 = vld [vmem:[#allocation3 + $0x60] sm:$0xff]  ;;  %v814_v47 = vld [vmem:[#allocation3 + $0x78] sm:$0xff] }
  0x91   : > { %v1225_v57 = vsel %vm2917_vm15, %v1220_v46, %v1224_v28  ;;  %v2252_v60 = vrot.slane %v1507_v45, 9  ;;  %v1253_v62 = vor.u32 %v1252_v52, %v1248_v48  ;;  %v1582_v63 = vsel %vm2928_vm0, %v2251_v49, %v1581_v54  ;;  %v803_v42 = vld [vmem:[#allocation3 + $0x20] sm:$0xff]  ;;  %v806_v49 = vld [vmem:[#allocation3 + $0x38] sm:$0xff] }
  0x92   : > { %v1235_v61 = vsel %vm2917_vm15, %v1230_v51, %v1234_v34  ;;  %v1583_v0 = vrot.slane %v1581_v54, 4  ;;  %v1244_v3 = vrot.slane %v1243_v58, 4  ;;  %v1588_v23 = vrot.slane %v1508_v50, 5  ;;  %v805_v34 = vld [vmem:[#allocation3 + $0x30] sm:$0xff] }
  0x93   : > { %v2231_v2 = vcombine.low %v1225_v57, %v1235_v61  ;;  %v1591_v4 = vrot.slane %v1509_v56, 5  ;;  %v1254_v29 = vrot.slane %v1253_v62, 4  ;;  %v804_v56 = vld [vmem:[#allocation3 + $0x28] sm:$0xff] }
  0x94   : > { %v1585_v1 = vsel %vm2928_vm0, %v1583_v0, %v1584_v59  ;;  %v1249_v5 = vsel %vm2917_vm15, %v1244_v3, %v1248_v48  ;;  %v1589_v7 = vsel %vm2928_vm0, %v2252_v60, %v1588_v23  ;;  %v1590_v8 = vrot.slane %v1588_v23, 4 }
  0x95   : > { %2456 = vmatprep.mubr.msk.bf16.mxu1 %vm887_vm10, %v2231_v2  ;;  %v2267_v6 = vcombine.low %v1582_v63, %v1585_v1  ;;  %v1259_v9 = vsel %vm2917_vm15, %v1254_v29, %v1258_v53  ;;  %v812_v53 = vld [vmem:[#allocation3 + $0x68] sm:$0xff] }
  0x96   : > { %v2232_v10 = vcombine.low %v1249_v5, %v1259_v9  ;;  %v1592_v11 = vsel %vm2928_vm0, %v1590_v8, %v1591_v4 }
  0x97   : > { %2480 = vmatprep.mubr.msk.bf16.mxu0 %vm887_vm10, %v2267_v6  ;;  %v2268_v12 = vcombine.low %v1589_v7, %v1592_v11 }
  0x98   : > { %2457 = vmatmul.mubr.msk.bf16.gmra.mxu1 %vm887_vm10, %v2232_v10 }
  0x99   : > { %2481 = vmatmul.mubr.msk.bf16.gmra.mxu0 %vm887_vm10, %v2268_v12 }
 0x12d   : > { %v2430_v14 = vpop.f32.mrf.mxu1  ;;  %v2422_v16 = vpop.f32.mrf.mxu0 }
 0x12e   : > { %v1019_v18 = vadd.f32 %v2430_v14, %v809_v13  ;;  %v1011_v44 = vadd.f32 %v2422_v16, %v801_v36 }
 0x12f   : > { %v978_v19 = vpop.f32.mrf.mxu1  ;;  %v946_v21 = vpop.f32.mrf.mxu0 }
 0x130   : > { %1035 = vst.msk [vmem:[#allocation3 + $0x50] sm:$0xff] %vm887_vm10, %v1019_v18  ;;  %v1017_v55 = vadd.f32 %v978_v19, %v807_v15  ;;  %1027 = vst.msk [vmem:[#allocation3 + $0x10] sm:$0xff] %vm887_vm10, %v1011_v44  ;;  %v1009_v24 = vadd.f32 %v946_v21, %v799_v17 }
 0x131   : > { %v2431_v25 = vpop.f32.mrf.mxu1  ;;  %v2423_v27 = vpop.f32.mrf.mxu0 }
 0x132   : > { %1033 = vst.msk [vmem:[#allocation3 + $0x40] sm:$0xff] %vm887_vm10, %v1017_v55  ;;  %v1020_v28 = vadd.f32 %v2431_v25, %v810_v20  ;;  %1025 = vst.msk [vmem:[#allocation3] sm:$0xff] %vm887_vm10, %v1009_v24  ;;  %v1012_v30 = vadd.f32 %v2423_v27, %v802_v22 }
 0x133   : > { %v981_v31 = vpop.f32.mrf.mxu1  ;;  %v949_v33 = vpop.f32.mrf.mxu0 }
 0x134   : > { %1036 = vst.msk [vmem:[#allocation3 + $0x58] sm:$0xff] %vm887_vm10, %v1020_v28  ;;  %v1018_v35 = vadd.f32 %v981_v31, %v808_v26  ;;  %1028 = vst.msk [vmem:[#allocation3 + $0x18] sm:$0xff] %vm887_vm10, %v1012_v30  ;;  %v1010_v37 = vadd.f32 %v949_v33, %v800_v41 }
 0x135   : > { %v2434_v38 = vpop.f32.mrf.mxu1  ;;  %v2426_v40 = vpop.f32.mrf.mxu0 }
 0x136   : > { %1034 = vst.msk [vmem:[#allocation3 + $0x48] sm:$0xff] %vm887_vm10, %v1018_v35  ;;  %v1023_v43 = vadd.f32 %v2434_v38, %v813_v32  ;;  %1026 = vst.msk [vmem:[#allocation3 + $0x8] sm:$0xff] %vm887_vm10, %v1010_v37  ;;  %v1015_v45 = vadd.f32 %v2426_v40, %v805_v34 }
 0x137   : > { %v994_v46 = vpop.f32.mrf.mxu1  ;;  %v962_v48 = vpop.f32.mrf.mxu0  ;;  %v1262_v62 = vld [vmem:[#allocation3 + $0x10] sm:$0xff] }
 0x138   : > { %1039 = vst.msk [vmem:[#allocation3 + $0x70] sm:$0xff] %vm887_vm10, %v1023_v43  ;;  %v1021_v50 = vadd.f32 %v994_v46, %v811_v39  ;;  %1031 = vst.msk [vmem:[#allocation3 + $0x30] sm:$0xff] %vm887_vm10, %v1015_v45  ;;  %v1013_v51 = vadd.f32 %v962_v48, %v803_v42  ;;  %v1270_v38 = vld [vmem:[#allocation3 + $0x50] sm:$0xff] }
 0x139   : > { %v2435_v52 = vpop.f32.mrf.mxu1  ;;  %v2427_v54 = vpop.f32.mrf.mxu0  ;;  %v1260_v2 = vld [vmem:[#allocation3] sm:$0xff] }
 0x13a   : > { %1037 = vst.msk [vmem:[#allocation3 + $0x60] sm:$0xff] %vm887_vm10, %v1021_v50  ;;  %v1024_v57 = vadd.f32 %v2435_v52, %v814_v47  ;;  %1029 = vst.msk [vmem:[#allocation3 + $0x20] sm:$0xff] %vm887_vm10, %v1013_v51  ;;  %v1016_v58 = vadd.f32 %v2427_v54, %v806_v49  ;;  %v1268_v46 = vld [vmem:[#allocation3 + $0x40] sm:$0xff] }
 0x13b   : > { %v997_v59 = vpop.f32.mrf.mxu1  ;;  %v965_v60 = vpop.f32.mrf.mxu0  ;;  %v1263_v4 = vld [vmem:[#allocation3 + $0x18] sm:$0xff] }
 0x13c   : > { %1040 = vst.msk [vmem:[#allocation3 + $0x78] sm:$0xff] %vm887_vm10, %v1024_v57  ;;  %v1022_v61 = vadd.f32 %v997_v59, %v812_v53  ;;  %1032 = vst.msk [vmem:[#allocation3 + $0x38] sm:$0xff] %vm887_vm10, %v1016_v58  ;;  %v1014_v63 = vadd.f32 %v965_v60, %v804_v56  ;;  %v1271_v51 = vld [vmem:[#allocation3 + $0x58] sm:$0xff] }
 0x13d   : > { %v2446_v0 = vpop.f32.mrf.mxu1  ;;  %v2470_v1 = vpop.f32.mrf.mxu0  ;;  %v1261_v8 = vld [vmem:[#allocation3 + $0x8] sm:$0xff] }
 0x13e   : > { %1038 = vst.msk [vmem:[#allocation3 + $0x68] sm:$0xff] %vm887_vm10, %v1022_v61  ;;  %1030 = vst.msk [vmem:[#allocation3 + $0x28] sm:$0xff] %vm887_vm10, %v1014_v63  ;;  %v1456_v3 = vadd.f32 %v2446_v0, %v1262_v62  ;;  %v1269_v58 = vld [vmem:[#allocation3 + $0x48] sm:$0xff] }
 0x13f   : > { %v1391_v23 = vpop.f32.mrf.mxu1  ;;  %v1724_v7 = vpop.f32.mrf.mxu0  ;;  %v1266_v15 = vld [vmem:[#allocation3 + $0x30] sm:$0xff] }
 0x140   : > { %1472 = vst.msk [vmem:[#allocation3 + $0x10] sm:$0xff] %vm887_vm10, %v1456_v3  ;;  %v1454_v29 = vadd.f32 %v1391_v23, %v1260_v2  ;;  %v1274_v2 = vld [vmem:[#allocation3 + $0x70] sm:$0xff] }
 0x141   : > { %v2447_v5 = vpop.f32.mrf.mxu1  ;;  %v2471_v11 = vpop.f32.mrf.mxu0  ;;  %v1264_v44 = vld [vmem:[#allocation3 + $0x20] sm:$0xff] }
 0x142   : > { %1470 = vst.msk [vmem:[#allocation3] sm:$0xff] %vm887_vm10, %v1454_v29  ;;  %v1457_v6 = vadd.f32 %v2447_v5, %v1263_v4  ;;  %v1272_v5 = vld [vmem:[#allocation3 + $0x60] sm:$0xff] }
 0x143   : > { %v1394_v9 = vpop.f32.mrf.mxu1  ;;  %v1727_v13 = vpop.f32.mrf.mxu0  ;;  %v1267_v24 = vld [vmem:[#allocation3 + $0x38] sm:$0xff] }
 0x144   : > { %1473 = vst.msk [vmem:[#allocation3 + $0x18] sm:$0xff] %vm887_vm10, %v1457_v6  ;;  %v1455_v10 = vadd.f32 %v1394_v9, %v1261_v8 }
 0x145   : > { %v2450_v17 = vpop.f32.mrf.mxu1  ;;  %v2474_v19 = vpop.f32.mrf.mxu0  ;;  %v1265_v31 = vld [vmem:[#allocation3 + $0x28] sm:$0xff] }
 0x146   : > { %1471 = vst.msk [vmem:[#allocation3 + $0x8] sm:$0xff] %vm887_vm10, %v1455_v10  ;;  %v1460_v20 = vadd.f32 %v2450_v17, %v1266_v15  ;;  %v1275_v10 = vld [vmem:[#allocation3 + $0x78] sm:$0xff] }
 0x147   : > { %v1595_v12 = vld [vmem:[#allocation3 + $0x10] sm:$0xff]  ;;  %v1407_v22 = vpop.f32.mrf.mxu1  ;;  %v1740_v25 = vpop.f32.mrf.mxu0 }
 0x148   : > { %v1789_v36 = vadd.f32 %v2470_v1, %v1595_v12  ;;  %1476 = vst.msk [vmem:[#allocation3 + $0x30] sm:$0xff] %vm887_vm10, %v1460_v20  ;;  %v1458_v26 = vadd.f32 %v1407_v22, %v1264_v44 }
 0x149   : > { %v1593_v14 = vld [vmem:[#allocation3] sm:$0xff]  ;;  %v2451_v41 = vpop.f32.mrf.mxu1  ;;  %v2475_v28 = vpop.f32.mrf.mxu0 }
 0x14a   : > { %1805 = vst.msk [vmem:[#allocation3 + $0x10] sm:$0xff] %vm887_vm10, %v1789_v36  ;;  %v1787_v16 = vadd.f32 %v1724_v7, %v1593_v14  ;;  %1474 = vst.msk [vmem:[#allocation3 + $0x20] sm:$0xff] %vm887_vm10, %v1458_v26  ;;  %v1461_v30 = vadd.f32 %v2451_v41, %v1267_v24  ;;  %v1273_v14 = vld [vmem:[#allocation3 + $0x68] sm:$0xff] }
 0x14b   : > { %v1596_v18 = vld [vmem:[#allocation3 + $0x18] sm:$0xff]  ;;  %v1410_v32 = vpop.f32.mrf.mxu1  ;;  %v1743_v34 = vpop.f32.mrf.mxu0 }
 0x14c   : > { %1803 = vst.msk [vmem:[#allocation3] sm:$0xff] %vm887_vm10, %v1787_v16  ;;  %v1790_v21 = vadd.f32 %v2471_v11, %v1596_v18  ;;  %1477 = vst.msk [vmem:[#allocation3 + $0x38] sm:$0xff] %vm887_vm10, %v1461_v30  ;;  %v1459_v33 = vadd.f32 %v1410_v32, %v1265_v31 }
 0x14d   : > { %v1594_v55 = vld [vmem:[#allocation3 + $0x8] sm:$0xff]  ;;  %v2454_v39 = vpop.f32.mrf.mxu1 }
 0x14e   : > { %1806 = vst.msk [vmem:[#allocation3 + $0x18] sm:$0xff] %vm887_vm10, %v1790_v21  ;;  %v1788_v27 = vadd.f32 %v1727_v13, %v1594_v55  ;;  %1475 = vst.msk [vmem:[#allocation3 + $0x28] sm:$0xff] %vm887_vm10, %v1459_v33  ;;  %v1464_v42 = vadd.f32 %v2454_v39, %v1270_v38  ;;  %v2478_v43 = vpop.f32.mrf.mxu0 }
 0x14f   : > { %v1599_v35 = vld [vmem:[#allocation3 + $0x30] sm:$0xff]  ;;  %v1423_v47 = vpop.f32.mrf.mxu1 }
 0x150   : > { %1804 = vst.msk [vmem:[#allocation3 + $0x8] sm:$0xff] %vm887_vm10, %v1788_v27  ;;  %v1793_v37 = vadd.f32 %v2474_v19, %v1599_v35  ;;  %1480 = vst.msk [vmem:[#allocation3 + $0x50] sm:$0xff] %vm887_vm10, %v1464_v42  ;;  %v1462_v49 = vadd.f32 %v1423_v47, %v1268_v46  ;;  %v1756_v53 = vpop.f32.mrf.mxu0 }
 0x151   : > { %v1597_v40 = vld [vmem:[#allocation3 + $0x20] sm:$0xff]  ;;  %v2455_v52 = vpop.f32.mrf.mxu1 }
 0x152   : > { %1809 = vst.msk [vmem:[#allocation3 + $0x30] sm:$0xff] %vm887_vm10, %v1793_v37  ;;  %v1791_v45 = vadd.f32 %v1740_v25, %v1597_v40  ;;  %1478 = vst.msk [vmem:[#allocation3 + $0x40] sm:$0xff] %vm887_vm10, %v1462_v49  ;;  %v1465_v56 = vadd.f32 %v2455_v52, %v1271_v51  ;;  %v2479_v61 = vpop.f32.mrf.mxu0 }
 0x153   : > { %v1600_v48 = vld [vmem:[#allocation3 + $0x38] sm:$0xff]  ;;  %v1426_v59 = vpop.f32.mrf.mxu1 }
 0x154   : > { %1807 = vst.msk [vmem:[#allocation3 + $0x20] sm:$0xff] %vm887_vm10, %v1791_v45  ;;  %v1794_v50 = vadd.f32 %v2475_v28, %v1600_v48  ;;  %1481 = vst.msk [vmem:[#allocation3 + $0x58] sm:$0xff] %vm887_vm10, %v1465_v56  ;;  %v1463_v60 = vadd.f32 %v1426_v59, %v1269_v58  ;;  %v1759_v23 = vpop.f32.mrf.mxu0 }
 0x155   : > { %v1598_v54 = vld [vmem:[#allocation3 + $0x28] sm:$0xff] }
 0x156   : > { %1810 = vst.msk [vmem:[#allocation3 + $0x38] sm:$0xff] %vm887_vm10, %v1794_v50  ;;  %v1792_v57 = vadd.f32 %v1743_v34, %v1598_v54  ;;  %1479 = vst.msk [vmem:[#allocation3 + $0x48] sm:$0xff] %vm887_vm10, %v1463_v60 }
 0x157   : > { %v1603_v62 = vld [vmem:[#allocation3 + $0x50] sm:$0xff] }
 0x158   : > { %1808 = vst.msk [vmem:[#allocation3 + $0x28] sm:$0xff] %vm887_vm10, %v1792_v57  ;;  %v1797_v63 = vadd.f32 %v2478_v43, %v1603_v62  ;;  %v2458_v3 = vpop.f32.mrf.mxu1 }
 0x159   : > { %v1601_v0 = vld [vmem:[#allocation3 + $0x40] sm:$0xff]  ;;  %v1468_v29 = vadd.f32 %v2458_v3, %v1274_v2  ;;  %v2482_v12 = vpop.f32.mrf.mxu0 }
 0x15a   : > { %1813 = vst.msk [vmem:[#allocation3 + $0x50] sm:$0xff] %vm887_vm10, %v1797_v63  ;;  %v1795_v4 = vadd.f32 %v1756_v53, %v1601_v0  ;;  %v1439_v6 = vpop.f32.mrf.mxu1 }
 0x15b   : > { %v1604_v1 = vld [vmem:[#allocation3 + $0x58] sm:$0xff]  ;;  %1484 = vst.msk [vmem:[#allocation3 + $0x70] sm:$0xff] %vm887_vm10, %v1468_v29  ;;  %v1466_v8 = vadd.f32 %v1439_v6, %v1272_v5  ;;  %v1772_v17 = vpop.f32.mrf.mxu0 }
 0x15c   : > { %1811 = vst.msk [vmem:[#allocation3 + $0x40] sm:$0xff] %vm887_vm10, %v1795_v4  ;;  %v1798_v7 = vadd.f32 %v2479_v61, %v1604_v1  ;;  %v2459_v11 = vpop.f32.mrf.mxu1 }
 0x15d   : > { %v1602_v9 = vld [vmem:[#allocation3 + $0x48] sm:$0xff]  ;;  %1482 = vst.msk [vmem:[#allocation3 + $0x60] sm:$0xff] %vm887_vm10, %v1466_v8  ;;  %v1469_v36 = vadd.f32 %v2459_v11, %v1275_v10  ;;  %v2483_v20 = vpop.f32.mrf.mxu0 }
 0x15e   : > { %1814 = vst.msk [vmem:[#allocation3 + $0x58] sm:$0xff] %vm887_vm10, %v1798_v7  ;;  %v1796_v13 = vadd.f32 %v1759_v23, %v1602_v9  ;;  %v1442_v15 = vpop.f32.mrf.mxu1 }
 0x15f   : > { %1485 = vst.msk [vmem:[#allocation3 + $0x78] sm:$0xff] %vm887_vm10, %v1469_v36  ;;  %v1467_v16 = vadd.f32 %v1442_v15, %v1273_v14  ;;  %v1775_v25 = vpop.f32.mrf.mxu0 }
 0x160   : > { %1812 = vst.msk [vmem:[#allocation3 + $0x48] sm:$0xff] %vm887_vm10, %v1796_v13 }
 0x161   : > { %1483 = vst.msk [vmem:[#allocation3 + $0x68] sm:$0xff] %vm887_vm10, %v1467_v16 }
 0x162   : > { %v1607_v18 = vld [vmem:[#allocation3 + $0x70] sm:$0xff] }
 0x163   : > { %v1801_v44 = vadd.f32 %v2482_v12, %v1607_v18 }
 0x164   : > { %v1605_v19 = vld [vmem:[#allocation3 + $0x60] sm:$0xff] }
 0x165   : > { %1817 = vst.msk [vmem:[#allocation3 + $0x70] sm:$0xff] %vm887_vm10, %v1801_v44  ;;  %v1799_v21 = vadd.f32 %v1772_v17, %v1605_v19 }
 0x166   : > { %v1608_v22 = vld [vmem:[#allocation3 + $0x78] sm:$0xff] }
 0x167   : > { %1815 = vst.msk [vmem:[#allocation3 + $0x60] sm:$0xff] %vm887_vm10, %v1799_v21  ;;  %v1802_v55 = vadd.f32 %v2483_v20, %v1608_v22  ;;  %1822 = sbr.rel (%p2281_p8) target bundleno = 414 (0x19e), region = 48 }
 0x168   : > { %v1606_v24 = vld [vmem:[#allocation3 + $0x68] sm:$0xff] }
 0x169   : > { %1818 = vst.msk [vmem:[#allocation3 + $0x78] sm:$0xff] %vm887_vm10, %v1802_v55  ;;  %v1800_v26 = vadd.f32 %v1775_v25, %v1606_v24 }
 0x16b   : > { %1816 = vst.msk [vmem:[#allocation3 + $0x68] sm:$0xff] %vm887_vm10, %v1800_v26 }
 0x16c   : > { %v1823_v27 = vld [vmem:[#allocation3] sm:$0xff]  ;;  %v3103_v41 = vld [vmem:[%s3214_s4] ss:$0 sm:$0xff]  ;;  %v1825_v32 = vld [vmem:[#allocation3 + $0x10] sm:$0xff]  ;;  %vm1926_vm1 = vcmask 519168   ;;  %vm1980_vm2 = vcmask 516096  }
 0x16d   : > { %v1824_v28 = vld [vmem:[#allocation3 + $0x8] sm:$0xff]  ;;  %v1846_v30 = vadd.f32 %v3103_v41, %v1823_v27  ;;  %v1826_v33 = vld [vmem:[#allocation3 + $0x18] sm:$0xff]  ;;  %v1827_v34 = vld [vmem:[#allocation3 + $0x20] sm:$0xff]  ;;  %v1848_v35 = vadd.f32 %v3103_v41, %v1825_v32 }
 0x16e   : > { %v1847_v31 = vadd.f32 %v3103_v41, %v1824_v28  ;;  %v1849_v37 = vadd.f32 %v3103_v41, %v1826_v33  ;;  %v1850_v38 = vadd.f32 %v3103_v41, %v1827_v34  ;;  %v1828_v53 = vld [vmem:[#allocation3 + $0x28] sm:$0xff]  ;;  %v1829_v54 = vld [vmem:[#allocation3 + $0x30] sm:$0xff]  ;;  %v1830_v60 = vld [vmem:[#allocation3 + $0x38] sm:$0xff] }
 0x16f   : > { %v2321_v39 = vpack.c.bf16 %v1846_v30, %v1846_v30  ;;  %v1943_v40 = vsel %vm887_vm10, %v1846_v30, 0.0  ;;  %v1982_v42 = vmul.f32 %v1846_v30, %v1846_v30  ;;  %v2323_v47 = vpack.c.bf16 %v1848_v35, %v1848_v35  ;;  %v1831_v61 = vld [vmem:[#allocation3 + $0x40] sm:$0xff]  ;;  %v1832_v14 = vld [vmem:[#allocation3 + $0x48] sm:$0xff]  ;;  %v1833_v44 = vld [vmem:[#allocation3 + $0x50] sm:$0xff] }
 0x170   : > { %v2322_v43 = vpack.c.bf16 %v1847_v31, %v1847_v31  ;;  %v1944_v45 = vsel %vm887_vm10, %v1847_v31, 0.0  ;;  %v1983_v46 = vmul.f32 %v1847_v31, %v1847_v31  ;;  %v1946_v48 = vsel %vm887_vm10, %v1848_v35, 0.0  ;;  %v1834_v31 = vld [vmem:[#allocation3 + $0x58] sm:$0xff]  ;;  %v1835_v32 = vld [vmem:[#allocation3 + $0x60] sm:$0xff] }
 0x171   : > { %1927 = vst.msk [vmem:[%s2684_s18] sm:$0xf] %vm1926_vm1, %v2321_v39  ;;  %v1998_v49 = vsel %vm887_vm10, %v1982_v42, 0.0  ;;  %v1945_v50 = vadd.f32 %v1944_v45, %v1943_v40  ;;  %v1984_v51 = vmul.f32 %v1848_v35, %v1848_v35  ;;  %v2324_v52 = vpack.c.bf16 %v1849_v37, %v1849_v37  ;;  %1929 = vst.msk [vmem:[%s2684_s18 + $0x8] sm:$0xf] %vm1926_vm1, %v2323_v47 }
 0x172   : > { %1928 = vst.msk [vmem:[%s2684_s18 + $0x4] sm:$0xf] %vm1926_vm1, %v2322_v43  ;;  %v1999_v56 = vsel %vm887_vm10, %v1983_v46, 0.0  ;;  %v1948_v57 = vsel %vm887_vm10, %v1849_v37, 0.0  ;;  %v1985_v58 = vmul.f32 %v1849_v37, %v1849_v37  ;;  %v2325_v59 = vpack.c.bf16 %v1850_v38, %v1850_v38  ;;  %v1836_v43 = vld [vmem:[#allocation3 + $0x68] sm:$0xff] }
 0x173   : > { %v2000_v62 = vadd.f32 %v1999_v56, %v1998_v49  ;;  %v1947_v63 = vadd.f32 %v1946_v48, %v1945_v50  ;;  %v2001_v0 = vsel %vm887_vm10, %v1984_v51, 0.0  ;;  %1930 = vst.msk [vmem:[%s2684_s18 + $0xc] sm:$0xf] %vm1926_vm1, %v2324_v52  ;;  %v1950_v2 = vsel %vm887_vm10, %v1850_v38, 0.0  ;;  %v1837_v49 = vld [vmem:[#allocation3 + $0x70] sm:$0xff] }
 0x174   : > { %v2003_v3 = vsel %vm887_vm10, %v1985_v58, 0.0  ;;  %1931 = vst.msk [vmem:[%s2684_s18 + $0x10] sm:$0xf] %vm1926_vm1, %v2325_v59  ;;  %v1986_v23 = vmul.f32 %v1850_v38, %v1850_v38  ;;  %v1851_v4 = vadd.f32 %v3103_v41, %v1828_v53  ;;  %v1852_v29 = vadd.f32 %v3103_v41, %v1829_v54 }
 0x175   : > { %v2002_v1 = vadd.f32 %v2001_v0, %v2000_v62  ;;  %v1949_v5 = vadd.f32 %v1948_v57, %v1947_v63  ;;  %v1853_v6 = vadd.f32 %v3103_v41, %v1830_v60  ;;  %v1854_v7 = vadd.f32 %v3103_v41, %v1831_v61  ;;  %v1838_v62 = vld [vmem:[#allocation3 + $0x78] sm:$0xff] }
 0x176   : > { %v2005_v8 = vsel %vm887_vm10, %v1986_v23, 0.0  ;;  %v2326_v9 = vpack.c.bf16 %v1851_v4, %v1851_v4  ;;  %v1952_v10 = vsel %vm887_vm10, %v1851_v4, 0.0  ;;  %v1987_v11 = vmul.f32 %v1851_v4, %v1851_v4 }
 0x177   : > { %v2004_v12 = vadd.f32 %v2003_v3, %v2002_v1  ;;  %v1951_v13 = vadd.f32 %v1950_v2, %v1949_v5  ;;  %v2327_v36 = vpack.c.bf16 %v1852_v29, %v1852_v29  ;;  %v1954_v16 = vsel %vm887_vm10, %v1852_v29, 0.0 }
 0x178   : > { %1932 = vst.msk [vmem:[%s2684_s18 + $0x14] sm:$0xf] %vm1926_vm1, %v2326_v9  ;;  %v2007_v15 = vsel %vm887_vm10, %v1987_v11, 0.0  ;;  %v1988_v17 = vmul.f32 %v1852_v29, %v1852_v29  ;;  %v2328_v18 = vpack.c.bf16 %v1853_v6, %v1853_v6  ;;  %v1989_v21 = vmul.f32 %v1853_v6, %v1853_v6 }
 0x179   : > { %v2006_v19 = vadd.f32 %v2005_v8, %v2004_v12  ;;  %v1953_v20 = vadd.f32 %v1952_v10, %v1951_v13  ;;  %1933 = vst.msk [vmem:[%s2684_s18 + $0x18] sm:$0xf] %vm1926_vm1, %v2327_v36  ;;  %v2329_v22 = vpack.c.bf16 %v1854_v7, %v1854_v7  ;;  %v1956_v24 = vsel %vm887_vm10, %v1853_v6, 0.0 }
 0x17a   : > { %v2009_v55 = vsel %vm887_vm10, %v1988_v17, 0.0  ;;  %1934 = vst.msk [vmem:[%s2684_s18 + $0x1c] sm:$0xf] %vm1926_vm1, %v2328_v18  ;;  %v1990_v25 = vmul.f32 %v1854_v7, %v1854_v7  ;;  %v1855_v26 = vadd.f32 %v3103_v41, %v1832_v14  ;;  %v1856_v30 = vadd.f32 %v3103_v41, %v1833_v44 }
 0x17b   : > { %v2008_v27 = vadd.f32 %v2007_v15, %v2006_v19  ;;  %v1955_v28 = vadd.f32 %v1954_v16, %v1953_v20  ;;  %1935 = vst.msk [vmem:[%s2684_s18 + $0x20] sm:$0xf] %vm1926_vm1, %v2329_v22  ;;  %v2011_v33 = vsel %vm887_vm10, %v1989_v21, 0.0  ;;  %v1958_v34 = vsel %vm887_vm10, %v1854_v7, 0.0 }
 0x17c   : > { %v2330_v35 = vpack.c.bf16 %v1855_v26, %v1855_v26  ;;  %v1991_v37 = vmul.f32 %v1855_v26, %v1855_v26  ;;  %v2013_v40 = vsel %vm887_vm10, %v1990_v25, 0.0  ;;  %v2331_v42 = vpack.c.bf16 %v1856_v30, %v1856_v30 }
 0x17d   : > { %v2010_v38 = vadd.f32 %v2009_v55, %v2008_v27  ;;  %v1957_v39 = vadd.f32 %v1956_v24, %v1955_v28  ;;  %v1960_v45 = vsel %vm887_vm10, %v1855_v26, 0.0  ;;  %v1992_v46 = vmul.f32 %v1856_v30, %v1856_v30 }
 0x17e   : > { %1936 = vst.msk [vmem:[%s2684_s18 + $0x24] sm:$0xf] %vm1926_vm1, %v2330_v35  ;;  %v1857_v47 = vadd.f32 %v3103_v41, %v1834_v31  ;;  %v1858_v48 = vadd.f32 %v3103_v41, %v1835_v32  ;;  %1937 = vst.msk [vmem:[%s2684_s18 + $0x28] sm:$0xf] %vm1926_vm1, %v2331_v42  ;;  %v1962_v52 = vsel %vm887_vm10, %v1856_v30, 0.0  ;;  %v2015_v53 = vsel %vm887_vm10, %v1991_v37, 0.0 }
 0x17f   : > { %v2012_v50 = vadd.f32 %v2011_v33, %v2010_v38  ;;  %v1959_v51 = vadd.f32 %v1958_v34, %v1957_v39  ;;  %v1859_v57 = vadd.f32 %v3103_v41, %v1836_v43  ;;  %v1860_v61 = vadd.f32 %v3103_v41, %v1837_v49 }
 0x180   : > { %v2332_v54 = vpack.c.bf16 %v1857_v47, %v1857_v47  ;;  %v1993_v56 = vmul.f32 %v1857_v47, %v1857_v47  ;;  %v2333_v60 = vpack.c.bf16 %v1858_v48, %v1858_v48  ;;  %v2017_v63 = vsel %vm887_vm10, %v1992_v46, 0.0 }
 0x181   : > { %v2014_v58 = vadd.f32 %v2013_v40, %v2012_v50  ;;  %v1961_v59 = vadd.f32 %v1960_v45, %v1959_v51  ;;  %v1964_v0 = vsel %vm887_vm10, %v1857_v47, 0.0  ;;  %v1994_v2 = vmul.f32 %v1858_v48, %v1858_v48 }
 0x182   : > { %1938 = vst.msk [vmem:[%s2684_s18 + $0x2c] sm:$0xf] %vm1926_vm1, %v2332_v54  ;;  %v2334_v3 = vpack.c.bf16 %v1859_v57, %v1859_v57  ;;  %1939 = vst.msk [vmem:[%s2684_s18 + $0x30] sm:$0xf] %vm1926_vm1, %v2333_v60  ;;  %v2335_v29 = vpack.c.bf16 %v1860_v61, %v1860_v61  ;;  %v2019_v1 = vsel %vm887_vm10, %v1993_v56, 0.0  ;;  %v1966_v5 = vsel %vm887_vm10, %v1858_v48, 0.0 }
 0x183   : > { %v2016_v23 = vadd.f32 %v2015_v53, %v2014_v58  ;;  %v1963_v4 = vadd.f32 %v1962_v52, %v1961_v59  ;;  %v1995_v6 = vmul.f32 %v1859_v57, %v1859_v57  ;;  %v1861_v7 = vadd.f32 %v3103_v41, %v1838_v62 }
 0x184   : > { %1940 = vst.msk [vmem:[%s2684_s18 + $0x34] sm:$0xf] %vm1926_vm1, %v2334_v3  ;;  %1941 = vst.msk [vmem:[%s2684_s18 + $0x38] sm:$0xf] %vm1926_vm1, %v2335_v29  ;;  %v2021_v10 = vsel %vm887_vm10, %v1994_v2, 0.0  ;;  %v1968_v11 = vsel %vm887_vm10, %v1859_v57, 0.0  ;;  %v1996_v12 = vmul.f32 %v1860_v61, %v1860_v61 }
 0x185   : > { %v2018_v8 = vadd.f32 %v2017_v63, %v2016_v23  ;;  %v1965_v9 = vadd.f32 %v1964_v0, %v1963_v4  ;;  %v2336_v13 = vpack.c.bf16 %v1861_v7, %v1861_v7  ;;  %v2023_v15 = vsel %vm887_vm10, %v1995_v6, 0.0 }
 0x186   : > { %v1970_v16 = vsel %vm887_vm10, %v1860_v61, 0.0  ;;  %v1997_v17 = vmul.f32 %v1861_v7, %v1861_v7  ;;  %v1972_v44 = vsel %vm887_vm10, %v1861_v7, 0.0  ;;  %v2025_v19 = vsel %vm887_vm10, %v1996_v12, 0.0 }
 0x187   : > { %v2020_v36 = vadd.f32 %v2019_v1, %v2018_v8  ;;  %v1967_v14 = vadd.f32 %v1966_v5, %v1965_v9  ;;  %1942 = vst.msk [vmem:[%s2684_s18 + $0x3c] sm:$0xf] %vm1926_vm1, %v2336_v13 }
 0x188   : > { %v2027_v22 = vsel %vm887_vm10, %v1997_v17, 0.0 }
 0x189   : > { %v2022_v41 = vadd.f32 %v2021_v10, %v2020_v36  ;;  %v1969_v18 = vadd.f32 %v1968_v11, %v1967_v14 }
 0x18b   : > { %v1971_v20 = vadd.f32 %v1970_v16, %v1969_v18  ;;  %v2024_v21 = vadd.f32 %v2023_v15, %v2022_v41 }
 0x18d   : > { %v1973_v55 = vadd.f32 %v1972_v44, %v1971_v20  ;;  %v2026_v24 = vadd.f32 %v2025_v19, %v2024_v21 }
 0x18f   : > { %v1974_v25 = vrot.slane %v1973_v55, 4  ;;  %v2028_v26 = vadd.f32 %v2027_v22, %v2026_v24 }
 0x191   : > { %v1975_v27 = vadd.f32 %v1974_v25, %v1973_v55  ;;  %v2029_v28 = vrot.slane %v2028_v26, 4 }
 0x193   : > { %v1976_v30 = vrot.slane %v1975_v27, 2  ;;  %v2030_v31 = vadd.f32 %v2029_v28, %v2028_v26 }
 0x195   : > { %v1977_v32 = vadd.f32 %v1976_v30, %v1975_v27  ;;  %v2031_v33 = vrot.slane %v2030_v31, 2 }
 0x197   : > { %v1978_v34 = vrot.slane %v1977_v32, 1  ;;  %v2032_v35 = vadd.f32 %v2031_v33, %v2030_v31 }
 0x199   : > { %v1979_v37 = vadd.f32 %v1978_v34, %v1977_v32  ;;  %v2033_v38 = vrot.slane %v2032_v35, 1 }
 0x19b   : > { %1981 = vst.msk [vmem:[%s329_s12] sm:$0x1] %vm1980_vm2, %v1979_v37  ;;  %v2034_v39 = vadd.f32 %v2033_v38, %v2032_v35 }
 0x19d   : > { %2035 = vst.msk [vmem:[%s332_s21] sm:$0x1] %vm1980_vm2, %v2034_v39 }
 0x19e PF: > { %s18_s28 = sadd.s32 1, %s2592_s28   ;;  %s3231_s20 = sld [smem:[#allocation4_spill]] }
 0x19f   : > { %p15_p9 = scmp.ge.s32.totalorder %s18_s28, 8   ;;  %s3232_s24 = smov %s2584_s26 }
 0x1a0   : > { %s3233_s25 = smov %s2588_s27  ;;  %s3234_s26 = smov %s3237_s29 }
 0x1a1   :  { %17 = sbr.rel (!%p15_p9) target bundleno = 3 (0x3), region = 110 }
 0x1a4   : > { %s3235_s27 = smov %s3231_s20 }

// kernel: decoder_block_forward.5
= control target key start
LH: loop header
LB: loop body
LE: loop exit
PB: predicated region body
PF: predicated region fallthrough
CT: control target
= control target key end

     0   :  { %s4039_s24 = smov 0   ;;  %s4041_s25 = smov 0   ;;  %s4913_s0 = inlined_call_operand.vmem [shape: bf16[2,8,16,64], index: 0, kind: input, shape index: {}]   ;;  %s4914_s1 = inlined_call_operand.vmem [shape: bf16[2,8,16,64], index: 1, kind: input, shape index: {}]   ;;  %s4915_s2 = inlined_call_operand.vmem [shape: bf16[9,64,64], index: 2, kind: input, shape index: {}]   ;;  %s4916_s3 = inlined_call_operand.vmem [shape: bf16[9,64,64], index: 3, kind: input, shape index: {}]   ;;  %s4917_s4 = inlined_call_operand.vmem [shape: f32[1,64], index: 4, kind: input, shape index: {}]   ;;  %s4918_s5 = inlined_call_operand.vmem [shape: bf16[2,8,16,64], index: 5, kind: output, shape index: {0}]   ;;  %s4919_s6 = inlined_call_operand.vmem [shape: f32[2,1,64], index: 6, kind: output, shape index: {1}]   ;;  %s4920_s7 = inlined_call_operand.vmem [shape: f32[2,1,64], index: 7, kind: output, shape index: {2}]  }
   0x1   :  { %4921 = sst [smem:[#allocation5_spill]] %s4913_s0  ;;  %s4043_s26 = smov 0  }
   0x2   :  { %s4045_s27 = smov 0   ;;  %s4047_s28 = smov 0  }
   0x3 LB: > { %s27_s29 = sadd.s32 1, %s3987_s26  ;;  %s30_s30 = sadd.s32 1, %s3991_s27  ;;  %s3995_s28 = sphi %s4047_s28, %s18_s28   ;;  %s3991_s27 = sphi %s4045_s27, %s4939_s27   ;;  %s3987_s26 = sphi %s4043_s26, %s4938_s26   ;;  %s3983_s25 = sphi %s4041_s25, %s4937_s25   ;;  %s3979_s24 = sphi %s4039_s24, %s4936_s24  }
   0x4   : > { %p28_p0 = scmp.ge.s32.totalorder %s27_s29, 3  ;;  %p3434_p1 = scmp.ge.s32.totalorder %s3995_s28, 1 }
   0x5   : > { %p288_p2 = scmp.lt.s32.totalorder %s3995_s28, 7 }
   0x6   : > { %s4941_s29 = smov (%p28_p0, %s27_s29), 0  ;;  %s4943_s30 = smov (!%p28_p0, %s30_s30), %s3991_s27 }
   0x7   : > { %p289_p3 = pnand %p3434_p1, %p288_p2  ;;  %p32_p4 = scmp.ge.s32.totalorder %s4943_s30, 2 }
   0x8   : > { %p343_p5 = scmp.lt.s32.totalorder (!%p289_p3), %s3983_s25, 1  ;;  %s353_s8 = smul.u32 (!%p289_p3), 3, %s3979_s24 }
   0x9   : > { %s4945_s30 = smov (%p32_p4, %s4943_s30), 0  ;;  %292 = sbr.rel (%p289_p3) target bundleno = 505 (0x1f9), region = 40 }
   0xa   : > { %p354_p6 = scmp.lt.s32.totalorder (!%p289_p3), %s353_s8, 8  ;;  %s4922_s0 = sld [smem:[#allocation5_spill]] (!%p289_p3) }
   0xb   : > { %p3445_p7 = scmp.ne.s32.totalorder (!%p289_p3), %s3979_s24, 0 }
   0xe   : > { %s4947_s25 = smov (!%p343_p5, %s3983_s25), 1  ;;  %s4949_s8 = smov (!%p354_p6, %s353_s8), 8 }
   0xf   : > { %s3636_s9 = sshll.u32 %s4947_s25, 6  ;;  %s377_s10 = scalar_lea.vmem %s4920_s7, %s4947_s25 }
  0x10   : > { %s4082_s15 = scalar_lea.vmem %s4922_s0, %s3636_s9  ;;  %s4087_s18 = scalar_lea.vmem %s4914_s1, %s3636_s9 }
  0x11   : > { %s4092_s21 = scalar_lea.vmem %s4918_s5, %s3636_s9  ;;  %s3638_s11 = sshll.u32 %s4949_s8, 5 }
  0x12   : > { %s4101_s14 = scalar_lea.vmem %s4915_s2, %s3638_s11  ;;  %s4106_s17 = scalar_lea.vmem %s4916_s3, %s3638_s11 }
  0x13   : > { %382 = sbr.rel (%p3445_p7) target bundleno = 124 (0x7c), region = 44 }
  0x18   : > { %vm386_vm0 = vcmask 516096   ;;  %vm394_vm1 = vsmask.f32 256  ;;  %v396_v0 = vld [vmem:[#allocation2 + $0xc] sm:$0x1]  ;;  %vm383_vm2 = vcmask 519168  }
  0x19   : > { %vm4111_vm3 = vmand %vm386_vm0, %vm394_vm1  ;;  %v399_v2 = vld [vmem:[#allocation2 + $0x18] sm:$0x1]  ;;  %v402_v3 = vld [vmem:[#allocation2 + $0x24] sm:$0x1]  ;;  %vm420_vm4 = vsmask.f32 7938 }
  0x1a   : > { %v397_v4 = vsel %vm4111_vm3, 0, %v396_v0  ;;  %v400_v5 = vsel %vm4111_vm3, 0, %v399_v2  ;;  %v403_v6 = vsel %vm4111_vm3, 0, %v402_v3  ;;  %v405_v7 = vld [vmem:[#allocation2 + $0x30] sm:$0x1]  ;;  %vm4125_vm5 = vmand %vm386_vm0, %vm420_vm4  ;;  %v3997_v12 = vmov 0  }
  0x1b   : > { %398 = vst [vmem:[#allocation2 + $0xc] sm:$0x1] %v397_v4  ;;  %401 = vst [vmem:[#allocation2 + $0x18] sm:$0x1] %v400_v5  ;;  %v406_v8 = vsel %vm4111_vm3, 0, %v405_v7  ;;  %vm970_vm6 = vcmask 523264  }
  0x1c   : > { %404 = vst [vmem:[#allocation2 + $0x24] sm:$0x1] %v403_v6  ;;  %v408_v9 = vld [vmem:[#allocation2 + $0x3c] sm:$0x1]  ;;  %v411_v10 = vld [vmem:[#allocation2 + $0x48] sm:$0x1]  ;;  %vm4202_vm8 = vmand %vm383_vm2, %vm420_vm4 }
  0x1d   : > { %384 = vst.msk [vmem:[#allocation2] sm:$0xf] %vm383_vm2, %v3997_v12  ;;  %385 = vst.msk [vmem:[#allocation2 + $0x4] sm:$0xf] %vm383_vm2, %v3997_v12  ;;  %v409_v13 = vsel %vm4111_vm3, 0, %v408_v9  ;;  %v412_v14 = vsel %vm4111_vm3, 0, %v411_v10 }
  0x1e   : > { %387 = vst.msk [vmem:[#allocation2 + $0x8] sm:$0x1] %vm386_vm0, %v3997_v12  ;;  %391 = vst.msk [vmem:[#allocation2 + $0x74] sm:$0x1] %vm386_vm0, %v3997_v12  ;;  %v414_v15 = vld [vmem:[#allocation2 + $0x54] sm:$0x1] }
  0x1f   : > { %389 = vst.msk [vmem:[#allocation2 + $0x6c] sm:$0xf] %vm383_vm2, %v3997_v12  ;;  %390 = vst.msk [vmem:[#allocation2 + $0x70] sm:$0xf] %vm383_vm2, %v3997_v12  ;;  %v417_v16 = vld [vmem:[#allocation2 + $0x60] sm:$0x1] }
  0x20   : > { %446 = vst.msk [vmem:[#allocation3] sm:$0xf] %vm383_vm2, %v3997_v12  ;;  %447 = vst.msk [vmem:[#allocation3 + $0x4] sm:$0xf] %vm383_vm2, %v3997_v12  ;;  %v415_v17 = vsel %vm4111_vm3, 0, %v414_v15  ;;  %v418_v18 = vsel %vm4111_vm3, 0, %v417_v16 }
  0x21   : > { %448 = vst.msk [vmem:[#allocation3 + $0x8] sm:$0x1] %vm386_vm0, %v3997_v12  ;;  %452 = vst.msk [vmem:[#allocation3 + $0x74] sm:$0x1] %vm386_vm0, %v3997_v12  ;;  %v422_v19 = vld [vmem:[#allocation2 + $0x14] sm:$0x1] }
  0x22   : > { %450 = vst.msk [vmem:[#allocation3 + $0x6c] sm:$0xf] %vm383_vm2, %v3997_v12  ;;  %451 = vst.msk [vmem:[#allocation3 + $0x70] sm:$0xf] %vm383_vm2, %v3997_v12  ;;  %v425_v20 = vld [vmem:[#allocation2 + $0x20] sm:$0x1] }
  0x23   : > { %407 = vst [vmem:[#allocation2 + $0x30] sm:$0x1] %v406_v8  ;;  %410 = vst [vmem:[#allocation2 + $0x3c] sm:$0x1] %v409_v13  ;;  %v423_v21 = vsel %vm4125_vm5, 0, %v422_v19  ;;  %v426_v22 = vsel %vm4125_vm5, 0, %v425_v20 }
  0x24   : > { %413 = vst [vmem:[#allocation2 + $0x48] sm:$0x1] %v412_v14  ;;  %416 = vst [vmem:[#allocation2 + $0x54] sm:$0x1] %v415_v17  ;;  %v428_v23 = vld [vmem:[#allocation2 + $0x2c] sm:$0x1] }
  0x25   : > { %419 = vst [vmem:[#allocation2 + $0x60] sm:$0x1] %v418_v18  ;;  %v431_v24 = vld [vmem:[#allocation2 + $0x38] sm:$0x1]  ;;  %424 = vst [vmem:[#allocation2 + $0x14] sm:$0x1] %v423_v21 }
  0x26   : > { %427 = vst [vmem:[#allocation2 + $0x20] sm:$0x1] %v426_v22  ;;  %v429_v25 = vsel %vm4125_vm5, 0, %v428_v23  ;;  %v432_v26 = vsel %vm4125_vm5, 0, %v431_v24  ;;  %v434_v27 = vld [vmem:[#allocation2 + $0x44] sm:$0x1] }
  0x27   : > { %v437_v28 = vld [vmem:[#allocation2 + $0x50] sm:$0x1]  ;;  %430 = vst [vmem:[#allocation2 + $0x2c] sm:$0x1] %v429_v25  ;;  %433 = vst [vmem:[#allocation2 + $0x38] sm:$0x1] %v432_v26 }
  0x28   : > { %v435_v29 = vsel %vm4125_vm5, 0, %v434_v27  ;;  %v438_v30 = vsel %vm4125_vm5, 0, %v437_v28  ;;  %v440_v31 = vld [vmem:[#allocation2 + $0x5c] sm:$0x1]  ;;  %v443_v32 = vld [vmem:[#allocation2 + $0x68] sm:$0x1] }
  0x29   : > { %436 = vst [vmem:[#allocation2 + $0x44] sm:$0x1] %v435_v29  ;;  %439 = vst [vmem:[#allocation2 + $0x50] sm:$0x1] %v438_v30  ;;  %v441_v33 = vsel %vm4125_vm5, 0, %v440_v31  ;;  %v444_v34 = vsel %vm4125_vm5, 0, %v443_v32 }
  0x2a   : > { %v454_v35 = vld [vmem:[#allocation3 + $0xc] sm:$0x1]  ;;  %v457_v36 = vld [vmem:[#allocation3 + $0x18] sm:$0x1]  ;;  %442 = vst [vmem:[#allocation2 + $0x5c] sm:$0x1] %v441_v33 }
  0x2b   : > { %445 = vst [vmem:[#allocation2 + $0x68] sm:$0x1] %v444_v34  ;;  %v455_v37 = vsel %vm4111_vm3, 0, %v454_v35  ;;  %v458_v38 = vsel %vm4111_vm3, 0, %v457_v36  ;;  %v460_v39 = vld [vmem:[#allocation3 + $0x24] sm:$0x1] }
  0x2c   : > { %v463_v40 = vld [vmem:[#allocation3 + $0x30] sm:$0x1]  ;;  %456 = vst [vmem:[#allocation3 + $0xc] sm:$0x1] %v455_v37  ;;  %459 = vst [vmem:[#allocation3 + $0x18] sm:$0x1] %v458_v38 }
  0x2d   : > { %v461_v41 = vsel %vm4111_vm3, 0, %v460_v39  ;;  %v464_v42 = vsel %vm4111_vm3, 0, %v463_v40  ;;  %v466_v43 = vld [vmem:[#allocation3 + $0x3c] sm:$0x1]  ;;  %v469_v44 = vld [vmem:[#allocation3 + $0x48] sm:$0x1] }
  0x2e   : > { %462 = vst [vmem:[#allocation3 + $0x24] sm:$0x1] %v461_v41  ;;  %465 = vst [vmem:[#allocation3 + $0x30] sm:$0x1] %v464_v42  ;;  %v467_v45 = vsel %vm4111_vm3, 0, %v466_v43  ;;  %v470_v46 = vsel %vm4111_vm3, 0, %v469_v44 }
  0x2f   : > { %v472_v47 = vld [vmem:[#allocation3 + $0x54] sm:$0x1]  ;;  %v475_v48 = vld [vmem:[#allocation3 + $0x60] sm:$0x1]  ;;  %468 = vst [vmem:[#allocation3 + $0x3c] sm:$0x1] %v467_v45 }
  0x30   : > { %471 = vst [vmem:[#allocation3 + $0x48] sm:$0x1] %v470_v46  ;;  %v473_v49 = vsel %vm4111_vm3, 0, %v472_v47  ;;  %v476_v50 = vsel %vm4111_vm3, 0, %v475_v48  ;;  %v478_v51 = vld [vmem:[#allocation3 + $0x14] sm:$0x1] }
  0x31   : > { %v481_v52 = vld [vmem:[#allocation3 + $0x20] sm:$0x1]  ;;  %474 = vst [vmem:[#allocation3 + $0x54] sm:$0x1] %v473_v49  ;;  %477 = vst [vmem:[#allocation3 + $0x60] sm:$0x1] %v476_v50 }
  0x32   : > { %v479_v53 = vsel %vm4125_vm5, 0, %v478_v51  ;;  %v482_v54 = vsel %vm4125_vm5, 0, %v481_v52  ;;  %v484_v55 = vld [vmem:[#allocation3 + $0x2c] sm:$0x1]  ;;  %v487_v56 = vld [vmem:[#allocation3 + $0x38] sm:$0x1] }
  0x33   : > { %480 = vst [vmem:[#allocation3 + $0x14] sm:$0x1] %v479_v53  ;;  %483 = vst [vmem:[#allocation3 + $0x20] sm:$0x1] %v482_v54  ;;  %v485_v57 = vsel %vm4125_vm5, 0, %v484_v55  ;;  %v488_v58 = vsel %vm4125_vm5, 0, %v487_v56 }
  0x34   : > { %v490_v59 = vld [vmem:[#allocation3 + $0x44] sm:$0x1]  ;;  %v493_v60 = vld [vmem:[#allocation3 + $0x50] sm:$0x1]  ;;  %486 = vst [vmem:[#allocation3 + $0x2c] sm:$0x1] %v485_v57 }
  0x35   : > { %489 = vst [vmem:[#allocation3 + $0x38] sm:$0x1] %v488_v58  ;;  %v491_v61 = vsel %vm4125_vm5, 0, %v490_v59  ;;  %v494_v62 = vsel %vm4125_vm5, 0, %v493_v60  ;;  %v496_v63 = vld [vmem:[#allocation3 + $0x5c] sm:$0x1] }
  0x36   : > { %v499_v0 = vld [vmem:[#allocation3 + $0x68] sm:$0x1]  ;;  %492 = vst [vmem:[#allocation3 + $0x44] sm:$0x1] %v491_v61  ;;  %495 = vst [vmem:[#allocation3 + $0x50] sm:$0x1] %v494_v62 }
  0x37   : > { %v497_v2 = vsel %vm4125_vm5, 0, %v496_v63  ;;  %v500_v3 = vsel %vm4125_vm5, 0, %v499_v0  ;;  %v502_v4 = vld [vmem:[%s4082_s15] sm:$0xf]  ;;  %v503_v7 = vld [vmem:[%s4082_s15 + $0x4] sm:$0xf] }
  0x38   : > { %498 = vst [vmem:[#allocation3 + $0x5c] sm:$0x1] %v497_v2  ;;  %501 = vst [vmem:[#allocation3 + $0x68] sm:$0x1] %v500_v3  ;;  %v521_v5 = vshrl.u32 %v502_v4, 16  ;;  %v524_v6 = vshll.u32 %v502_v4, 16 }
  0x39   : > { %vm518_vm7 = vsmask.f32 4368  ;;  %v529_v8 = vshrl.u32 %v503_v7, 16  ;;  %v532_v9 = vshll.u32 %v503_v7, 16  ;;  %v504_v10 = vld [vmem:[%s4082_s15 + $0x8] sm:$0xf] }
  0x3a   : > { %v523_v12 = vrot.slane %v521_v5, 7  ;;  %v682_v13 = vld [vmem:[#allocation2 + $0xc] sm:$0xf]  ;;  %v538_v14 = vshrl.u32 %v504_v10, 16  ;;  %v541_v15 = vshll.u32 %v504_v10, 16  ;;  %v3998_v19 = vmov 0.0   ;;  %vm4225_vm9 = vmor %vm394_vm1, %vm518_vm7 }
  0x3b   : > { %v531_v16 = vrot.slane %v529_v8, 7  ;;  %v686_v17 = vld [vmem:[#allocation2 + $0x14] sm:$0x1]  ;;  %v505_v18 = vld [vmem:[%s4082_s15 + $0xc] sm:$0xf]  ;;  %971 = vst.msk [vmem:[#allocation4] sm:$0xff] %vm970_vm6, %v3998_v19 }
  0x3c   : > { %972 = vst.msk [vmem:[#allocation4 + $0x8] sm:$0xff] %vm970_vm6, %v3998_v19  ;;  %973 = vst.msk [vmem:[#allocation4 + $0x10] sm:$0xff] %vm970_vm6, %v3998_v19  ;;  %v526_v20 = vor.u32 %v524_v6, %v523_v12  ;;  %v527_v22 = vrot.slane %v523_v12, 4  ;;  %v540_v23 = vrot.slane %v538_v14, 7  ;;  %v546_v24 = vshrl.u32 %v505_v18, 16 }
  0x3d   : > { %974 = vst.msk [vmem:[#allocation4 + $0x18] sm:$0xff] %vm970_vm6, %v3998_v19  ;;  %975 = vst.msk [vmem:[#allocation4 + $0x20] sm:$0xff] %vm970_vm6, %v3998_v19  ;;  %v506_v25 = vld [vmem:[%s4082_s15 + $0x10] sm:$0xf]  ;;  %v534_v26 = vor.u32 %v532_v9, %v531_v16  ;;  %v536_v27 = vrot.slane %v531_v16, 4  ;;  %v549_v29 = vshll.u32 %v505_v18, 16 }
  0x3e   : > { %976 = vst.msk [vmem:[#allocation4 + $0x28] sm:$0xff] %vm970_vm6, %v3998_v19  ;;  %977 = vst.msk [vmem:[#allocation4 + $0x30] sm:$0xff] %vm970_vm6, %v3998_v19  ;;  %v689_v28 = vld [vmem:[#allocation2 + $0x18] sm:$0xf]  ;;  %v555_v30 = vshrl.u32 %v506_v25, 16  ;;  %v683_v31 = vsel %vm4202_vm8, %v526_v20, %v682_v13  ;;  %v543_v32 = vor.u32 %v541_v15, %v540_v23  ;;  %v544_v33 = vrot.slane %v540_v23, 4 }
  0x3f   : > { %978 = vst.msk [vmem:[#allocation4 + $0x38] sm:$0xff] %vm970_vm6, %v3998_v19  ;;  %979 = vst.msk [vmem:[#allocation4 + $0x40] sm:$0xff] %vm970_vm6, %v3998_v19  ;;  %v548_v34 = vrot.slane %v546_v24, 7  ;;  %v507_v35 = vld [vmem:[%s4082_s15 + $0x14] sm:$0xf]  ;;  %v535_v36 = vsel %vm4225_vm9, %v527_v22, %v534_v26  ;;  %v687_v37 = vsel %vm4111_vm3, %v536_v27, %v686_v17  ;;  %v558_v40 = vshll.u32 %v506_v25, 16 }
  0x40   : > { %980 = vst.msk [vmem:[#allocation4 + $0x48] sm:$0xff] %vm970_vm6, %v3998_v19  ;;  %981 = vst.msk [vmem:[#allocation4 + $0x50] sm:$0xff] %vm970_vm6, %v3998_v19  ;;  %v693_v38 = vld [vmem:[#allocation2 + $0x20] sm:$0x1]  ;;  %v557_v39 = vrot.slane %v555_v30, 7  ;;  %v690_v42 = vsel %vm4202_vm8, %v543_v32, %v689_v28  ;;  %v563_v46 = vshrl.u32 %v507_v35, 16 }
  0x41   : > { %982 = vst.msk [vmem:[#allocation4 + $0x58] sm:$0xff] %vm970_vm6, %v3998_v19  ;;  %983 = vst.msk [vmem:[#allocation4 + $0x60] sm:$0xff] %vm970_vm6, %v3998_v19  ;;  %v508_v41 = vld [vmem:[%s4082_s15 + $0x18] sm:$0xf]  ;;  %v551_v43 = vor.u32 %v549_v29, %v548_v34  ;;  %v553_v44 = vrot.slane %v548_v34, 4  ;;  %v566_v50 = vshll.u32 %v507_v35, 16 }
  0x42   : > { %984 = vst.msk [vmem:[#allocation4 + $0x68] sm:$0xff] %vm970_vm6, %v3998_v19  ;;  %985 = vst.msk [vmem:[#allocation4 + $0x70] sm:$0xff] %vm970_vm6, %v3998_v19  ;;  %v696_v45 = vld [vmem:[#allocation2 + $0x24] sm:$0xf]  ;;  %v509_v47 = vld [vmem:[%s4082_s15 + $0x1c] sm:$0xf]  ;;  %v560_v48 = vor.u32 %v558_v40, %v557_v39 }
  0x43   : > { %986 = vst.msk [vmem:[#allocation4 + $0x78] sm:$0xff] %vm970_vm6, %v3998_v19  ;;  %684 = vst [vmem:[#allocation2 + $0xc] sm:$0xf] %v683_v31  ;;  %v561_v49 = vrot.slane %v557_v39, 4  ;;  %v572_v51 = vshrl.u32 %v508_v41, 16  ;;  %v552_v53 = vsel %vm4225_vm9, %v544_v33, %v551_v43  ;;  %v694_v54 = vsel %vm4111_vm3, %v553_v44, %v693_v38 }
  0x44   : > { %685 = vst.msk [vmem:[#allocation2 + $0x10] sm:$0xf] %vm383_vm2, %v535_v36  ;;  %688 = vst [vmem:[#allocation2 + $0x14] sm:$0x1] %v687_v37  ;;  %v510_v52 = vld [vmem:[%s4082_s15 + $0x20] sm:$0xf]  ;;  %v697_v58 = vsel %vm4202_vm8, %v560_v48, %v696_v45 }
  0x45   : > { %691 = vst [vmem:[#allocation2 + $0x18] sm:$0xf] %v690_v42  ;;  %v565_v55 = vrot.slane %v563_v46, 7  ;;  %v575_v56 = vshll.u32 %v508_v41, 16  ;;  %v511_v57 = vld [vmem:[%s4082_s15 + $0x24] sm:$0xf] }
  0x46   : > { %692 = vst.msk [vmem:[#allocation2 + $0x1c] sm:$0xf] %vm383_vm2, %v552_v53  ;;  %695 = vst [vmem:[#allocation2 + $0x20] sm:$0x1] %v694_v54  ;;  %v700_v59 = vld [vmem:[#allocation2 + $0x2c] sm:$0x1] }
  0x47   : > { %v574_v60 = vrot.slane %v572_v51, 7  ;;  %v580_v61 = vshrl.u32 %v509_v47, 16  ;;  %v583_v62 = vshll.u32 %v509_v47, 16  ;;  %698 = vst [vmem:[#allocation2 + $0x24] sm:$0xf] %v697_v58  ;;  %v568_v63 = vor.u32 %v566_v50, %v565_v55 }
  0x48   : > { %v570_v0 = vrot.slane %v565_v55, 4  ;;  %v703_v2 = vld [vmem:[#allocation2 + $0x30] sm:$0xf]  ;;  %v589_v3 = vshrl.u32 %v510_v52, 16  ;;  %v592_v4 = vshll.u32 %v510_v52, 16  ;;  %v597_v8 = vshrl.u32 %v511_v57, 16 }
  0x49   : > { %v577_v5 = vor.u32 %v575_v56, %v574_v60  ;;  %v578_v6 = vrot.slane %v574_v60, 4  ;;  %v582_v7 = vrot.slane %v580_v61, 7  ;;  %v512_v9 = vld [vmem:[%s4082_s15 + $0x28] sm:$0xf]  ;;  %v569_v10 = vsel %vm4225_vm9, %v561_v49, %v568_v63  ;;  %v707_v13 = vld [vmem:[#allocation2 + $0x38] sm:$0x1] }
  0x4a   : > { %v701_v12 = vsel %vm4111_vm3, %v570_v0, %v700_v59  ;;  %v591_v14 = vrot.slane %v589_v3, 7  ;;  %v710_v15 = vld [vmem:[#allocation2 + $0x3c] sm:$0xf]  ;;  %v600_v16 = vshll.u32 %v511_v57, 16  ;;  %699 = vst.msk [vmem:[#allocation2 + $0x28] sm:$0xf] %vm383_vm2, %v569_v10 }
  0x4b   : > { %702 = vst [vmem:[#allocation2 + $0x2c] sm:$0x1] %v701_v12  ;;  %v704_v17 = vsel %vm4202_vm8, %v577_v5, %v703_v2  ;;  %v585_v18 = vor.u32 %v583_v62, %v582_v7  ;;  %v587_v19 = vrot.slane %v582_v7, 4  ;;  %v599_v20 = vrot.slane %v597_v8, 7  ;;  %v714_v22 = vld [vmem:[#allocation2 + $0x44] sm:$0x1] }
  0x4c   : > { %v513_v23 = vld [vmem:[%s4082_s15 + $0x2c] sm:$0xf]  ;;  %705 = vst [vmem:[#allocation2 + $0x30] sm:$0xf] %v704_v17  ;;  %v594_v24 = vor.u32 %v592_v4, %v591_v14  ;;  %v595_v25 = vrot.slane %v591_v14, 4  ;;  %v606_v26 = vshrl.u32 %v512_v9, 16 }
  0x4d   : > { %v609_v27 = vshll.u32 %v512_v9, 16  ;;  %v514_v28 = vld [vmem:[%s4082_s15 + $0x30] sm:$0xf]  ;;  %v586_v29 = vsel %vm4225_vm9, %v578_v6, %v585_v18  ;;  %v708_v30 = vsel %vm4111_vm3, %v587_v19, %v707_v13  ;;  %v602_v31 = vor.u32 %v600_v16, %v599_v20  ;;  %v515_v33 = vld [vmem:[%s4082_s15 + $0x34] sm:$0xf] }
  0x4e   : > { %v604_v32 = vrot.slane %v599_v20, 4  ;;  %706 = vst.msk [vmem:[#allocation2 + $0x34] sm:$0xf] %vm383_vm2, %v586_v29  ;;  %709 = vst [vmem:[#allocation2 + $0x38] sm:$0x1] %v708_v30  ;;  %v711_v34 = vsel %vm4202_vm8, %v594_v24, %v710_v15  ;;  %v608_v35 = vrot.slane %v606_v26, 7 }
  0x4f   : > { %v614_v36 = vshrl.u32 %v513_v23, 16  ;;  %v617_v37 = vshll.u32 %v513_v23, 16  ;;  %v516_v38 = vld [vmem:[%s4082_s15 + $0x38] sm:$0xf]  ;;  %712 = vst [vmem:[#allocation2 + $0x3c] sm:$0xf] %v711_v34  ;;  %v603_v39 = vsel %vm4225_vm9, %v595_v25, %v602_v31 }
  0x50   : > { %v715_v40 = vsel %vm4111_vm3, %v604_v32, %v714_v22  ;;  %v717_v41 = vld [vmem:[#allocation2 + $0x48] sm:$0xf]  ;;  %v623_v42 = vshrl.u32 %v514_v28, 16  ;;  %v626_v43 = vshll.u32 %v514_v28, 16  ;;  %713 = vst.msk [vmem:[#allocation2 + $0x40] sm:$0xf] %vm383_vm2, %v603_v39  ;;  %v611_v44 = vor.u32 %v609_v27, %v608_v35 }
  0x51   : > { %716 = vst [vmem:[#allocation2 + $0x44] sm:$0x1] %v715_v40  ;;  %v612_v45 = vrot.slane %v608_v35, 4  ;;  %v616_v46 = vrot.slane %v614_v36, 7  ;;  %v631_v47 = vshrl.u32 %v515_v33, 16  ;;  %v634_v51 = vshll.u32 %v515_v33, 16 }
  0x52   : > { %v517_v48 = vld [vmem:[%s4082_s15 + $0x3c] sm:$0xf]  ;;  %v721_v49 = vld [vmem:[#allocation2 + $0x50] sm:$0x1]  ;;  %v625_v50 = vrot.slane %v623_v42, 7  ;;  %v640_v52 = vshrl.u32 %v516_v38, 16  ;;  %v718_v54 = vsel %vm4202_vm8, %v611_v44, %v717_v41 }
  0x53   : > { %v643_v53 = vshll.u32 %v516_v38, 16  ;;  %v619_v55 = vor.u32 %v617_v37, %v616_v46  ;;  %v621_v56 = vrot.slane %v616_v46, 4  ;;  %v724_v57 = vld [vmem:[#allocation2 + $0x54] sm:$0xf]  ;;  %v633_v58 = vrot.slane %v631_v47, 7 }
  0x54   : > { %v728_v59 = vld [vmem:[#allocation2 + $0x5c] sm:$0x1]  ;;  %719 = vst [vmem:[#allocation2 + $0x48] sm:$0xf] %v718_v54  ;;  %v628_v60 = vor.u32 %v626_v43, %v625_v50  ;;  %v629_v61 = vrot.slane %v625_v50, 4  ;;  %v642_v62 = vrot.slane %v640_v52, 7 }
  0x55   : > { %v648_v63 = vshrl.u32 %v517_v48, 16  ;;  %v738_v0 = vld [vmem:[%s4087_s18] sm:$0xf]  ;;  %v620_v2 = vsel %vm4225_vm9, %v612_v45, %v619_v55  ;;  %v722_v3 = vsel %vm4111_vm3, %v621_v56, %v721_v49  ;;  %v636_v4 = vor.u32 %v634_v51, %v633_v58  ;;  %v739_v7 = vld [vmem:[%s4087_s18 + $0x4] sm:$0xf] }
  0x56   : > { %v638_v5 = vrot.slane %v633_v58, 4  ;;  %v731_v6 = vld [vmem:[#allocation2 + $0x60] sm:$0xf]  ;;  %720 = vst.msk [vmem:[#allocation2 + $0x4c] sm:$0xf] %vm383_vm2, %v620_v2  ;;  %v725_v8 = vsel %vm4202_vm8, %v628_v60, %v724_v57  ;;  %v645_v9 = vor.u32 %v643_v53, %v642_v62  ;;  %v646_v10 = vrot.slane %v642_v62, 4 }
  0x57   : > { %723 = vst [vmem:[#allocation2 + $0x50] sm:$0x1] %v722_v3  ;;  %v650_v12 = vrot.slane %v648_v63, 7  ;;  %v740_v13 = vld [vmem:[%s4087_s18 + $0x8] sm:$0xf]  ;;  %v637_v14 = vsel %vm4225_vm9, %v629_v61, %v636_v4  ;;  %v651_v16 = vshll.u32 %v517_v48, 16 }
  0x58   : > { %726 = vst [vmem:[#allocation2 + $0x54] sm:$0xf] %v725_v8  ;;  %v729_v15 = vsel %vm4111_vm3, %v638_v5, %v728_v59  ;;  %v735_v17 = vld [vmem:[#allocation2 + $0x68] sm:$0x1]  ;;  %v755_v18 = vshrl.u32 %v738_v0, 16  ;;  %v732_v20 = vsel %vm4202_vm8, %v645_v9, %v731_v6  ;;  %v758_v23 = vshll.u32 %v738_v0, 16 }
  0x59   : > { %v741_v19 = vld [vmem:[%s4087_s18 + $0xc] sm:$0xf]  ;;  %727 = vst.msk [vmem:[#allocation2 + $0x58] sm:$0xf] %vm383_vm2, %v637_v14  ;;  %730 = vst [vmem:[#allocation2 + $0x5c] sm:$0x1] %v729_v15  ;;  %v653_v25 = vor.u32 %v651_v16, %v650_v12 }
  0x5a   : > { %v655_v22 = vrot.slane %v650_v12, 4  ;;  %v763_v24 = vshrl.u32 %v739_v7, 16  ;;  %733 = vst [vmem:[#allocation2 + $0x60] sm:$0xf] %v732_v20  ;;  %v757_v26 = vrot.slane %v755_v18, 7  ;;  %v766_v28 = vshll.u32 %v739_v7, 16 }
  0x5b   : > { %v914_v27 = vld [vmem:[#allocation3 + $0xc] sm:$0xf]  ;;  %v772_v29 = vshrl.u32 %v740_v13, 16  ;;  %v775_v32 = vshll.u32 %v740_v13, 16  ;;  %v780_v33 = vshrl.u32 %v741_v19, 16  ;;  %v654_v35 = vsel %vm4225_vm9, %v646_v10, %v653_v25 }
  0x5c   : > { %v736_v30 = vsel %vm4111_vm3, %v655_v22, %v735_v17  ;;  %v765_v31 = vrot.slane %v763_v24, 7  ;;  %v742_v34 = vld [vmem:[%s4087_s18 + $0x10] sm:$0xf]  ;;  %v760_v36 = vor.u32 %v758_v23, %v757_v26  ;;  %v761_v37 = vrot.slane %v757_v26, 4  ;;  %v918_v38 = vld [vmem:[#allocation3 + $0x14] sm:$0x1] }
  0x5d   : > { %737 = vst [vmem:[#allocation2 + $0x68] sm:$0x1] %v736_v30  ;;  %v774_v39 = vrot.slane %v772_v29, 7  ;;  %v921_v40 = vld [vmem:[#allocation3 + $0x18] sm:$0xf]  ;;  %v782_v43 = vrot.slane %v780_v33, 7 }
  0x5e   : > { %734 = vst.msk [vmem:[#allocation2 + $0x64] sm:$0xf] %vm383_vm2, %v654_v35  ;;  %v768_v41 = vor.u32 %v766_v28, %v765_v31  ;;  %v770_v42 = vrot.slane %v765_v31, 4  ;;  %v783_v44 = vshll.u32 %v741_v19, 16  ;;  %v743_v45 = vld [vmem:[%s4087_s18 + $0x14] sm:$0xf]  ;;  %v915_v46 = vsel %vm4202_vm8, %v760_v36, %v914_v27 }
  0x5f   : > { %v777_v47 = vor.u32 %v775_v32, %v774_v39  ;;  %v778_v48 = vrot.slane %v774_v39, 4  ;;  %v925_v49 = vld [vmem:[#allocation3 + $0x20] sm:$0x1]  ;;  %v789_v50 = vshrl.u32 %v742_v34, 16  ;;  %916 = vst [vmem:[#allocation3 + $0xc] sm:$0xf] %v915_v46 }
  0x60   : > { %v744_v51 = vld [vmem:[%s4087_s18 + $0x18] sm:$0xf]  ;;  %v769_v52 = vsel %vm4225_vm9, %v761_v37, %v768_v41  ;;  %v919_v53 = vsel %vm4111_vm3, %v770_v42, %v918_v38  ;;  %v785_v54 = vor.u32 %v783_v44, %v782_v43  ;;  %v787_v55 = vrot.slane %v782_v43, 4  ;;  %v745_v56 = vld [vmem:[%s4087_s18 + $0x1c] sm:$0xf] }
  0x61   : > { %917 = vst.msk [vmem:[#allocation3 + $0x10] sm:$0xf] %vm383_vm2, %v769_v52  ;;  %920 = vst [vmem:[#allocation3 + $0x14] sm:$0x1] %v919_v53  ;;  %v922_v57 = vsel %vm4202_vm8, %v777_v47, %v921_v40  ;;  %v791_v58 = vrot.slane %v789_v50, 7  ;;  %v792_v59 = vshll.u32 %v742_v34, 16 }
  0x62   : > { %v797_v60 = vshrl.u32 %v743_v45, 16  ;;  %v746_v61 = vld [vmem:[%s4087_s18 + $0x20] sm:$0xf]  ;;  %923 = vst [vmem:[#allocation3 + $0x18] sm:$0xf] %v922_v57  ;;  %v786_v62 = vsel %vm4225_vm9, %v778_v48, %v785_v54  ;;  %v926_v63 = vsel %vm4111_vm3, %v787_v55, %v925_v49  ;;  %v800_v2 = vshll.u32 %v743_v45, 16 }
  0x63   : > { %v928_v0 = vld [vmem:[#allocation3 + $0x24] sm:$0xf]  ;;  %v806_v3 = vshrl.u32 %v744_v51, 16  ;;  %924 = vst.msk [vmem:[#allocation3 + $0x1c] sm:$0xf] %vm383_vm2, %v786_v62  ;;  %v794_v4 = vor.u32 %v792_v59, %v791_v58  ;;  %v795_v5 = vrot.slane %v791_v58, 4 }
  0x64   : > { %927 = vst [vmem:[#allocation3 + $0x20] sm:$0x1] %v926_v63  ;;  %v799_v6 = vrot.slane %v797_v60, 7  ;;  %v932_v7 = vld [vmem:[#allocation3 + $0x2c] sm:$0x1]  ;;  %v809_v8 = vshll.u32 %v744_v51, 16 }
  0x65   : > { %v808_v9 = vrot.slane %v806_v3, 7  ;;  %v814_v10 = vshrl.u32 %v745_v56, 16  ;;  %v817_v12 = vshll.u32 %v745_v56, 16  ;;  %v823_v13 = vshrl.u32 %v746_v61, 16  ;;  %v747_v14 = vld [vmem:[%s4087_s18 + $0x24] sm:$0xf] }
  0x66   : > { %v929_v15 = vsel %vm4202_vm8, %v794_v4, %v928_v0  ;;  %v802_v16 = vor.u32 %v800_v2, %v799_v6  ;;  %v804_v17 = vrot.slane %v799_v6, 4  ;;  %v935_v18 = vld [vmem:[#allocation3 + $0x30] sm:$0xf]  ;;  %v939_v19 = vld [vmem:[#allocation3 + $0x38] sm:$0x1]  ;;  %v826_v20 = vshll.u32 %v746_v61, 16 }
  0x67   : > { %930 = vst [vmem:[#allocation3 + $0x24] sm:$0xf] %v929_v15  ;;  %v811_v22 = vor.u32 %v809_v8, %v808_v9  ;;  %v812_v23 = vrot.slane %v808_v9, 4  ;;  %v816_v24 = vrot.slane %v814_v10, 7  ;;  %v825_v25 = vrot.slane %v823_v13, 7 }
  0x68   : > { %v748_v26 = vld [vmem:[%s4087_s18 + $0x28] sm:$0xf]  ;;  %v803_v27 = vsel %vm4225_vm9, %v795_v5, %v802_v16  ;;  %v933_v28 = vsel %vm4111_vm3, %v804_v17, %v932_v7  ;;  %v942_v29 = vld [vmem:[#allocation3 + $0x3c] sm:$0xf]  ;;  %v831_v30 = vshrl.u32 %v747_v14, 16  ;;  %v834_v31 = vshll.u32 %v747_v14, 16 }
  0x69   : > { %v749_v32 = vld [vmem:[%s4087_s18 + $0x2c] sm:$0xf]  ;;  %931 = vst.msk [vmem:[#allocation3 + $0x28] sm:$0xf] %vm383_vm2, %v803_v27  ;;  %934 = vst [vmem:[#allocation3 + $0x2c] sm:$0x1] %v933_v28  ;;  %v936_v33 = vsel %vm4202_vm8, %v811_v22, %v935_v18  ;;  %v819_v34 = vor.u32 %v817_v12, %v816_v24  ;;  %v828_v36 = vor.u32 %v826_v20, %v825_v25 }
  0x6a   : > { %v821_v35 = vrot.slane %v816_v24, 4  ;;  %v750_v37 = vld [vmem:[%s4087_s18 + $0x30] sm:$0xf]  ;;  %937 = vst [vmem:[#allocation3 + $0x30] sm:$0xf] %v936_v33  ;;  %v829_v38 = vrot.slane %v825_v25, 4 }
  0x6b   : > { %v833_v39 = vrot.slane %v831_v30, 7  ;;  %v840_v40 = vshrl.u32 %v748_v26, 16  ;;  %v843_v41 = vshll.u32 %v748_v26, 16  ;;  %v751_v42 = vld [vmem:[%s4087_s18 + $0x34] sm:$0xf]  ;;  %v820_v43 = vsel %vm4225_vm9, %v812_v23, %v819_v34 }
  0x6c   : > { %v940_v44 = vsel %vm4111_vm3, %v821_v35, %v939_v19  ;;  %v943_v45 = vsel %vm4202_vm8, %v828_v36, %v942_v29  ;;  %v946_v46 = vld [vmem:[#allocation3 + $0x44] sm:$0x1]  ;;  %v848_v47 = vshrl.u32 %v749_v32, 16  ;;  %938 = vst.msk [vmem:[#allocation3 + $0x34] sm:$0xf] %vm383_vm2, %v820_v43  ;;  %v851_v52 = vshll.u32 %v749_v32, 16 }
  0x6d   : > { %941 = vst [vmem:[#allocation3 + $0x38] sm:$0x1] %v940_v44  ;;  %944 = vst [vmem:[#allocation3 + $0x3c] sm:$0xf] %v943_v45  ;;  %v836_v48 = vor.u32 %v834_v31, %v833_v39  ;;  %v838_v49 = vrot.slane %v833_v39, 4  ;;  %v842_v50 = vrot.slane %v840_v40, 7 }
  0x6e   : > { %v949_v51 = vld [vmem:[#allocation3 + $0x48] sm:$0xf]  ;;  %v850_v53 = vrot.slane %v848_v47, 7  ;;  %v857_v54 = vshrl.u32 %v750_v37, 16  ;;  %v860_v55 = vshll.u32 %v750_v37, 16  ;;  %v865_v56 = vshrl.u32 %v751_v42, 16 }
  0x6f   : > { %v752_v57 = vld [vmem:[%s4087_s18 + $0x38] sm:$0xf]  ;;  %v837_v58 = vsel %vm4225_vm9, %v829_v38, %v836_v48  ;;  %v947_v59 = vsel %vm4111_vm3, %v838_v49, %v946_v46  ;;  %v845_v60 = vor.u32 %v843_v41, %v842_v50  ;;  %v846_v61 = vrot.slane %v842_v50, 4  ;;  %v953_v62 = vld [vmem:[#allocation3 + $0x50] sm:$0x1] }
  0x70   : > { %945 = vst.msk [vmem:[#allocation3 + $0x40] sm:$0xf] %vm383_vm2, %v837_v58  ;;  %948 = vst [vmem:[#allocation3 + $0x44] sm:$0x1] %v947_v59  ;;  %v853_v63 = vor.u32 %v851_v52, %v850_v53  ;;  %v855_v0 = vrot.slane %v850_v53, 4  ;;  %v859_v2 = vrot.slane %v857_v54, 7 }
  0x71   : > { %v867_v3 = vrot.slane %v865_v56, 7  ;;  %v753_v4 = vld [vmem:[%s4087_s18 + $0x3c] sm:$0xf]  ;;  %v950_v5 = vsel %vm4202_vm8, %v845_v60, %v949_v51  ;;  %v956_v6 = vld [vmem:[#allocation3 + $0x54] sm:$0xf]  ;;  %v868_v7 = vshll.u32 %v751_v42, 16 }
  0x72   : > { %v874_v8 = vshrl.u32 %v752_v57, 16  ;;  %v877_v9 = vshll.u32 %v752_v57, 16  ;;  %951 = vst [vmem:[#allocation3 + $0x48] sm:$0xf] %v950_v5  ;;  %v854_v10 = vsel %vm4225_vm9, %v846_v61, %v853_v63  ;;  %v954_v12 = vsel %vm4111_vm3, %v855_v0, %v953_v62  ;;  %v960_v15 = vld [vmem:[#allocation3 + $0x5c] sm:$0x1] }
  0x73   : > { %v862_v13 = vor.u32 %v860_v55, %v859_v2  ;;  %v863_v14 = vrot.slane %v859_v2, 4  ;;  %952 = vst.msk [vmem:[#allocation3 + $0x4c] sm:$0xf] %vm383_vm2, %v854_v10  ;;  %955 = vst [vmem:[#allocation3 + $0x50] sm:$0x1] %v954_v12  ;;  %v870_v16 = vor.u32 %v868_v7, %v867_v3  ;;  %v872_v17 = vrot.slane %v867_v3, 4 }
  0x74   : > { %v876_v18 = vrot.slane %v874_v8, 7  ;;  %v882_v19 = vshrl.u32 %v753_v4, 16  ;;  %v963_v22 = vld [vmem:[#allocation3 + $0x60] sm:$0xf]  ;;  %v885_v23 = vshll.u32 %v753_v4, 16 }
  0x75   : > { %v957_v20 = vsel %vm4202_vm8, %v862_v13, %v956_v6  ;;  %v871_v24 = vsel %vm4225_vm9, %v863_v14, %v870_v16  ;;  %v961_v25 = vsel %vm4111_vm3, %v872_v17, %v960_v15  ;;  %v967_v30 = vld [vmem:[#allocation3 + $0x68] sm:$0x1] }
  0x76   : > { %958 = vst [vmem:[#allocation3 + $0x54] sm:$0xf] %v957_v20  ;;  %v879_v26 = vor.u32 %v877_v9, %v876_v18  ;;  %959 = vst.msk [vmem:[#allocation3 + $0x58] sm:$0xf] %vm383_vm2, %v871_v24  ;;  %v880_v27 = vrot.slane %v876_v18, 4  ;;  %v884_v28 = vrot.slane %v882_v19, 7 }
  0x77   : > { %962 = vst [vmem:[#allocation3 + $0x5c] sm:$0x1] %v961_v25 }
  0x78   : > { %v964_v29 = vsel %vm4202_vm8, %v879_v26, %v963_v22  ;;  %v887_v31 = vor.u32 %v885_v23, %v884_v28  ;;  %v889_v32 = vrot.slane %v884_v28, 4 }
  0x79   : > { %965 = vst [vmem:[#allocation3 + $0x60] sm:$0xf] %v964_v29 }
  0x7a   : > { %v888_v33 = vsel %vm4225_vm9, %v880_v27, %v887_v31  ;;  %v968_v34 = vsel %vm4111_vm3, %v889_v32, %v967_v30 }
  0x7b   : > { %966 = vst.msk [vmem:[#allocation3 + $0x64] sm:$0xf] %vm383_vm2, %v888_v33  ;;  %969 = vst [vmem:[#allocation3 + $0x68] sm:$0x1] %v968_v34 }
  0x7c PF: > { %v3917_v11 = vld [vmem:[%s4101_s14 + $0x18] sm:$0xff]   ;;  %s3641_s0 = smul.u32 12, %s3979_s24  ;;  %v3918_v35 = vld [vmem:[%s4101_s14 + $0x10] sm:$0xff]   ;;  %v3920_v1 = vld [vmem:[%s4101_s14 + $0x8] sm:$0xff]   ;;  %vm1112_vm10 = vcmask 523264   ;;  %vm2442_vm14 = vcmask 1042432  }
  0x7d   : > { %3731 = vmatprep.subr.bf16.mxu0 %v3917_v11  ;;  %v3919_v21 = vld [vmem:[%s4106_s17 + $0x18] sm:$0xff]   ;;  %v3921_v36 = vld [vmem:[%s4106_s17 + $0x10] sm:$0xff]   ;;  %v3923_v37 = vld [vmem:[%s4106_s17 + $0x8] sm:$0xff]   ;;  %vm1531_vm11 = vsmask.f32 3328  ;;  %vm2443_vm15 = vcmask 1046532  }
  0x7e   : > { %3732 = vmatpush3.bf16.msra.mxu0 %v3917_v11  ;;  %3755 = vmatprep.subr.bf16.mxu1 %v3919_v21  ;;  %s4376_s8 = scalar_lea.vmem [#allocation2], %s3641_s0  ;;  %v3922_v39 = vld [vmem:[%s4101_s14] sm:$0xff]   ;;  %s4382_s9 = scalar_lea.vmem [#allocation3], %s3641_s0  ;;  %v3926_v42 = vld [vmem:[%s4101_s14 + $0x38] sm:$0xff]   ;;  %v3932_v46 = vld [vmem:[%s4101_s14 + $0x30] sm:$0xff]  }
  0x7f   : > { %3733 = vmatprep.subr.bf16.mxu0 %v3918_v35  ;;  %3756 = vmatpush3.bf16.msra.mxu1 %v3919_v21  ;;  %v3924_v38 = vld [vmem:[%s4376_s8] sm:$0xff]   ;;  %v3925_v43 = vld [vmem:[%s4376_s8 + $0xc] sm:$0xff]   ;;  %v3930_v45 = vld [vmem:[%s4376_s8 + $0x18] sm:$0xff]   ;;  %vm1532_vm12 = vsmask.f32 7440  ;;  %p3616_p8 = scmp.ne.s32.totalorder %s3979_s24, 2 }
  0x80   : > { %3757 = vmatprep.subr.bf16.mxu1 %v3921_v36  ;;  %3739 = vmatprep.mubr.msk.bf16.mxu0 %vm1112_vm10, %v3924_v38  ;;  %v3927_v40 = vld [vmem:[%s4106_s17] sm:$0xff]   ;;  %v3933_v47 = vld [vmem:[%s4106_s17 + $0x38] sm:$0xff]   ;;  %v3938_v50 = vld [vmem:[%s4101_s14 + $0x28] sm:$0xff]   ;;  %s4935_s19 = scalar_lea.vmem (!%p3616_p8), %s4919_s6, %s4947_s25 }
  0x81   : > { %v3931_v49 = vld [vmem:[%s4376_s8 + $0x24] sm:$0xff]   ;;  %v3939_v51 = vld [vmem:[%s4106_s17 + $0x30] sm:$0xff]   ;;  %v3937_v57 = vld [vmem:[%s4376_s8 + $0x3c] sm:$0xff]  }
  0x82   : > { %3734 = vmatpush3.bf16.msra.mxu0 %v3918_v35  ;;  %v3928_v41 = vld [vmem:[%s4382_s9] sm:$0xff]   ;;  %v3929_v44 = vld [vmem:[%s4382_s9 + $0xc] sm:$0xff]   ;;  %v3934_v48 = vld [vmem:[%s4382_s9 + $0x18] sm:$0xff]  }
  0x83   : > { %3735 = vmatprep.subr.bf16.mxu0 %v3920_v1  ;;  %3758 = vmatpush3.bf16.msra.mxu1 %v3921_v36  ;;  %v3936_v52 = vld [vmem:[%s4376_s8 + $0x30] sm:$0xff]   ;;  %v3935_v53 = vld [vmem:[%s4382_s9 + $0x24] sm:$0xff]   ;;  %v3941_v58 = vld [vmem:[%s4382_s9 + $0x3c] sm:$0xff]  }
  0x84   : > { %3759 = vmatprep.subr.bf16.mxu1 %v3923_v37  ;;  %3763 = vmatprep.mubr.msk.bf16.mxu1 %vm1112_vm10, %v3928_v41  ;;  %v3940_v54 = vld [vmem:[%s4382_s9 + $0x30] sm:$0xff]   ;;  %v3944_v55 = vld [vmem:[%s4101_s14 + $0x20] sm:$0xff]   ;;  %v3945_v56 = vld [vmem:[%s4106_s17 + $0x28] sm:$0xff]  }
  0x85   : > { %v3942_v59 = vld [vmem:[%s4376_s8 + $0x48] sm:$0xff]   ;;  %v1507_v61 = vld [vmem:[%s4376_s8] sm:$0xf]  ;;  %v1508_v62 = vld [vmem:[%s4376_s8 + $0x4] sm:$0xf] }
  0x86   : > { %3736 = vmatpush3.bf16.msra.mxu0 %v3920_v1  ;;  %v3946_v60 = vld [vmem:[%s4382_s9 + $0x48] sm:$0xff]   ;;  %v1535_v0 = vshrl.u32 %v1507_v61, 16  ;;  %v1538_v2 = vshll.u32 %v1507_v61, 16  ;;  %v1544_v3 = vshll.u32 %v1508_v62, 16  ;;  %v1548_v4 = vshrl.u32 %v1508_v62, 16  ;;  %v4418_v7 = vld [vmem:[%s4101_s14 + $0x58] sm:$0xff]   ;;  %vm4431_vm13 = vmor %vm1531_vm11, %vm1532_vm12 }
  0x87   : > { %3737 = vmatprep.subr.bf16.mxu0 %v3922_v39  ;;  %3760 = vmatpush3.bf16.msra.mxu1 %v3923_v37  ;;  %v1509_v63 = vld [vmem:[%s4376_s8 + $0x8] sm:$0x1]  ;;  %v1510_v6 = vld [vmem:[%s4376_s8 + $0xc] sm:$0xf]  ;;  %v1511_v10 = vld [vmem:[%s4376_s8 + $0x10] sm:$0xf] }
  0x88   : > { %3761 = vmatprep.subr.bf16.mxu1 %v3927_v40  ;;  %v1554_v5 = vshll.u32 %v1509_v63, 16  ;;  %v1537_v8 = vrot.slane %v1535_v0, 4  ;;  %v1540_v9 = vrot.slane %v1538_v2, 5  ;;  %v1512_v12 = vld [vmem:[%s4376_s8 + $0x14] sm:$0x1]  ;;  %v1546_v13 = vrot.slane %v1544_v3, 5  ;;  %vm4570_vm0 = vmor %vm2442_vm14, %vm2443_vm15 }
  0x89   : > { %v1550_v14 = vrot.slane %v1548_v4, 4  ;;  %v1559_v16 = vshrl.u32 %v1510_v6, 16  ;;  %v3943_v17 = vld [vmem:[%s4376_s8 + $0x54] sm:$0xff]   ;;  %v1562_v19 = vshll.u32 %v1510_v6, 16  ;;  %v1568_v20 = vshll.u32 %v1511_v10, 16  ;;  %v3949_v23 = vld [vmem:[%s4106_s17 + $0x20] sm:$0xff]  }
  0x8a   : > { %3738 = vmatpush3.bf16.msra.mxu0 %v3922_v39  ;;  %v1556_v15 = vrot.slane %v1554_v5, 5  ;;  %v1541_v18 = vor.u32 %v1540_v9, %v1537_v8  ;;  %v1572_v22 = vshrl.u32 %v1511_v10, 16  ;;  %v1578_v27 = vshll.u32 %v1512_v12, 16  ;;  %v1726_v32 = vld [vmem:[%s4382_s9] sm:$0xf]  ;;  %v3947_v35 = vld [vmem:[%s4382_s9 + $0x54] sm:$0xff]  }
  0x8b   : > { %3779 = vmatprep.subr.bf16.mxu0 %v3926_v42  ;;  %3762 = vmatpush3.bf16.msra.mxu1 %v3927_v40  ;;  %v1551_v25 = vor.u32 %v1550_v14, %v1546_v13  ;;  %v1561_v26 = vrot.slane %v1559_v16, 4  ;;  %v1564_v29 = vrot.slane %v1562_v19, 5  ;;  %v1570_v30 = vrot.slane %v1568_v20, 5  ;;  %v1727_v11 = vld [vmem:[%s4382_s9 + $0x4] sm:$0xf] }
  0x8c   : > { %3803 = vmatprep.subr.bf16.mxu1 %v3933_v47  ;;  %v1542_v28 = vrot.slane %v1541_v18, 4  ;;  %v1574_v31 = vrot.slane %v1572_v22, 4  ;;  %v1580_v34 = vrot.slane %v1578_v27, 5  ;;  %v1728_v37 = vld [vmem:[%s4382_s9 + $0x8] sm:$0x1]  ;;  %v1751_v38 = vshrl.u32 %v1726_v32, 16 }
  0x8d   : > { %3740 = vmatmul.mubr.msk.bf16.vlgmr.msra.gmra.mxu0 %vm1112_vm10, %v3925_v43  ;;  %v1552_v33 = vrot.slane %v1551_v25, 4  ;;  %v1565_v1 = vor.u32 %v1564_v29, %v1561_v26  ;;  %v1754_v40 = vshll.u32 %v1726_v32, 16  ;;  %v1760_v41 = vshll.u32 %v1727_v11, 16  ;;  %v1729_v43 = vld [vmem:[%s4382_s9 + $0xc] sm:$0xf]  ;;  %v3950_v18 = vld [vmem:[%s4101_s14 + $0x50] sm:$0xff]  }
  0x8e   : > { %3780 = vmatpush3.bf16.msra.mxu0 %v3926_v42  ;;  %3743 = vmatprep.mubr.msk.bf16.mxu0 %vm1112_vm10, %v3930_v45  ;;  %v1547_v21 = vsel %vm4431_vm13, %v1542_v28, %v1546_v13  ;;  %v1575_v36 = vor.u32 %v1574_v31, %v1570_v30  ;;  %v1764_v42 = vshrl.u32 %v1727_v11, 16  ;;  %v1514_v5 = vld [vmem:[%s4376_s8 + $0x1c] sm:$0xf]  ;;  %v1515_v6 = vld [vmem:[%s4376_s8 + $0x20] sm:$0x1] }
  0x8f   : > { %3764 = vmatmul.mubr.msk.bf16.vlgmr.msra.gmra.mxu1 %vm1112_vm10, %v3929_v44  ;;  %3781 = vmatprep.subr.bf16.mxu0 %v3932_v46  ;;  %v1557_v39 = vsel %vm4431_vm13, %v1552_v33, %v1556_v15  ;;  %v4445_v44 = vld [vmem:[%s4106_s17 + $0x58] sm:$0xff]   ;;  %v1516_v8 = vld [vmem:[%s4376_s8 + $0x24] sm:$0xf]  ;;  %v1592_v29 = vshll.u32 %v1514_v5, 16  ;;  %v1602_v31 = vshll.u32 %v1515_v6, 16 }
  0x90   : > { %3804 = vmatpush3.bf16.msra.mxu1 %v3933_v47  ;;  %3767 = vmatprep.mubr.msk.bf16.mxu1 %vm1112_vm10, %v3934_v48  ;;  %v3496_v45 = vcombine.low %v1547_v21, %v1557_v39  ;;  %v1576_v47 = vrot.slane %v1575_v36, 4  ;;  %v1753_v48 = vrot.slane %v1751_v38, 4  ;;  %v1517_v32 = vld [vmem:[%s4376_s8 + $0x28] sm:$0xf]  ;;  %v1607_v33 = vshrl.u32 %v1516_v8, 16 }
  0x91   : > { %3805 = vmatprep.subr.bf16.mxu1 %v3939_v51  ;;  %v1518_v21 = vld [vmem:[%s4376_s8 + $0x2c] sm:$0x1]  ;;  %v1604_v38 = vrot.slane %v1602_v31, 5  ;;  %v1520_v31 = vld [vmem:[%s4376_s8 + $0x34] sm:$0xf] }
  0x92   : > { %3782 = vmatpush3.bf16.msra.mxu0 %v3932_v46  ;;  %v1566_v46 = vrot.slane %v1565_v1, 4  ;;  %v1610_v1 = vshll.u32 %v1516_v8, 16  ;;  %v3952_v36 = vld [vmem:[%s4101_s14 + $0x48] sm:$0xff]   ;;  %v1609_v39 = vrot.slane %v1607_v33, 4 }
  0x93   : > { %3783 = vmatprep.subr.bf16.mxu0 %v3938_v50  ;;  %v2405_v24 = vld [vmem:[%s4376_s8 + $0x2c] sm:$0x1] }
  0x94   : > { %3806 = vmatpush3.bf16.msra.mxu1 %v3939_v51  ;;  %v1766_v51 = vrot.slane %v1764_v42, 4 }
  0x95   : > { %3744 = vmatmul.mubr.msk.bf16.gmra.mxu0 %vm1112_vm10, %v3931_v49  ;;  %3807 = vmatprep.subr.bf16.mxu1 %v3945_v56  ;;  %v1756_v49 = vrot.slane %v1754_v40, 5  ;;  %v1732_v40 = vld [vmem:[%s4382_s9 + $0x18] sm:$0xf] }
  0x96   : > { %3747 = vmatprep.mubr.msk.bf16.mxu0 %vm1112_vm10, %v3936_v52  ;;  %3784 = vmatpush3.bf16.msra.mxu0 %v3938_v50  ;;  %v1762_v50 = vrot.slane %v1760_v41, 5  ;;  %v1770_v52 = vshll.u32 %v1728_v37, 16 }
  0x97   : > { %3768 = vmatmul.mubr.msk.bf16.gmra.mxu1 %vm1112_vm10, %v3935_v53  ;;  %3785 = vmatprep.subr.bf16.mxu0 %v3944_v55  ;;  %v1730_v53 = vld [vmem:[%s4382_s9 + $0x10] sm:$0xf]  ;;  %v1757_v61 = vor.u32 %v1756_v49, %v1753_v48  ;;  %v1620_v48 = vshrl.u32 %v1517_v32, 16  ;;  %v1626_v49 = vshll.u32 %v1518_v21, 16 }
  0x98   : > { %3771 = vmatprep.mubr.msk.bf16.mxu1 %vm1112_vm10, %v3940_v54  ;;  %3808 = vmatpush3.bf16.msra.mxu1 %v3945_v56  ;;  %v1571_v54 = vsel %vm4431_vm13, %v1566_v46, %v1570_v30  ;;  %v1731_v56 = vld [vmem:[%s4382_s9 + $0x14] sm:$0x1]  ;;  %v1767_v62 = vor.u32 %v1766_v51, %v1762_v50  ;;  %v1772_v63 = vrot.slane %v1770_v52, 5  ;;  %v1784_v3 = vshll.u32 %v1730_v53, 16  ;;  %v3954_v52 = vld [vmem:[%s4101_s14 + $0x40] sm:$0xff]  }
  0x99   : > { %3809 = vmatprep.subr.bf16.mxu1 %v3949_v23  ;;  %v1788_v4 = vshrl.u32 %v1730_v53, 16  ;;  %v1758_v9 = vrot.slane %v1757_v61, 4  ;;  %v1794_v12 = vshll.u32 %v1731_v56, 16  ;;  %v1596_v30 = vshrl.u32 %v1514_v5, 16  ;;  %v3953_v51 = vld [vmem:[%s4106_s17 + $0x50] sm:$0xff]  }
  0x9a   : > { %3786 = vmatpush3.bf16.msra.mxu0 %v3944_v55  ;;  %v1581_v55 = vsel %vm4431_vm13, %v1576_v47, %v1580_v34  ;;  %v1768_v10 = vrot.slane %v1767_v62, 4  ;;  %v1786_v15 = vrot.slane %v1784_v3, 5  ;;  %v1734_v56 = vld [vmem:[%s4382_s9 + $0x20] sm:$0x1]  ;;  %v1628_v61 = vrot.slane %v1626_v49, 5 }
  0x9b   : > { %3827 = vmatprep.subr.bf16.mxu0 %v4418_v7  ;;  %v1790_v16 = vrot.slane %v1788_v4, 4  ;;  %v1763_v19 = vsel %vm4431_vm13, %v1758_v9, %v1762_v50  ;;  %v1796_v22 = vrot.slane %v1794_v12, 5  ;;  %v1598_v37 = vrot.slane %v1596_v30, 4  ;;  %v1733_v50 = vld [vmem:[%s4382_s9 + $0x1c] sm:$0xf] }
  0x9c   : > { %3810 = vmatpush3.bf16.msra.mxu1 %v3949_v23  ;;  %v1773_v20 = vsel %vm4431_vm13, %v1768_v10, %v1772_v63  ;;  %v1802_v62 = vshll.u32 %v1732_v40, 16  ;;  %v1736_v63 = vld [vmem:[%s4382_s9 + $0x28] sm:$0xf]  ;;  %v1808_v4 = vshll.u32 %v1733_v50, 16  ;;  %v1812_v5 = vshrl.u32 %v1733_v50, 16 }
  0x9d   : > { %3748 = vmatmul.mubr.msk.bf16.gmra.mxu0 %vm1112_vm10, %v3937_v57  ;;  %3851 = vmatprep.subr.bf16.mxu1 %v4445_v44  ;;  %v1775_v57 = vshrl.u32 %v1729_v43, 16  ;;  %v3524_v25 = vcombine.low %v1763_v19, %v1773_v20  ;;  %v1791_v27 = vor.u32 %v1790_v16, %v1786_v15  ;;  %v1818_v10 = vshll.u32 %v1734_v56, 16  ;;  %v1737_v16 = vld [vmem:[%s4382_s9 + $0x2c] sm:$0x1] }
  0x9e   : > { %3751 = vmatprep.mubr.msk.bf16.mxu0 %vm1112_vm10, %v3942_v59  ;;  %v1513_v59 = vld [vmem:[%s4376_s8 + $0x18] sm:$0xf]  ;;  %v1804_v9 = vrot.slane %v1802_v62, 5  ;;  %v1842_v30 = vshll.u32 %v1737_v16, 16 }
  0x9f   : > { %3772 = vmatmul.mubr.msk.bf16.gmra.mxu1 %vm1112_vm10, %v3941_v58  ;;  %v1778_v58 = vshll.u32 %v1729_v43, 16  ;;  %v1777_v0 = vrot.slane %v1775_v57, 4  ;;  %v1583_v13 = vshrl.u32 %v1513_v59, 16  ;;  %v1792_v11 = vrot.slane %v1791_v27, 4 }
  0xa0   : > { %3775 = vmatprep.mubr.msk.bf16.mxu1 %vm1112_vm10, %v3946_v60  ;;  %v3497_v60 = vcombine.low %v1571_v54, %v1581_v55  ;;  %v1612_v43 = vrot.slane %v1610_v1, 5  ;;  %v1799_v57 = vshrl.u32 %v1732_v40, 16 }
  0xa1   : > { %v1780_v2 = vrot.slane %v1778_v58, 5  ;;  %v1585_v23 = vrot.slane %v1583_v13, 4  ;;  %v1797_v41 = vsel %vm4431_vm13, %v1792_v11, %v1796_v22  ;;  %v1735_v58 = vld [vmem:[%s4382_s9 + $0x24] sm:$0xf] }
  0xa2   : > { %v1613_v54 = vor.u32 %v1612_v43, %v1609_v39  ;;  %v1801_v3 = vrot.slane %v1799_v57, 4  ;;  %v1823_v19 = vshrl.u32 %v1735_v58, 16  ;;  %v1826_v22 = vshll.u32 %v1735_v58, 16 }
  0xa3   : > { %v1781_v14 = vor.u32 %v1780_v2, %v1777_v0  ;;  %v3955_v0 = vld [vmem:[%s4106_s17 + $0x48] sm:$0xff]  }
  0xa4   : > { %v1614_v2 = vrot.slane %v1613_v54, 4  ;;  %v1828_v11 = vrot.slane %v1826_v22, 5  ;;  %v1738_v54 = vld [vmem:[%s4382_s9 + $0x30] sm:$0xf] }
  0xa5   : > { %3752 = vmatmul.mubr.msk.bf16.gmra.mxu0 %vm1112_vm10, %v3943_v17  ;;  %v1586_v17 = vshll.u32 %v1513_v59, 16  ;;  %v1782_v26 = vrot.slane %v1781_v14, 4  ;;  %v1810_v14 = vrot.slane %v1808_v4, 5  ;;  %v1739_v4 = vld [vmem:[%s4382_s9 + $0x34] sm:$0xf] }
  0xa6   : > { %3787 = vmatprep.mubr.msk.bf16.mxu0 %vm1112_vm10, %v3496_v45  ;;  %v1616_v45 = vshll.u32 %v1517_v32, 16  ;;  %v3956_v32 = vld [vmem:[%s4106_s17 + $0x40] sm:$0xff]  }
  0xa7   : > { %3776 = vmatmul.mubr.msk.bf16.gmra.mxu1 %vm1112_vm10, %v3947_v35  ;;  %v1588_v28 = vrot.slane %v1586_v17, 5  ;;  %v1787_v34 = vsel %vm4431_vm13, %v1782_v26, %v1786_v15  ;;  %v1814_v15 = vrot.slane %v1812_v5, 4  ;;  %v1805_v17 = vor.u32 %v1804_v9, %v1801_v3  ;;  %v1519_v26 = vld [vmem:[%s4376_s8 + $0x30] sm:$0xf] }
  0xa8   : > { %3811 = vmatprep.mubr.msk.bf16.mxu1 %vm1112_vm10, %v3524_v25  ;;  %v3525_v46 = vcombine.low %v1787_v34, %v1797_v41  ;;  %v1618_v55 = vrot.slane %v1616_v45, 5  ;;  %v1836_v25 = vshrl.u32 %v1736_v63, 16  ;;  %v1634_v40 = vshll.u32 %v1519_v26, 16 }
  0xa9   : > { %v1589_v35 = vor.u32 %v1588_v28, %v1585_v23  ;;  %v1815_v20 = vor.u32 %v1814_v15, %v1810_v14  ;;  %v1832_v23 = vshll.u32 %v1736_v63, 16  ;;  %v1806_v28 = vrot.slane %v1805_v17, 4 }
  0xaa   : > { %v1619_v13 = vsel %vm4431_vm13, %v1614_v2, %v1618_v55  ;;  %v1838_v1 = vrot.slane %v1836_v25, 4  ;;  %v1640_v41 = vshll.u32 %v1520_v31, 16  ;;  %v1636_v50 = vrot.slane %v1634_v40, 5  ;;  %v1525_v40 = vld [vmem:[%s4376_s8 + $0x48] sm:$0xf] }
  0xab   : > { %v1590_v42 = vrot.slane %v1589_v35, 4  ;;  %v1816_v34 = vrot.slane %v1815_v20, 4  ;;  %v1834_v35 = vrot.slane %v1832_v23, 5  ;;  %v1811_v21 = vsel %vm4431_vm13, %v1806_v28, %v1810_v14  ;;  %v1740_v14 = vld [vmem:[%s4382_s9 + $0x38] sm:$0x1] }
  0xac   : > { %v1847_v15 = vshrl.u32 %v1738_v54, 16  ;;  %v1850_v17 = vshll.u32 %v1738_v54, 16  ;;  %v1679_v54 = vshrl.u32 %v1525_v40, 16 }
  0xad   : > { %3788 = vmatmul.mubr.msk.bf16.vlgmr.msra.gmra.mxu0 %vm1112_vm10, %v3497_v60  ;;  %v1622_v60 = vrot.slane %v1620_v48, 4  ;;  %v1839_v45 = vor.u32 %v1838_v1, %v1834_v35  ;;  %v1523_v48 = vld [vmem:[%s4376_s8 + $0x40] sm:$0xf] }
  0xae   : > { %3828 = vmatpush3.bf16.msra.mxu0 %v4418_v7  ;;  %v1594_v7 = vrot.slane %v1592_v29, 5  ;;  %v1825_v29 = vrot.slane %v1823_v19, 4  ;;  %v1664_v62 = vshll.u32 %v1523_v48, 16  ;;  %v1668_v9 = vshrl.u32 %v1523_v48, 16  ;;  %v1741_v19 = vld [vmem:[%s4382_s9 + $0x3c] sm:$0xf] }
  0xaf   : > { %3829 = vmatprep.subr.bf16.mxu0 %v3950_v18  ;;  %3812 = vmatmul.mubr.msk.bf16.vlgmr.msra.gmra.mxu1 %vm1112_vm10, %v3525_v46  ;;  %v1623_v8 = vor.u32 %v1622_v60, %v1618_v55  ;;  %v1840_v55 = vrot.slane %v1839_v45, 4  ;;  %v1849_v25 = vrot.slane %v1847_v15, 4  ;;  %v1874_v1 = vshll.u32 %v1741_v19, 16 }
  0xb0   : > { %v1599_v47 = vor.u32 %v1598_v37, %v1594_v7  ;;  %v1595_v53 = vsel %vm4431_vm13, %v1590_v42, %v1594_v7  ;;  %3852 = vmatpush3.bf16.msra.mxu1 %v4445_v44  ;;  %v1521_v7 = vld [vmem:[%s4376_s8 + $0x38] sm:$0x1]  ;;  %v1631_v37 = vshrl.u32 %v1519_v26, 16  ;;  %v1829_v39 = vor.u32 %v1828_v11, %v1825_v29  ;;  %v1522_v42 = vld [vmem:[%s4376_s8 + $0x3c] sm:$0xf] }
  0xb1   : > { %3853 = vmatprep.subr.bf16.mxu1 %v3953_v51  ;;  %v1624_v44 = vrot.slane %v1623_v8, 4  ;;  %v1655_v57 = vshrl.u32 %v1522_v42, 16  ;;  %v1658_v58 = vshll.u32 %v1522_v42, 16  ;;  %v1666_v8 = vrot.slane %v1664_v62, 5  ;;  %v1742_v26 = vld [vmem:[%s4382_s9 + $0x40] sm:$0xf] }
  0xb2   : > { %3830 = vmatpush3.bf16.msra.mxu0 %v3950_v18  ;;  %v1600_v59 = vrot.slane %v1599_v47, 4  ;;  %v1820_v18 = vrot.slane %v1818_v10, 5  ;;  %v1633_v46 = vrot.slane %v1631_v37, 4  ;;  %v1644_v47 = vshrl.u32 %v1520_v31, 16 }
  0xb3   : > { %3831 = vmatprep.subr.bf16.mxu0 %v3952_v36  ;;  %v1629_v27 = vsel %vm4431_vm13, %v1624_v44, %v1628_v61  ;;  %v1830_v49 = vrot.slane %v1829_v39, 4  ;;  %v1657_v2 = vrot.slane %v1655_v57, 4  ;;  %v1660_v3 = vrot.slane %v1658_v58, 5 }
  0xb4   : > { %v1605_v6 = vsel %vm4431_vm13, %v1600_v59, %v1604_v38  ;;  %3854 = vmatpush3.bf16.msra.mxu1 %v3953_v51  ;;  %v3499_v33 = vcombine.low %v1619_v13, %v1629_v27  ;;  %v1821_v38 = vsel %vm4431_vm13, %v1816_v34, %v1820_v18  ;;  %v1642_v51 = vrot.slane %v1640_v41, 5 }
  0xb5   : > { %v3498_v12 = vcombine.low %v1595_v53, %v1605_v6  ;;  %3855 = vmatprep.subr.bf16.mxu1 %v3955_v0  ;;  %v3526_v43 = vcombine.low %v1811_v21, %v1821_v38  ;;  %v1524_v53 = vld [vmem:[%s4376_s8 + $0x44] sm:$0x1]  ;;  %v1646_v56 = vrot.slane %v1644_v47, 4  ;;  %v1835_v59 = vsel %vm4431_vm13, %v1830_v49, %v1834_v35 }
  0xb6   : > { %3832 = vmatpush3.bf16.msra.mxu0 %v3952_v36  ;;  %v1844_v36 = vrot.slane %v1842_v30, 5  ;;  %v1637_v60 = vor.u32 %v1636_v50, %v1633_v46  ;;  %v1674_v13 = vshll.u32 %v1524_v53, 16  ;;  %v1670_v44 = vrot.slane %v1668_v9, 4  ;;  %v1743_v21 = vld [vmem:[%s4382_s9 + $0x44] sm:$0x1] }
  0xb7   : > { %3833 = vmatprep.subr.bf16.mxu0 %v3954_v52  ;;  %3791 = vmatprep.mubr.msk.bf16.mxu0 %vm1112_vm10, %v3498_v12  ;;  %v1661_v12 = vor.u32 %v1660_v3, %v1657_v2  ;;  %v1856_v18 = vshll.u32 %v1739_v4, 16  ;;  %v1852_v29 = vrot.slane %v1850_v17, 5  ;;  %v1871_v34 = vshrl.u32 %v1741_v19, 16  ;;  %v1526_v46 = vld [vmem:[%s4376_s8 + $0x4c] sm:$0xf] }
  0xb8   : > { %3792 = vmatmul.mubr.msk.bf16.gmra.mxu0 %vm1112_vm10, %v3499_v33  ;;  %3856 = vmatpush3.bf16.msra.mxu1 %v3955_v0  ;;  %v1845_v63 = vsel %vm4431_vm13, %v1840_v55, %v1844_v36  ;;  %v1647_v0 = vor.u32 %v1646_v56, %v1642_v51  ;;  %v1638_v6 = vrot.slane %v1637_v60, 4  ;;  %v1676_v23 = vrot.slane %v1674_v13, 5  ;;  %v1527_v53 = vld [vmem:[%s4376_s8 + $0x50] sm:$0x1]  ;;  %v1530_v13 = vld [vmem:[%s4376_s8 + $0x5c] sm:$0x1] }
  0xb9   : > { %3857 = vmatprep.subr.bf16.mxu1 %v3956_v32  ;;  %3815 = vmatprep.mubr.msk.bf16.mxu1 %vm1112_vm10, %v3526_v43  ;;  %v3527_v5 = vcombine.low %v1835_v59, %v1845_v63  ;;  %v1662_v22 = vrot.slane %v1661_v12, 4  ;;  %v1671_v28 = vor.u32 %v1670_v44, %v1666_v8  ;;  %v1858_v30 = vrot.slane %v1856_v18, 5  ;;  %v1744_v17 = vld [vmem:[%s4382_s9 + $0x48] sm:$0xf] }
  0xba   : > { %3834 = vmatpush3.bf16.msra.mxu0 %v3954_v52  ;;  %v1650_v52 = vshll.u32 %v1521_v7, 16  ;;  %v1648_v10 = vrot.slane %v1647_v0, 4  ;;  %v1643_v16 = vsel %vm4431_vm13, %v1638_v6, %v1642_v51  ;;  %v1866_v33 = vshll.u32 %v1740_v14, 16  ;;  %v1528_v0 = vld [vmem:[%s4376_s8 + $0x54] sm:$0xf] }
  0xbb   : > { %3816 = vmatmul.mubr.msk.bf16.gmra.mxu1 %vm1112_vm10, %v3527_v5  ;;  %v1667_v31 = vsel %vm4431_vm13, %v1662_v22, %v1666_v8  ;;  %v1672_v11 = vrot.slane %v1671_v28, 4  ;;  %v1853_v35 = vor.u32 %v1852_v29, %v1849_v25  ;;  %v1880_v36 = vshll.u32 %v1742_v26, 16  ;;  %v1529_v6 = vld [vmem:[%s4376_s8 + $0x58] sm:$0xf]  ;;  %v1745_v28 = vld [vmem:[%s4382_s9 + $0x4c] sm:$0xf] }
  0xbc   : > { %v1652_v61 = vrot.slane %v1650_v52, 5  ;;  %3858 = vmatpush3.bf16.msra.mxu1 %v3956_v32  ;;  %v1860_v32 = vshrl.u32 %v1739_v4, 16  ;;  %v1868_v37 = vrot.slane %v1866_v33, 5  ;;  %v1873_v38 = vrot.slane %v1871_v34, 4 }
  0xbd   : > { %v1884_v39 = vshrl.u32 %v1742_v26, 16  ;;  %v1677_v41 = vsel %vm4431_vm13, %v1672_v11, %v1676_v23  ;;  %v1854_v42 = vrot.slane %v1853_v35, 4  ;;  %v1876_v43 = vrot.slane %v1874_v1, 5  ;;  %v1747_v1 = vld [vmem:[%s4382_s9 + $0x54] sm:$0xf] }
  0xbe   : > { %v1653_v20 = vsel %vm4431_vm13, %v1648_v10, %v1652_v61  ;;  %v1862_v7 = vrot.slane %v1860_v32, 4  ;;  %v1882_v45 = vrot.slane %v1880_v36, 5  ;;  %v3501_v47 = vcombine.low %v1667_v31, %v1677_v41  ;;  %v1746_v32 = vld [vmem:[%s4382_s9 + $0x50] sm:$0x1] }
  0xbf   : > { %v3500_v27 = vcombine.low %v1643_v16, %v1653_v20  ;;  %v1886_v49 = vrot.slane %v1884_v39, 4  ;;  %v1890_v50 = vshll.u32 %v1743_v21, 16  ;;  %v1859_v51 = vsel %vm4431_vm13, %v1854_v42, %v1858_v30 }
  0xc0   : > { %v1863_v48 = vor.u32 %v1862_v7, %v1858_v30  ;;  %v1877_v52 = vor.u32 %v1876_v43, %v1873_v38  ;;  %v1682_v55 = vshll.u32 %v1525_v40, 16  ;;  %v1688_v59 = vshll.u32 %v1526_v46, 16  ;;  %v1748_v43 = vld [vmem:[%s4382_s9 + $0x58] sm:$0xf] }
  0xc1   : > { %3795 = vmatprep.mubr.msk.bf16.mxu0 %vm1112_vm10, %v3500_v27  ;;  %v1887_v57 = vor.u32 %v1886_v49, %v1882_v45  ;;  %v1892_v58 = vrot.slane %v1890_v50, 5  ;;  %v1681_v61 = vrot.slane %v1679_v54, 4  ;;  %v1692_v63 = vshrl.u32 %v1526_v46, 16  ;;  %v2394_v54 = vld [vmem:[%s4376_s8] sm:$0xe] }
  0xc2   : > { %3796 = vmatmul.mubr.msk.bf16.gmra.mxu0 %vm1112_vm10, %v3501_v47  ;;  %v1864_v56 = vrot.slane %v1863_v48, 4  ;;  %v1878_v60 = vrot.slane %v1877_v52, 4  ;;  %v1684_v62 = vrot.slane %v1682_v55, 5  ;;  %v1690_v4 = vrot.slane %v1688_v59, 5  ;;  %v1749_v48 = vld [vmem:[%s4382_s9 + $0x5c] sm:$0x1] }
  0xc3   : > { %v1888_v3 = vrot.slane %v1887_v57, 4  ;;  %v1698_v5 = vshll.u32 %v1527_v53, 16  ;;  %v1694_v12 = vrot.slane %v1692_v63, 4  ;;  %v1703_v16 = vshrl.u32 %v1528_v0, 16  ;;  %v2395_v55 = vld [vmem:[%s4376_s8 + $0x4] sm:$0xf] }
  0xc4   : > { %v1869_v2 = vsel %vm4431_vm13, %v1864_v56, %v1868_v37  ;;  %v1883_v9 = vsel %vm4431_vm13, %v1878_v60, %v1882_v45  ;;  %v1685_v10 = vor.u32 %v1684_v62, %v1681_v61  ;;  %v1706_v44 = vshll.u32 %v1528_v0, 16  ;;  %v2396_v60 = vld [vmem:[%s4376_s8 + $0x8] sm:$0x1] }
  0xc5   : > { %v3528_v8 = vcombine.low %v1859_v51, %v1869_v2  ;;  %v1893_v14 = vsel %vm4431_vm13, %v1888_v3, %v1892_v58  ;;  %v1700_v15 = vrot.slane %v1698_v5, 5  ;;  %v1695_v20 = vor.u32 %v1694_v12, %v1690_v4  ;;  %v2397_v2 = vld [vmem:[%s4376_s8 + $0xc] sm:$0xe] }
  0xc6   : > { %v3529_v18 = vcombine.low %v1883_v9, %v1893_v14  ;;  %v1686_v19 = vrot.slane %v1685_v10, 4  ;;  %v1712_v22 = vshll.u32 %v1529_v6, 16  ;;  %v1705_v23 = vrot.slane %v1703_v16, 4  ;;  %v2501_v16 = vld [vmem:[%s4382_s9] sm:$0xe] }
  0xc7   : > { %3819 = vmatprep.mubr.msk.bf16.mxu1 %vm1112_vm10, %v3528_v8  ;;  %v1708_v25 = vrot.slane %v1706_v44, 5  ;;  %v1716_v26 = vshrl.u32 %v1529_v6, 16  ;;  %v1722_v27 = vshll.u32 %v1530_v13, 16  ;;  %v1696_v30 = vrot.slane %v1695_v20, 4  ;;  %v2398_v8 = vld [vmem:[%s4376_s8 + $0x10] sm:$0xf] }
  0xc8   : > { %3820 = vmatmul.mubr.msk.bf16.gmra.mxu1 %vm1112_vm10, %v3529_v18  ;;  %v1691_v29 = vsel %vm4431_vm13, %v1686_v19, %v1690_v4  ;;  %v1714_v31 = vrot.slane %v1712_v22, 5  ;;  %v1895_v33 = vshrl.u32 %v1744_v17, 16  ;;  %v1898_v21 = vshll.u32 %v1744_v17, 16  ;;  %v2502_v20 = vld [vmem:[%s4382_s9 + $0x4] sm:$0xf] }
  0xc9   : > { %v1709_v34 = vor.u32 %v1708_v25, %v1705_v23  ;;  %v1718_v11 = vrot.slane %v1716_v26, 4  ;;  %v1724_v35 = vrot.slane %v1722_v27, 5  ;;  %v1701_v36 = vsel %vm4431_vm13, %v1696_v30, %v1700_v15  ;;  %v2399_v15 = vld [vmem:[%s4376_s8 + $0x14] sm:$0x1]  ;;  %v2503_v27 = vld [vmem:[%s4382_s9 + $0x8] sm:$0x1] }
  0xca   : > { %v1897_v7 = vrot.slane %v1895_v33, 4  ;;  %v1904_v37 = vshll.u32 %v1745_v28, 16  ;;  %v1908_v38 = vshrl.u32 %v1745_v28, 16  ;;  %v3502_v39 = vcombine.low %v1691_v29, %v1701_v36  ;;  %v2504_v28 = vld [vmem:[%s4382_s9 + $0xc] sm:$0xe] }
  0xcb   : > { %v1710_v40 = vrot.slane %v1709_v34, 4  ;;  %v1719_v41 = vor.u32 %v1718_v11, %v1714_v31  ;;  %v1900_v42 = vrot.slane %v1898_v21, 5  ;;  %v1914_v47 = vshll.u32 %v1746_v32, 16  ;;  %v2505_v33 = vld [vmem:[%s4382_s9 + $0x10] sm:$0xf] }
  0xcc   : > { %v1906_v45 = vrot.slane %v1904_v37, 5  ;;  %v1910_v46 = vrot.slane %v1908_v38, 4  ;;  %v1919_v49 = vshrl.u32 %v1747_v1, 16  ;;  %3799 = vmatprep.mubr.msk.bf16.mxu0 %vm1112_vm10, %v3502_v39  ;;  %v1922_v53 = vshll.u32 %v1747_v1, 16  ;;  %v2506_v1 = vld [vmem:[%s4382_s9 + $0x14] sm:$0x1] }
  0xcd   : > { %v1715_v50 = vsel %vm4431_vm13, %v1710_v40, %v1714_v31  ;;  %v1720_v51 = vrot.slane %v1719_v41, 4  ;;  %v1901_v52 = vor.u32 %v1900_v42, %v1897_v7  ;;  %v1916_v57 = vrot.slane %v1914_v47, 5  ;;  %v2400_v39 = vld [vmem:[%s4376_s8 + $0x18] sm:$0xe]  ;;  %v2401_v40 = vld [vmem:[%s4376_s8 + $0x1c] sm:$0xf] }
  0xce   : > { %v1911_v56 = vor.u32 %v1910_v46, %v1906_v45  ;;  %v1921_v58 = vrot.slane %v1919_v49, 4  ;;  %v1928_v59 = vshll.u32 %v1748_v43, 16  ;;  %v1924_v63 = vrot.slane %v1922_v53, 5  ;;  %v2402_v46 = vld [vmem:[%s4376_s8 + $0x20] sm:$0x1] }
  0xcf   : > { %v1725_v61 = vsel %vm4431_vm13, %v1720_v51, %v1724_v35  ;;  %v1902_v62 = vrot.slane %v1901_v52, 4  ;;  %v1932_v0 = vshrl.u32 %v1748_v43, 16  ;;  %v1938_v6 = vshll.u32 %v1749_v48, 16  ;;  %v2403_v47 = vld [vmem:[%s4376_s8 + $0x24] sm:$0xe] }
  0xd0   : > { %v3503_v3 = vcombine.low %v1715_v50, %v1725_v61  ;;  %v1912_v4 = vrot.slane %v1911_v56, 4  ;;  %v1930_v5 = vrot.slane %v1928_v59, 5  ;;  %v1925_v10 = vor.u32 %v1924_v63, %v1921_v58  ;;  %v2404_v52 = vld [vmem:[%s4376_s8 + $0x28] sm:$0xf]  ;;  %v2508_v58 = vld [vmem:[%s4382_s9 + $0x1c] sm:$0xf] }
  0xd1   : > { %v1907_v9 = vsel %vm4431_vm13, %v1902_v62, %v1906_v45  ;;  %v1934_v12 = vrot.slane %v1932_v0, 4  ;;  %v3544_v14 = vrot.slane %v2394_v54, 9  ;;  %v1940_v17 = vrot.slane %v1938_v6, 5  ;;  %v2509_v63 = vld [vmem:[%s4382_s9 + $0x20] sm:$0x1] }
  0xd2   : > { %3800 = vmatmul.mubr.msk.bf16.gmra.mxu0 %vm1112_vm10, %v3503_v3  ;;  %v1917_v44 = vsel %vm4431_vm13, %v1912_v4, %v1916_v57  ;;  %v2447_v18 = vrot.slane %v2395_v55, 5  ;;  %v2450_v19 = vrot.slane %v2396_v60, 5  ;;  %v1926_v23 = vrot.slane %v1925_v10, 4  ;;  %v2507_v57 = vld [vmem:[%s4382_s9 + $0x18] sm:$0xe] }
  0xd3   : > { %v3530_v22 = vcombine.low %v1907_v9, %v1917_v44  ;;  %v1935_v25 = vor.u32 %v1934_v12, %v1930_v5  ;;  %v3545_v26 = vrot.slane %v2397_v2, 9  ;;  %v2454_v31 = vrot.slane %v2398_v8, 5  ;;  %v2510_v0 = vld [vmem:[%s4382_s9 + $0x24] sm:$0xe]  ;;  %v2511_v6 = vld [vmem:[%s4382_s9 + $0x28] sm:$0xf] }
  0xd4   : > { %v2448_v29 = vsel %vm4570_vm0, %v3544_v14, %v2447_v18  ;;  %v2449_v30 = vrot.slane %v2447_v18, 4  ;;  %v2457_v32 = vrot.slane %v2399_v15, 5  ;;  %v1931_v34 = vsel %vm4431_vm13, %v1926_v23, %v1930_v5  ;;  %v2512_v14 = vld [vmem:[%s4382_s9 + $0x2c] sm:$0x1]  ;;  %v2406_v15 = vld [vmem:[%s4376_s8 + $0x30] sm:$0xe] }
  0xd5   : > { %3823 = vmatprep.mubr.msk.bf16.mxu1 %vm1112_vm10, %v3530_v22  ;;  %v1936_v11 = vrot.slane %v1935_v25, 4  ;;  %v3552_v35 = vrot.slane %v2501_v16, 9  ;;  %v2551_v21 = vrot.slane %v2502_v20, 5  ;;  %v2455_v7 = vsel %vm4570_vm0, %v3545_v26, %v2454_v31  ;;  %v2408_v20 = vld [vmem:[%s4376_s8 + $0x38] sm:$0x1] }
  0xd6   : > { %v2451_v36 = vsel %vm4570_vm0, %v2449_v30, %v2450_v19  ;;  %v2456_v37 = vrot.slane %v2454_v31, 4  ;;  %v2554_v38 = vrot.slane %v2503_v27, 5  ;;  %v3553_v50 = vrot.slane %v2504_v28, 9  ;;  %v2407_v19 = vld [vmem:[%s4376_s8 + $0x34] sm:$0xf] }
  0xd7   : > { %v1941_v41 = vsel %vm4431_vm13, %v1936_v11, %v1940_v17  ;;  %v3568_v42 = vcombine.low %v2448_v29, %v2451_v36  ;;  %v2552_v43 = vsel %vm4570_vm0, %v3552_v35, %v2551_v21  ;;  %v2553_v45 = vrot.slane %v2551_v21, 4  ;;  %v2409_v27 = vld [vmem:[%s4376_s8 + $0x3c] sm:$0xe]  ;;  %v2514_v36 = vld [vmem:[%s4382_s9 + $0x34] sm:$0xf] }
  0xd8   : > { %v3531_v48 = vcombine.low %v1931_v34, %v1941_v41  ;;  %v2458_v49 = vsel %vm4570_vm0, %v2456_v37, %v2457_v32  ;;  %v2558_v51 = vrot.slane %v2505_v33, 5  ;;  %v2561_v55 = vrot.slane %v2506_v1, 5  ;;  %v2410_v32 = vld [vmem:[%s4376_s8 + $0x40] sm:$0xf]  ;;  %v2411_v33 = vld [vmem:[%s4376_s8 + $0x44] sm:$0x1] }
  0xd9   : > { %3835 = vmatprep.mubr.msk.bf16.mxu0 %vm1112_vm10, %v3568_v42  ;;  %v3569_v53 = vcombine.low %v2455_v7, %v2458_v49  ;;  %v2555_v54 = vsel %vm4570_vm0, %v2553_v45, %v2554_v38  ;;  %v3546_v56 = vrot.slane %v2400_v39, 9  ;;  %v2461_v62 = vrot.slane %v2401_v40, 5  ;;  %v2513_v1 = vld [vmem:[%s4382_s9 + $0x30] sm:$0xe]  ;;  %v2515_v40 = vld [vmem:[%s4382_s9 + $0x38] sm:$0x1] }
  0xda   : > { %3824 = vmatmul.mubr.msk.bf16.gmra.mxu1 %vm1112_vm10, %v3531_v48  ;;  %v3596_v59 = vcombine.low %v2552_v43, %v2555_v54  ;;  %v2559_v60 = vsel %vm4570_vm0, %v3553_v50, %v2558_v51  ;;  %v2560_v61 = vrot.slane %v2558_v51, 4  ;;  %v2464_v2 = vrot.slane %v2402_v46, 5  ;;  %v2516_v46 = vld [vmem:[%s4382_s9 + $0x3c] sm:$0xe] }
  0xdb   : > { %3836 = vmatmul.mubr.msk.bf16.vlgmr.msra.gmra.mxu0 %vm1112_vm10, %v3569_v53  ;;  %v3547_v3 = vrot.slane %v2403_v47, 9  ;;  %v2468_v4 = vrot.slane %v2404_v52, 5  ;;  %v2471_v5 = vrot.slane %v2405_v24, 5  ;;  %v2462_v9 = vsel %vm4570_vm0, %v3546_v56, %v2461_v62  ;;  %v2517_v47 = vld [vmem:[%s4382_s9 + $0x40] sm:$0xf] }
  0xdc   : > { %3859 = vmatprep.mubr.msk.bf16.mxu1 %vm1112_vm10, %v3596_v59  ;;  %v2562_v8 = vsel %vm4570_vm0, %v2560_v61, %v2561_v55  ;;  %v2463_v10 = vrot.slane %v2461_v62, 4  ;;  %v3554_v12 = vrot.slane %v2507_v57, 9  ;;  %v2565_v18 = vrot.slane %v2508_v58, 5  ;;  %v2518_v52 = vld [vmem:[%s4382_s9 + $0x44] sm:$0x1] }
  0xdd   : > { %v3597_v16 = vcombine.low %v2559_v60, %v2562_v8  ;;  %v2469_v44 = vsel %vm4570_vm0, %v3547_v3, %v2468_v4  ;;  %v2470_v17 = vrot.slane %v2468_v4, 4  ;;  %v2568_v23 = vrot.slane %v2509_v63, 5  ;;  %v2412_v24 = vld [vmem:[%s4376_s8 + $0x48] sm:$0xe]  ;;  %v2413_v57 = vld [vmem:[%s4376_s8 + $0x4c] sm:$0xf] }
  0xde   : > { %v2465_v22 = vsel %vm4570_vm0, %v2463_v10, %v2464_v2  ;;  %v3555_v25 = vrot.slane %v2510_v0, 9  ;;  %v2572_v26 = vrot.slane %v2511_v6, 5  ;;  %v2566_v30 = vsel %vm4570_vm0, %v3554_v12, %v2565_v18  ;;  %v2414_v62 = vld [vmem:[%s4376_s8 + $0x50] sm:$0x1]  ;;  %v2415_v4 = vld [vmem:[%s4376_s8 + $0x54] sm:$0xe] }
  0xdf   : > { %v3570_v28 = vcombine.low %v2462_v9, %v2465_v22  ;;  %v2472_v29 = vsel %vm4570_vm0, %v2470_v17, %v2471_v5  ;;  %v2567_v31 = vrot.slane %v2565_v18, 4  ;;  %v2575_v21 = vrot.slane %v2512_v14, 5  ;;  %v2416_v5 = vld [vmem:[%s4376_s8 + $0x58] sm:$0xf]  ;;  %v2417_v10 = vld [vmem:[%s4376_s8 + $0x5c] sm:$0x1] }
  0xe0   : > { %v3571_v34 = vcombine.low %v2469_v44, %v2472_v29  ;;  %v2573_v11 = vsel %vm4570_vm0, %v3555_v25, %v2572_v26  ;;  %v2574_v35 = vrot.slane %v2572_v26, 4  ;;  %v3548_v37 = vrot.slane %v2406_v15, 9  ;;  %v2519_v12 = vld [vmem:[%s4382_s9 + $0x48] sm:$0xe]  ;;  %v2520_v17 = vld [vmem:[%s4382_s9 + $0x4c] sm:$0xf] }
  0xe1   : > { %3839 = vmatprep.mubr.msk.bf16.mxu0 %vm1112_vm10, %v3570_v28  ;;  %v2569_v7 = vsel %vm4570_vm0, %v2567_v31, %v2568_v23  ;;  %v2475_v38 = vrot.slane %v2407_v19, 5  ;;  %v2478_v39 = vrot.slane %v2408_v20, 5  ;;  %v3549_v43 = vrot.slane %v2409_v27, 9  ;;  %v2521_v22 = vld [vmem:[%s4382_s9 + $0x50] sm:$0x1] }
  0xe2   : > { %3860 = vmatmul.mubr.msk.bf16.vlgmr.msra.gmra.mxu1 %vm1112_vm10, %v3597_v16  ;;  %v3598_v41 = vcombine.low %v2566_v30, %v2569_v7  ;;  %v2576_v42 = vsel %vm4570_vm0, %v2574_v35, %v2575_v21  ;;  %v2482_v45 = vrot.slane %v2410_v32, 5  ;;  %v2485_v51 = vrot.slane %v2411_v33, 5  ;;  %v2523_v23 = vld [vmem:[%s4382_s9 + $0x58] sm:$0xf]  ;;  %v2522_v33 = vld [vmem:[%s4382_s9 + $0x54] sm:$0xe] }
  0xe3   : > { %3840 = vmatmul.mubr.msk.bf16.gmra.mxu0 %vm1112_vm10, %v3571_v34  ;;  %v3599_v48 = vcombine.low %v2573_v11, %v2576_v42  ;;  %v2476_v49 = vsel %vm4570_vm0, %v3548_v37, %v2475_v38  ;;  %v2477_v50 = vrot.slane %v2475_v38, 4  ;;  %v3556_v55 = vrot.slane %v2513_v1, 9  ;;  %v2524_v21 = vld [vmem:[%s4382_s9 + $0x5c] sm:$0x1] }
  0xe4   : > { %3863 = vmatprep.mubr.msk.bf16.mxu1 %vm1112_vm10, %v3598_v41  ;;  %v2483_v53 = vsel %vm4570_vm0, %v3549_v43, %v2482_v45  ;;  %v2484_v54 = vrot.slane %v2482_v45, 4  ;;  %v2579_v56 = vrot.slane %v2514_v36, 5  ;;  %v2582_v59 = vrot.slane %v2515_v40, 5 }
  0xe5   : > { %v2479_v58 = vsel %vm4570_vm0, %v2477_v50, %v2478_v39  ;;  %v3557_v60 = vrot.slane %v2516_v46, 9  ;;  %v2586_v61 = vrot.slane %v2517_v47, 5  ;;  %v2589_v9 = vrot.slane %v2518_v52, 5  ;;  %v1026_v50 = vld [vmem:[#allocation4 + $0x10] sm:$0xff]  ;;  %v1024_v52 = vld [vmem:[#allocation4] sm:$0xff] }
  0xe6   : > { %v3572_v63 = vcombine.low %v2476_v49, %v2479_v58  ;;  %v2486_v0 = vsel %vm4570_vm0, %v2484_v54, %v2485_v51  ;;  %v2580_v2 = vsel %vm4570_vm0, %v3556_v55, %v2579_v56  ;;  %v2581_v3 = vrot.slane %v2579_v56, 4  ;;  %v1027_v54 = vld [vmem:[#allocation4 + $0x18] sm:$0xff]  ;;  %v1025_v58 = vld [vmem:[#allocation4 + $0x8] sm:$0xff] }
  0xe7   : > { %v3573_v6 = vcombine.low %v2483_v53, %v2486_v0  ;;  %v2588_v8 = vrot.slane %v2586_v61, 4  ;;  %v3550_v15 = vrot.slane %v2412_v24, 9  ;;  %v2489_v16 = vrot.slane %v2413_v57, 5 }
  0xe8   : > { %3843 = vmatprep.mubr.msk.bf16.mxu0 %vm1112_vm10, %v3572_v63  ;;  %v2583_v14 = vsel %vm4570_vm0, %v2581_v3, %v2582_v59  ;;  %v2492_v44 = vrot.slane %v2414_v62, 5  ;;  %v3551_v19 = vrot.slane %v2415_v4, 9  ;;  %v2496_v20 = vrot.slane %v2416_v5, 5 }
  0xe9   : > { %v3600_v18 = vcombine.low %v2580_v2, %v2583_v14  ;;  %v2587_v25 = vsel %vm4570_vm0, %v3557_v60, %v2586_v61  ;;  %v2490_v26 = vsel %vm4570_vm0, %v3550_v15, %v2489_v16  ;;  %v2491_v27 = vrot.slane %v2489_v16, 4  ;;  %v1030_v61 = vld [vmem:[#allocation4 + $0x30] sm:$0xff]  ;;  %v1028_v2 = vld [vmem:[#allocation4 + $0x20] sm:$0xff]  ;;  %v1029_v16 = vld [vmem:[#allocation4 + $0x28] sm:$0xff] }
  0xea   : > { %3864 = vmatmul.mubr.msk.bf16.gmra.mxu1 %vm1112_vm10, %v3599_v48  ;;  %v2499_v28 = vrot.slane %v2417_v10, 5  ;;  %v2590_v29 = vsel %vm4570_vm0, %v2588_v8, %v2589_v9  ;;  %v2498_v30 = vrot.slane %v2496_v20, 4  ;;  %v3558_v31 = vrot.slane %v2519_v12, 9  ;;  %v1031_v8 = vld [vmem:[#allocation4 + $0x38] sm:$0xff] }
  0xeb   : > { %3844 = vmatmul.mubr.msk.bf16.gmra.mxu0 %vm1112_vm10, %v3573_v6  ;;  %3867 = vmatprep.mubr.msk.bf16.mxu1 %vm1112_vm10, %v3600_v18  ;;  %v2593_v32 = vrot.slane %v2520_v17, 5  ;;  %v2493_v34 = vsel %vm4570_vm0, %v2491_v27, %v2492_v44  ;;  %v2497_v11 = vsel %vm4570_vm0, %v3551_v19, %v2496_v20  ;;  %v2596_v35 = vrot.slane %v2521_v22, 5  ;;  %v1034_v22 = vld [vmem:[#allocation4 + $0x50] sm:$0xff] }
  0xec   : > { %v2600_v1 = vrot.slane %v2523_v23, 5  ;;  %v3574_v36 = vcombine.low %v2490_v26, %v2493_v34  ;;  %v2500_v7 = vsel %vm4570_vm0, %v2498_v30, %v2499_v28  ;;  %v3601_v39 = vcombine.low %v2587_v25, %v2590_v29  ;;  %v1032_v29 = vld [vmem:[#allocation4 + $0x40] sm:$0xff] }
  0xed   : > { %v2594_v37 = vsel %vm4570_vm0, %v3558_v31, %v2593_v32  ;;  %v2595_v38 = vrot.slane %v2593_v32, 4  ;;  %v3559_v40 = vrot.slane %v2522_v33, 9  ;;  %v3575_v41 = vcombine.low %v2497_v11, %v2500_v7  ;;  %v1035_v11 = vld [vmem:[#allocation4 + $0x58] sm:$0xff] }
  0xee   : > { %3847 = vmatprep.mubr.msk.bf16.mxu0 %vm1112_vm10, %v3574_v36  ;;  %v2602_v43 = vrot.slane %v2600_v1, 4  ;;  %v2603_v45 = vrot.slane %v2524_v21, 5 }
  0xef   : > { %v2597_v42 = vsel %vm4570_vm0, %v2595_v38, %v2596_v35  ;;  %v2601_v47 = vsel %vm4570_vm0, %v3559_v40, %v2600_v1 }
  0xf0   : > { %v3602_v46 = vcombine.low %v2594_v37, %v2597_v42  ;;  %v2604_v48 = vsel %vm4570_vm0, %v2602_v43, %v2603_v45  ;;  %v1033_v37 = vld [vmem:[#allocation4 + $0x48] sm:$0xff]  ;;  %v1038_v43 = vld [vmem:[#allocation4 + $0x70] sm:$0xff] }
  0xf1   : > { %v3603_v49 = vcombine.low %v2601_v47, %v2604_v48 }
  0xf2   : > { %3868 = vmatmul.mubr.msk.bf16.gmra.mxu1 %vm1112_vm10, %v3601_v39 }
  0xf3   : > { %3848 = vmatmul.mubr.msk.bf16.gmra.mxu0 %vm1112_vm10, %v3575_v41  ;;  %3871 = vmatprep.mubr.msk.bf16.mxu1 %vm1112_vm10, %v3602_v46 }
  0xfa   : > { %3872 = vmatmul.mubr.msk.bf16.gmra.mxu1 %vm1112_vm10, %v3603_v49 }
 0x14d   : > { %v3741_v51 = vpop.f32.mrf.mxu0 }
 0x14e   : > { %v1236_v24 = vadd.f32 %v3741_v51, %v1026_v50  ;;  %v1036_v50 = vld [vmem:[#allocation4 + $0x60] sm:$0xff] }
 0x14f   : > { %v1171_v53 = vpop.f32.mrf.mxu0  ;;  %v3765_v55 = vpop.f32.mrf.mxu1 }
 0x150   : > { %1252 = vst.msk [vmem:[#allocation4 + $0x10] sm:$0xff] %vm1112_vm10, %v1236_v24  ;;  %v1234_v56 = vadd.f32 %v1171_v53, %v1024_v52 }
 0x151   : > { %v3742_v57 = vpop.f32.mrf.mxu0  ;;  %v1412_v59 = vpop.f32.mrf.mxu1 }
 0x152   : > { %1250 = vst.msk [vmem:[#allocation4] sm:$0xff] %vm1112_vm10, %v1234_v56  ;;  %v1237_v13 = vadd.f32 %v3742_v57, %v1027_v54 }
 0x153   : > { %v1174_v60 = vpop.f32.mrf.mxu0  ;;  %v3766_v62 = vpop.f32.mrf.mxu1 }
 0x154   : > { %1253 = vst.msk [vmem:[#allocation4 + $0x18] sm:$0xff] %vm1112_vm10, %v1237_v13  ;;  %v1235_v63 = vadd.f32 %v1174_v60, %v1025_v58  ;;  %v1037_v60 = vld [vmem:[#allocation4 + $0x68] sm:$0xff] }
 0x155   : > { %v3745_v0 = vpop.f32.mrf.mxu0  ;;  %v1415_v3 = vpop.f32.mrf.mxu1 }
 0x156   : > { %1251 = vst.msk [vmem:[#allocation4 + $0x8] sm:$0xff] %vm1112_vm10, %v1235_v63  ;;  %v1240_v4 = vadd.f32 %v3745_v0, %v1030_v61 }
 0x157   : > { %v1268_v5 = vld [vmem:[#allocation4 + $0x10] sm:$0xff]  ;;  %v1187_v6 = vpop.f32.mrf.mxu0  ;;  %v3769_v9 = vpop.f32.mrf.mxu1 }
 0x158   : > { %v1477_v10 = vadd.f32 %v3765_v55, %v1268_v5  ;;  %1256 = vst.msk [vmem:[#allocation4 + $0x30] sm:$0xff] %vm1112_vm10, %v1240_v4  ;;  %v1238_v12 = vadd.f32 %v1187_v6, %v1028_v2  ;;  %v1039_v55 = vld [vmem:[#allocation4 + $0x78] sm:$0xff] }
 0x159   : > { %v1266_v14 = vld [vmem:[#allocation4] sm:$0xff]  ;;  %v3746_v15 = vpop.f32.mrf.mxu0  ;;  %v1428_v44 = vpop.f32.mrf.mxu1 }
 0x15a   : > { %1493 = vst.msk [vmem:[#allocation4 + $0x10] sm:$0xff] %vm1112_vm10, %v1477_v10  ;;  %v1475_v17 = vadd.f32 %v1412_v59, %v1266_v14  ;;  %1254 = vst.msk [vmem:[#allocation4 + $0x20] sm:$0xff] %vm1112_vm10, %v1238_v12  ;;  %v1241_v18 = vadd.f32 %v3746_v15, %v1031_v8 }
 0x15b   : > { %v1269_v19 = vld [vmem:[#allocation4 + $0x18] sm:$0xff]  ;;  %v1190_v20 = vpop.f32.mrf.mxu0  ;;  %v3770_v23 = vpop.f32.mrf.mxu1 }
 0x15c   : > { %1491 = vst.msk [vmem:[#allocation4] sm:$0xff] %vm1112_vm10, %v1475_v17  ;;  %v1478_v25 = vadd.f32 %v3766_v62, %v1269_v19  ;;  %1257 = vst.msk [vmem:[#allocation4 + $0x38] sm:$0xff] %vm1112_vm10, %v1241_v18  ;;  %v1239_v26 = vadd.f32 %v1190_v20, %v1029_v16 }
 0x15d   : > { %v1267_v27 = vld [vmem:[#allocation4 + $0x8] sm:$0xff]  ;;  %v3749_v28 = vpop.f32.mrf.mxu0  ;;  %v1431_v30 = vpop.f32.mrf.mxu1 }
 0x15e   : > { %1494 = vst.msk [vmem:[#allocation4 + $0x18] sm:$0xff] %vm1112_vm10, %v1478_v25  ;;  %v1476_v31 = vadd.f32 %v1415_v3, %v1267_v27  ;;  %1255 = vst.msk [vmem:[#allocation4 + $0x28] sm:$0xff] %vm1112_vm10, %v1239_v26  ;;  %v1244_v32 = vadd.f32 %v3749_v28, %v1034_v22 }
 0x15f   : > { %v1272_v33 = vld [vmem:[#allocation4 + $0x30] sm:$0xff]  ;;  %v1203_v34 = vpop.f32.mrf.mxu0  ;;  %v3773_v35 = vpop.f32.mrf.mxu1 }
 0x160   : > { %1492 = vst.msk [vmem:[#allocation4 + $0x8] sm:$0xff] %vm1112_vm10, %v1476_v31  ;;  %v1481_v21 = vadd.f32 %v3769_v9, %v1272_v33  ;;  %1260 = vst.msk [vmem:[#allocation4 + $0x50] sm:$0xff] %vm1112_vm10, %v1244_v32  ;;  %v1242_v1 = vadd.f32 %v1203_v34, %v1032_v29 }
 0x161   : > { %v1270_v36 = vld [vmem:[#allocation4 + $0x20] sm:$0xff]  ;;  %v3750_v7 = vpop.f32.mrf.mxu0  ;;  %v1444_v38 = vpop.f32.mrf.mxu1  ;;  %v1944_v8 = vld [vmem:[#allocation4 + $0x10] sm:$0xff] }
 0x162   : > { %1497 = vst.msk [vmem:[#allocation4 + $0x30] sm:$0xff] %vm1112_vm10, %v1481_v21  ;;  %v1479_v39 = vadd.f32 %v1428_v44, %v1270_v36  ;;  %1258 = vst.msk [vmem:[#allocation4 + $0x40] sm:$0xff] %vm1112_vm10, %v1242_v1  ;;  %v1245_v40 = vadd.f32 %v3750_v7, %v1035_v11 }
 0x163   : > { %v1273_v41 = vld [vmem:[#allocation4 + $0x38] sm:$0xff]  ;;  %v1206_v42 = vpop.f32.mrf.mxu0  ;;  %v3774_v45 = vpop.f32.mrf.mxu1  ;;  %v1942_v15 = vld [vmem:[#allocation4] sm:$0xff] }
 0x164   : > { %1495 = vst.msk [vmem:[#allocation4 + $0x20] sm:$0xff] %vm1112_vm10, %v1479_v39  ;;  %v1482_v46 = vadd.f32 %v3770_v23, %v1273_v41  ;;  %1261 = vst.msk [vmem:[#allocation4 + $0x58] sm:$0xff] %vm1112_vm10, %v1245_v40  ;;  %v1243_v47 = vadd.f32 %v1206_v42, %v1033_v37 }
 0x165   : > { %v1271_v48 = vld [vmem:[#allocation4 + $0x28] sm:$0xff]  ;;  %v3753_v49 = vpop.f32.mrf.mxu0  ;;  %v1447_v51 = vpop.f32.mrf.mxu1  ;;  %v1945_v20 = vld [vmem:[#allocation4 + $0x18] sm:$0xff] }
 0x166   : > { %1498 = vst.msk [vmem:[#allocation4 + $0x38] sm:$0xff] %vm1112_vm10, %v1482_v46  ;;  %v1480_v52 = vadd.f32 %v1431_v30, %v1271_v48  ;;  %1259 = vst.msk [vmem:[#allocation4 + $0x48] sm:$0xff] %vm1112_vm10, %v1243_v47  ;;  %v1248_v24 = vadd.f32 %v3753_v49, %v1038_v43 }
 0x167   : > { %v1276_v53 = vld [vmem:[#allocation4 + $0x50] sm:$0xff]  ;;  %v1219_v54 = vpop.f32.mrf.mxu0  ;;  %v3777_v56 = vpop.f32.mrf.mxu1  ;;  %v1943_v27 = vld [vmem:[#allocation4 + $0x8] sm:$0xff] }
 0x168   : > { %1496 = vst.msk [vmem:[#allocation4 + $0x28] sm:$0xff] %vm1112_vm10, %v1480_v52  ;;  %v1485_v57 = vadd.f32 %v3773_v35, %v1276_v53  ;;  %1264 = vst.msk [vmem:[#allocation4 + $0x70] sm:$0xff] %vm1112_vm10, %v1248_v24  ;;  %v1246_v58 = vadd.f32 %v1219_v54, %v1036_v50 }
 0x169   : > { %v1274_v59 = vld [vmem:[#allocation4 + $0x40] sm:$0xff]  ;;  %v3754_v13 = vpop.f32.mrf.mxu0  ;;  %v1460_v61 = vpop.f32.mrf.mxu1 }
 0x16a   : > { %1501 = vst.msk [vmem:[#allocation4 + $0x50] sm:$0xff] %vm1112_vm10, %v1485_v57  ;;  %v1483_v62 = vadd.f32 %v1444_v38, %v1274_v59  ;;  %1262 = vst.msk [vmem:[#allocation4 + $0x60] sm:$0xff] %vm1112_vm10, %v1246_v58  ;;  %v1249_v63 = vadd.f32 %v3754_v13, %v1039_v55  ;;  %v1948_v38 = vld [vmem:[#allocation4 + $0x30] sm:$0xff] }
 0x16b   : > { %v1277_v0 = vld [vmem:[#allocation4 + $0x58] sm:$0xff]  ;;  %v1222_v2 = vpop.f32.mrf.mxu0  ;;  %v3778_v5 = vpop.f32.mrf.mxu1 }
 0x16c   : > { %1499 = vst.msk [vmem:[#allocation4 + $0x40] sm:$0xff] %vm1112_vm10, %v1483_v62  ;;  %v1486_v3 = vadd.f32 %v3774_v45, %v1277_v0  ;;  %1265 = vst.msk [vmem:[#allocation4 + $0x78] sm:$0xff] %vm1112_vm10, %v1249_v63  ;;  %v1247_v4 = vadd.f32 %v1222_v2, %v1037_v60  ;;  %v1946_v45 = vld [vmem:[#allocation4 + $0x20] sm:$0xff] }
 0x16d   : > { %v1275_v6 = vld [vmem:[#allocation4 + $0x48] sm:$0xff]  ;;  %v3789_v9 = vpop.f32.mrf.mxu0  ;;  %v1463_v18 = vpop.f32.mrf.mxu1  ;;  %v1949_v48 = vld [vmem:[#allocation4 + $0x38] sm:$0xff] }
 0x16e   : > { %1502 = vst.msk [vmem:[#allocation4 + $0x58] sm:$0xff] %vm1112_vm10, %v1486_v3  ;;  %v1484_v10 = vadd.f32 %v1447_v51, %v1275_v6  ;;  %1263 = vst.msk [vmem:[#allocation4 + $0x68] sm:$0xff] %vm1112_vm10, %v1247_v4  ;;  %v2138_v12 = vadd.f32 %v3789_v9, %v1944_v8 }
 0x16f   : > { %v1280_v14 = vld [vmem:[#allocation4 + $0x70] sm:$0xff]  ;;  %v2073_v16 = vpop.f32.mrf.mxu0  ;;  %v3813_v30 = vpop.f32.mrf.mxu1  ;;  %v1947_v51 = vld [vmem:[#allocation4 + $0x28] sm:$0xff] }
 0x170   : > { %1500 = vst.msk [vmem:[#allocation4 + $0x48] sm:$0xff] %vm1112_vm10, %v1484_v10  ;;  %v1489_v44 = vadd.f32 %v3777_v56, %v1280_v14  ;;  %2154 = vst.msk [vmem:[#allocation4 + $0x10] sm:$0xff] %vm1112_vm10, %v2138_v12  ;;  %v2136_v17 = vadd.f32 %v2073_v16, %v1942_v15 }
 0x171   : > { %v1278_v19 = vld [vmem:[#allocation4 + $0x60] sm:$0xff]  ;;  %v3790_v22 = vpop.f32.mrf.mxu0  ;;  %v2299_v34 = vpop.f32.mrf.mxu1  ;;  %v1952_v63 = vld [vmem:[#allocation4 + $0x50] sm:$0xff] }
 0x172   : > { %1505 = vst.msk [vmem:[#allocation4 + $0x70] sm:$0xff] %vm1112_vm10, %v1489_v44  ;;  %v1487_v23 = vadd.f32 %v1460_v61, %v1278_v19  ;;  %2152 = vst.msk [vmem:[#allocation4] sm:$0xff] %vm1112_vm10, %v2136_v17  ;;  %v2139_v25 = vadd.f32 %v3790_v22, %v1945_v20 }
 0x173   : > { %v1281_v26 = vld [vmem:[#allocation4 + $0x78] sm:$0xff]  ;;  %v2076_v28 = vpop.f32.mrf.mxu0  ;;  %v3814_v1 = vpop.f32.mrf.mxu1  ;;  %v1950_v4 = vld [vmem:[#allocation4 + $0x40] sm:$0xff] }
 0x174   : > { %1503 = vst.msk [vmem:[#allocation4 + $0x60] sm:$0xff] %vm1112_vm10, %v1487_v23  ;;  %v1490_v29 = vadd.f32 %v3778_v5, %v1281_v26  ;;  %2155 = vst.msk [vmem:[#allocation4 + $0x18] sm:$0xff] %vm1112_vm10, %v2139_v25  ;;  %v2137_v31 = vadd.f32 %v2076_v28, %v1943_v27 }
 0x175   : > { %v1279_v32 = vld [vmem:[#allocation4 + $0x68] sm:$0xff]  ;;  %v2302_v41 = vpop.f32.mrf.mxu1  ;;  %v1953_v8 = vld [vmem:[#allocation4 + $0x58] sm:$0xff] }
 0x176   : > { %1506 = vst.msk [vmem:[#allocation4 + $0x78] sm:$0xff] %vm1112_vm10, %v1490_v29  ;;  %v1488_v33 = vadd.f32 %v1463_v18, %v1279_v32  ;;  %2153 = vst.msk [vmem:[#allocation4 + $0x8] sm:$0xff] %vm1112_vm10, %v2137_v31 }
 0x177   : > { %v2170_v11 = vld [vmem:[#allocation4 + $0x10] sm:$0xff]  ;;  %v1951_v12 = vld [vmem:[#allocation4 + $0x48] sm:$0xff] }
 0x178   : > { %1504 = vst.msk [vmem:[#allocation4 + $0x68] sm:$0xff] %vm1112_vm10, %v1488_v33  ;;  %v2364_v35 = vadd.f32 %v3813_v30, %v2170_v11  ;;  %v3793_v39 = vpop.f32.mrf.mxu0 }
 0x179   : > { %v2168_v21 = vld [vmem:[#allocation4] sm:$0xff]  ;;  %v2142_v42 = vadd.f32 %v3793_v39, %v1948_v38  ;;  %v1956_v28 = vld [vmem:[#allocation4 + $0x70] sm:$0xff] }
 0x17a   : > { %2380 = vst.msk [vmem:[#allocation4 + $0x10] sm:$0xff] %vm1112_vm10, %v2364_v35  ;;  %v2362_v36 = vadd.f32 %v2299_v34, %v2168_v21  ;;  %v2089_v46 = vpop.f32.mrf.mxu0 }
 0x17b   : > { %v2171_v7 = vld [vmem:[#allocation4 + $0x18] sm:$0xff]  ;;  %2158 = vst.msk [vmem:[#allocation4 + $0x30] sm:$0xff] %vm1112_vm10, %v2142_v42  ;;  %v2140_v47 = vadd.f32 %v2089_v46, %v1946_v45  ;;  %v3817_v53 = vpop.f32.mrf.mxu1  ;;  %v1954_v32 = vld [vmem:[#allocation4 + $0x60] sm:$0xff] }
 0x17c   : > { %2378 = vst.msk [vmem:[#allocation4] sm:$0xff] %vm1112_vm10, %v2362_v36  ;;  %v2365_v37 = vadd.f32 %v3814_v1, %v2171_v7  ;;  %v3794_v49 = vpop.f32.mrf.mxu0 }
 0x17d   : > { %v2169_v40 = vld [vmem:[#allocation4 + $0x8] sm:$0xff]  ;;  %2156 = vst.msk [vmem:[#allocation4 + $0x20] sm:$0xff] %vm1112_vm10, %v2140_v47  ;;  %v2143_v50 = vadd.f32 %v3794_v49, %v1949_v48  ;;  %v2315_v55 = vpop.f32.mrf.mxu1  ;;  %v1957_v11 = vld [vmem:[#allocation4 + $0x78] sm:$0xff] }
 0x17e   : > { %2381 = vst.msk [vmem:[#allocation4 + $0x18] sm:$0xff] %vm1112_vm10, %v2365_v37  ;;  %v2363_v43 = vadd.f32 %v2302_v41, %v2169_v40  ;;  %v2092_v52 = vpop.f32.mrf.mxu0 }
 0x17f   : > { %2159 = vst.msk [vmem:[#allocation4 + $0x38] sm:$0xff] %vm1112_vm10, %v2143_v50  ;;  %v2141_v24 = vadd.f32 %v2092_v52, %v1947_v51  ;;  %v3818_v58 = vpop.f32.mrf.mxu1  ;;  %v1955_v1 = vld [vmem:[#allocation4 + $0x68] sm:$0xff] }
 0x180   : > { %2379 = vst.msk [vmem:[#allocation4 + $0x8] sm:$0xff] %vm1112_vm10, %v2363_v43 }
 0x181   : > { %2157 = vst.msk [vmem:[#allocation4 + $0x28] sm:$0xff] %vm1112_vm10, %v2141_v24  ;;  %v2318_v62 = vpop.f32.mrf.mxu1  ;;  %v2607_v38 = vld [vmem:[#allocation4 + $0x10] sm:$0xff] }
 0x182   : > { %v2174_v54 = vld [vmem:[#allocation4 + $0x30] sm:$0xff]  ;;  %v3797_v0 = vpop.f32.mrf.mxu0 }
 0x183   : > { %v2368_v56 = vadd.f32 %v3817_v53, %v2174_v54  ;;  %v2146_v3 = vadd.f32 %v3797_v0, %v1952_v63  ;;  %v2605_v45 = vld [vmem:[#allocation4] sm:$0xff] }
 0x184   : > { %v2172_v57 = vld [vmem:[#allocation4 + $0x20] sm:$0xff]  ;;  %v2105_v5 = vpop.f32.mrf.mxu0 }
 0x185   : > { %2384 = vst.msk [vmem:[#allocation4 + $0x30] sm:$0xff] %vm1112_vm10, %v2368_v56  ;;  %v2366_v59 = vadd.f32 %v2315_v55, %v2172_v57  ;;  %2162 = vst.msk [vmem:[#allocation4 + $0x50] sm:$0xff] %vm1112_vm10, %v2146_v3  ;;  %v2144_v6 = vadd.f32 %v2105_v5, %v1950_v4  ;;  %v2608_v51 = vld [vmem:[#allocation4 + $0x18] sm:$0xff] }
 0x186   : > { %v2175_v13 = vld [vmem:[#allocation4 + $0x38] sm:$0xff]  ;;  %v3798_v9 = vpop.f32.mrf.mxu0 }
 0x187   : > { %2382 = vst.msk [vmem:[#allocation4 + $0x20] sm:$0xff] %vm1112_vm10, %v2366_v59  ;;  %v2369_v60 = vadd.f32 %v3818_v58, %v2175_v13  ;;  %2160 = vst.msk [vmem:[#allocation4 + $0x40] sm:$0xff] %vm1112_vm10, %v2144_v6  ;;  %v2147_v10 = vadd.f32 %v3798_v9, %v1953_v8  ;;  %v2606_v56 = vld [vmem:[#allocation4 + $0x8] sm:$0xff] }
 0x188   : > { %v2173_v61 = vld [vmem:[#allocation4 + $0x28] sm:$0xff]  ;;  %v2108_v14 = vpop.f32.mrf.mxu0  ;;  %v3821_v15 = vpop.f32.mrf.mxu1 }
 0x189   : > { %2385 = vst.msk [vmem:[#allocation4 + $0x38] sm:$0xff] %vm1112_vm10, %v2369_v60  ;;  %v2367_v2 = vadd.f32 %v2318_v62, %v2173_v61  ;;  %2163 = vst.msk [vmem:[#allocation4 + $0x58] sm:$0xff] %vm1112_vm10, %v2147_v10  ;;  %v2145_v16 = vadd.f32 %v2108_v14, %v1951_v12 }
 0x18a   : > { %v2331_v44 = vpop.f32.mrf.mxu1 }
 0x18b   : > { %2383 = vst.msk [vmem:[#allocation4 + $0x28] sm:$0xff] %vm1112_vm10, %v2367_v2  ;;  %2161 = vst.msk [vmem:[#allocation4 + $0x48] sm:$0xff] %vm1112_vm10, %v2145_v16 }
 0x18c   : > { %v2178_v17 = vld [vmem:[#allocation4 + $0x50] sm:$0xff]  ;;  %v3822_v20 = vpop.f32.mrf.mxu1 }
 0x18d   : > { %v2372_v18 = vadd.f32 %v3821_v15, %v2178_v17  ;;  %v2611_v61 = vld [vmem:[#allocation4 + $0x30] sm:$0xff] }
 0x18e   : > { %v2176_v19 = vld [vmem:[#allocation4 + $0x40] sm:$0xff]  ;;  %v2334_v27 = vpop.f32.mrf.mxu1 }
 0x18f   : > { %2388 = vst.msk [vmem:[#allocation4 + $0x50] sm:$0xff] %vm1112_vm10, %v2372_v18  ;;  %v2370_v22 = vadd.f32 %v2331_v44, %v2176_v19  ;;  %v2609_v3 = vld [vmem:[#allocation4 + $0x20] sm:$0xff] }
 0x190   : > { %v2179_v23 = vld [vmem:[#allocation4 + $0x58] sm:$0xff] }
 0x191   : > { %2386 = vst.msk [vmem:[#allocation4 + $0x40] sm:$0xff] %vm1112_vm10, %v2370_v22  ;;  %v2373_v25 = vadd.f32 %v3822_v20, %v2179_v23  ;;  %v2612_v10 = vld [vmem:[#allocation4 + $0x38] sm:$0xff] }
 0x192   : > { %v2177_v26 = vld [vmem:[#allocation4 + $0x48] sm:$0xff]  ;;  %v3801_v29 = vpop.f32.mrf.mxu0 }
 0x193   : > { %2389 = vst.msk [vmem:[#allocation4 + $0x58] sm:$0xff] %vm1112_vm10, %v2373_v25  ;;  %v2371_v30 = vadd.f32 %v2334_v27, %v2177_v26  ;;  %v2150_v31 = vadd.f32 %v3801_v29, %v1956_v28  ;;  %v2610_v17 = vld [vmem:[#allocation4 + $0x28] sm:$0xff] }
 0x194   : > { %v2121_v33 = vpop.f32.mrf.mxu0 }
 0x195   : > { %2387 = vst.msk [vmem:[#allocation4 + $0x48] sm:$0xff] %vm1112_vm10, %v2371_v30  ;;  %2166 = vst.msk [vmem:[#allocation4 + $0x70] sm:$0xff] %vm1112_vm10, %v2150_v31  ;;  %v2148_v34 = vadd.f32 %v2121_v33, %v1954_v32 }
 0x196   : > { %v3802_v35 = vpop.f32.mrf.mxu0  ;;  %v2615_v25 = vld [vmem:[#allocation4 + $0x50] sm:$0xff] }
 0x197   : > { %2164 = vst.msk [vmem:[#allocation4 + $0x60] sm:$0xff] %vm1112_vm10, %v2148_v34  ;;  %v2151_v21 = vadd.f32 %v3802_v35, %v1957_v11 }
 0x198   : > { %v2124_v36 = vpop.f32.mrf.mxu0  ;;  %v2613_v31 = vld [vmem:[#allocation4 + $0x40] sm:$0xff] }
 0x199   : > { %2167 = vst.msk [vmem:[#allocation4 + $0x78] sm:$0xff] %vm1112_vm10, %v2151_v21  ;;  %v2149_v7 = vadd.f32 %v2124_v36, %v1955_v1 }
 0x19a   : > { %v3825_v37 = vpop.f32.mrf.mxu1  ;;  %v2616_v21 = vld [vmem:[#allocation4 + $0x58] sm:$0xff] }
 0x19b   : > { %2165 = vst.msk [vmem:[#allocation4 + $0x68] sm:$0xff] %vm1112_vm10, %v2149_v7  ;;  %v3837_v39 = vpop.f32.mrf.mxu0 }
 0x19c   : > { %v2182_v40 = vld [vmem:[#allocation4 + $0x70] sm:$0xff]  ;;  %v2347_v41 = vpop.f32.mrf.mxu1  ;;  %v2801_v42 = vadd.f32 %v3837_v39, %v2607_v38  ;;  %v2614_v39 = vld [vmem:[#allocation4 + $0x48] sm:$0xff] }
 0x19d   : > { %v2376_v43 = vadd.f32 %v3825_v37, %v2182_v40  ;;  %v2736_v46 = vpop.f32.mrf.mxu0 }
 0x19e   : > { %v2180_v47 = vld [vmem:[#allocation4 + $0x60] sm:$0xff]  ;;  %2817 = vst.msk [vmem:[#allocation4 + $0x10] sm:$0xff] %vm1112_vm10, %v2801_v42  ;;  %v3826_v48 = vpop.f32.mrf.mxu1  ;;  %v2799_v49 = vadd.f32 %v2736_v46, %v2605_v45 }
 0x19f   : > { %2392 = vst.msk [vmem:[#allocation4 + $0x70] sm:$0xff] %vm1112_vm10, %v2376_v43  ;;  %v2374_v50 = vadd.f32 %v2347_v41, %v2180_v47  ;;  %v3838_v52 = vpop.f32.mrf.mxu0 }
 0x1a0   : > { %v2183_v24 = vld [vmem:[#allocation4 + $0x78] sm:$0xff]  ;;  %2815 = vst.msk [vmem:[#allocation4] sm:$0xff] %vm1112_vm10, %v2799_v49  ;;  %v2350_v53 = vpop.f32.mrf.mxu1  ;;  %v2802_v54 = vadd.f32 %v3838_v52, %v2608_v51 }
 0x1a1   : > { %2390 = vst.msk [vmem:[#allocation4 + $0x60] sm:$0xff] %vm1112_vm10, %v2374_v50  ;;  %v2377_v55 = vadd.f32 %v3826_v48, %v2183_v24  ;;  %v2739_v57 = vpop.f32.mrf.mxu0 }
 0x1a2   : > { %v2181_v58 = vld [vmem:[#allocation4 + $0x68] sm:$0xff]  ;;  %2818 = vst.msk [vmem:[#allocation4 + $0x18] sm:$0xff] %vm1112_vm10, %v2802_v54  ;;  %v3861_v59 = vpop.f32.mrf.mxu1  ;;  %v2800_v13 = vadd.f32 %v2739_v57, %v2606_v56 }
 0x1a3   : > { %2393 = vst.msk [vmem:[#allocation4 + $0x78] sm:$0xff] %vm1112_vm10, %v2377_v55  ;;  %v2375_v60 = vadd.f32 %v2350_v53, %v2181_v58  ;;  %v3841_v62 = vpop.f32.mrf.mxu0 }
 0x1a4   : > { %2816 = vst.msk [vmem:[#allocation4 + $0x8] sm:$0xff] %vm1112_vm10, %v2800_v13  ;;  %v2962_v63 = vpop.f32.mrf.mxu1  ;;  %v2805_v0 = vadd.f32 %v3841_v62, %v2611_v61 }
 0x1a5   : > { %2391 = vst.msk [vmem:[#allocation4 + $0x68] sm:$0xff] %vm1112_vm10, %v2375_v60  ;;  %v2833_v2 = vld [vmem:[#allocation4 + $0x10] sm:$0xff]  ;;  %v2752_v4 = vpop.f32.mrf.mxu0 }
 0x1a6   : > { %v3027_v5 = vadd.f32 %v3861_v59, %v2833_v2  ;;  %2821 = vst.msk [vmem:[#allocation4 + $0x30] sm:$0xff] %vm1112_vm10, %v2805_v0  ;;  %v3862_v6 = vpop.f32.mrf.mxu1  ;;  %v2803_v8 = vadd.f32 %v2752_v4, %v2609_v3  ;;  %v2619_v46 = vld [vmem:[#allocation4 + $0x70] sm:$0xff] }
 0x1a7   : > { %v2831_v9 = vld [vmem:[#allocation4] sm:$0xff]  ;;  %v3842_v12 = vpop.f32.mrf.mxu0 }
 0x1a8   : > { %3043 = vst.msk [vmem:[#allocation4 + $0x10] sm:$0xff] %vm1112_vm10, %v3027_v5  ;;  %v3025_v14 = vadd.f32 %v2962_v63, %v2831_v9  ;;  %2819 = vst.msk [vmem:[#allocation4 + $0x20] sm:$0xff] %vm1112_vm10, %v2803_v8  ;;  %v2965_v15 = vpop.f32.mrf.mxu1  ;;  %v2806_v16 = vadd.f32 %v3842_v12, %v2612_v10  ;;  %v2617_v52 = vld [vmem:[#allocation4 + $0x60] sm:$0xff] }
 0x1a9   : > { %v2834_v44 = vld [vmem:[#allocation4 + $0x18] sm:$0xff]  ;;  %v2755_v18 = vpop.f32.mrf.mxu0 }
 0x1aa   : > { %3041 = vst.msk [vmem:[#allocation4] sm:$0xff] %vm1112_vm10, %v3025_v14  ;;  %v3028_v19 = vadd.f32 %v3862_v6, %v2834_v44  ;;  %2822 = vst.msk [vmem:[#allocation4 + $0x38] sm:$0xff] %vm1112_vm10, %v2806_v16  ;;  %v3865_v20 = vpop.f32.mrf.mxu1  ;;  %v2804_v22 = vadd.f32 %v2755_v18, %v2610_v17  ;;  %v2620_v57 = vld [vmem:[#allocation4 + $0x78] sm:$0xff] }
 0x1ab   : > { %v2832_v23 = vld [vmem:[#allocation4 + $0x8] sm:$0xff]  ;;  %v3845_v26 = vpop.f32.mrf.mxu0 }
 0x1ac   : > { %3044 = vst.msk [vmem:[#allocation4 + $0x18] sm:$0xff] %vm1112_vm10, %v3028_v19  ;;  %v3026_v27 = vadd.f32 %v2965_v15, %v2832_v23  ;;  %2820 = vst.msk [vmem:[#allocation4 + $0x28] sm:$0xff] %vm1112_vm10, %v2804_v22  ;;  %v2978_v28 = vpop.f32.mrf.mxu1  ;;  %v2809_v29 = vadd.f32 %v3845_v26, %v2615_v25  ;;  %v2618_v62 = vld [vmem:[#allocation4 + $0x68] sm:$0xff] }
 0x1ad   : > { %v2837_v30 = vld [vmem:[#allocation4 + $0x30] sm:$0xff]  ;;  %v2768_v32 = vpop.f32.mrf.mxu0 }
 0x1ae   : > { %3042 = vst.msk [vmem:[#allocation4 + $0x8] sm:$0xff] %vm1112_vm10, %v3026_v27  ;;  %v3031_v33 = vadd.f32 %v3865_v20, %v2837_v30  ;;  %2825 = vst.msk [vmem:[#allocation4 + $0x50] sm:$0xff] %vm1112_vm10, %v2809_v29  ;;  %v3866_v34 = vpop.f32.mrf.mxu1  ;;  %v2807_v11 = vadd.f32 %v2768_v32, %v2613_v31 }
 0x1af   : > { %v2835_v35 = vld [vmem:[#allocation4 + $0x20] sm:$0xff]  ;;  %v3846_v1 = vpop.f32.mrf.mxu0 }
 0x1b0   : > { %3047 = vst.msk [vmem:[#allocation4 + $0x30] sm:$0xff] %vm1112_vm10, %v3031_v33  ;;  %v3029_v36 = vadd.f32 %v2978_v28, %v2835_v35  ;;  %2823 = vst.msk [vmem:[#allocation4 + $0x40] sm:$0xff] %vm1112_vm10, %v2807_v11  ;;  %v2981_v7 = vpop.f32.mrf.mxu1  ;;  %v2810_v37 = vadd.f32 %v3846_v1, %v2616_v21 }
 0x1b1   : > { %v2838_v38 = vld [vmem:[#allocation4 + $0x38] sm:$0xff]  ;;  %v2771_v40 = vpop.f32.mrf.mxu0 }
 0x1b2   : > { %3045 = vst.msk [vmem:[#allocation4 + $0x20] sm:$0xff] %vm1112_vm10, %v3029_v36  ;;  %v3032_v41 = vadd.f32 %v3866_v34, %v2838_v38  ;;  %2826 = vst.msk [vmem:[#allocation4 + $0x58] sm:$0xff] %vm1112_vm10, %v2810_v37  ;;  %v3869_v42 = vpop.f32.mrf.mxu1  ;;  %v2808_v43 = vadd.f32 %v2771_v40, %v2614_v39 }
 0x1b3   : > { %v2836_v45 = vld [vmem:[#allocation4 + $0x28] sm:$0xff]  ;;  %v3849_v47 = vpop.f32.mrf.mxu0 }
 0x1b4   : > { %3048 = vst.msk [vmem:[#allocation4 + $0x38] sm:$0xff] %vm1112_vm10, %v3032_v41  ;;  %v3030_v48 = vadd.f32 %v2981_v7, %v2836_v45  ;;  %2824 = vst.msk [vmem:[#allocation4 + $0x48] sm:$0xff] %vm1112_vm10, %v2808_v43  ;;  %v2994_v49 = vpop.f32.mrf.mxu1  ;;  %v2813_v50 = vadd.f32 %v3849_v47, %v2619_v46 }
 0x1b5   : > { %v2841_v51 = vld [vmem:[#allocation4 + $0x50] sm:$0xff]  ;;  %v2784_v24 = vpop.f32.mrf.mxu0 }
 0x1b6   : > { %3046 = vst.msk [vmem:[#allocation4 + $0x28] sm:$0xff] %vm1112_vm10, %v3030_v48  ;;  %v3035_v53 = vadd.f32 %v3869_v42, %v2841_v51  ;;  %2829 = vst.msk [vmem:[#allocation4 + $0x70] sm:$0xff] %vm1112_vm10, %v2813_v50  ;;  %v3870_v54 = vpop.f32.mrf.mxu1  ;;  %v2811_v55 = vadd.f32 %v2784_v24, %v2617_v52 }
 0x1b7   : > { %v2839_v56 = vld [vmem:[#allocation4 + $0x40] sm:$0xff]  ;;  %v3850_v58 = vpop.f32.mrf.mxu0 }
 0x1b8   : > { %3051 = vst.msk [vmem:[#allocation4 + $0x50] sm:$0xff] %vm1112_vm10, %v3035_v53  ;;  %v3033_v59 = vadd.f32 %v2994_v49, %v2839_v56  ;;  %2827 = vst.msk [vmem:[#allocation4 + $0x60] sm:$0xff] %vm1112_vm10, %v2811_v55  ;;  %v2997_v13 = vpop.f32.mrf.mxu1  ;;  %v2814_v60 = vadd.f32 %v3850_v58, %v2620_v57 }
 0x1b9   : > { %v2842_v61 = vld [vmem:[#allocation4 + $0x58] sm:$0xff]  ;;  %v2787_v63 = vpop.f32.mrf.mxu0 }
 0x1ba   : > { %3049 = vst.msk [vmem:[#allocation4 + $0x40] sm:$0xff] %vm1112_vm10, %v3033_v59  ;;  %v3036_v0 = vadd.f32 %v3870_v54, %v2842_v61  ;;  %2830 = vst.msk [vmem:[#allocation4 + $0x78] sm:$0xff] %vm1112_vm10, %v2814_v60  ;;  %v3873_v2 = vpop.f32.mrf.mxu1  ;;  %v2812_v3 = vadd.f32 %v2787_v63, %v2618_v62 }
 0x1bb   : > { %v2840_v4 = vld [vmem:[#allocation4 + $0x48] sm:$0xff] }
 0x1bc   : > { %3052 = vst.msk [vmem:[#allocation4 + $0x58] sm:$0xff] %vm1112_vm10, %v3036_v0  ;;  %v3034_v5 = vadd.f32 %v2997_v13, %v2840_v4  ;;  %2828 = vst.msk [vmem:[#allocation4 + $0x68] sm:$0xff] %vm1112_vm10, %v2812_v3  ;;  %v3010_v6 = vpop.f32.mrf.mxu1 }
 0x1bd   : > { %v2845_v8 = vld [vmem:[#allocation4 + $0x70] sm:$0xff] }
 0x1be   : > { %3050 = vst.msk [vmem:[#allocation4 + $0x48] sm:$0xff] %vm1112_vm10, %v3034_v5  ;;  %v3039_v9 = vadd.f32 %v3873_v2, %v2845_v8  ;;  %v3874_v12 = vpop.f32.mrf.mxu1 }
 0x1bf   : > { %v2843_v10 = vld [vmem:[#allocation4 + $0x60] sm:$0xff] }
 0x1c0   : > { %3055 = vst.msk [vmem:[#allocation4 + $0x70] sm:$0xff] %vm1112_vm10, %v3039_v9  ;;  %v3037_v14 = vadd.f32 %v3010_v6, %v2843_v10  ;;  %v3013_v17 = vpop.f32.mrf.mxu1 }
 0x1c1   : > { %v2846_v15 = vld [vmem:[#allocation4 + $0x78] sm:$0xff] }
 0x1c2   : > { %3053 = vst.msk [vmem:[#allocation4 + $0x60] sm:$0xff] %vm1112_vm10, %v3037_v14  ;;  %v3040_v16 = vadd.f32 %v3874_v12, %v2846_v15  ;;  %3060 = sbr.rel (%p3616_p8) target bundleno = 505 (0x1f9), region = 48 }
 0x1c3   : > { %v2844_v44 = vld [vmem:[#allocation4 + $0x68] sm:$0xff] }
 0x1c4   : > { %3056 = vst.msk [vmem:[#allocation4 + $0x78] sm:$0xff] %vm1112_vm10, %v3040_v16  ;;  %v3038_v18 = vadd.f32 %v3013_v17, %v2844_v44 }
 0x1c6   : > { %3054 = vst.msk [vmem:[#allocation4 + $0x68] sm:$0xff] %vm1112_vm10, %v3038_v18 }
 0x1c7   : > { %v3061_v19 = vld [vmem:[#allocation4] sm:$0xff]  ;;  %v4806_v20 = vld [vmem:[%s4917_s4] ss:$0 sm:$0xff]  ;;  %v3062_v22 = vld [vmem:[#allocation4 + $0x8] sm:$0xff]  ;;  %vm3164_vm1 = vcmask 519168   ;;  %vm3218_vm2 = vcmask 516096  }
 0x1c8   : > { %v3084_v23 = vadd.f32 %v4806_v20, %v3061_v19  ;;  %v3085_v25 = vadd.f32 %v4806_v20, %v3062_v22  ;;  %v3063_v26 = vld [vmem:[#allocation4 + $0x10] sm:$0xff]  ;;  %v3064_v27 = vld [vmem:[#allocation4 + $0x18] sm:$0xff]  ;;  %v3065_v28 = vld [vmem:[#allocation4 + $0x20] sm:$0xff] }
 0x1c9   : > { %v3086_v29 = vadd.f32 %v4806_v20, %v3063_v26  ;;  %v3087_v30 = vadd.f32 %v4806_v20, %v3064_v27  ;;  %v3088_v31 = vadd.f32 %v4806_v20, %v3065_v28  ;;  %v3066_v40 = vld [vmem:[#allocation4 + $0x28] sm:$0xff]  ;;  %v3067_v41 = vld [vmem:[#allocation4 + $0x30] sm:$0xff]  ;;  %v3068_v47 = vld [vmem:[#allocation4 + $0x38] sm:$0xff] }
 0x1ca   : > { %v3643_v32 = vpack.c.bf16 %v3084_v23, %v3084_v23  ;;  %v3181_v33 = vsel %vm1112_vm10, %v3084_v23, 0.0  ;;  %v3220_v34 = vmul.f32 %v3084_v23, %v3084_v23  ;;  %v3644_v11 = vpack.c.bf16 %v3085_v25, %v3085_v25  ;;  %v3069_v48 = vld [vmem:[#allocation4 + $0x40] sm:$0xff]  ;;  %v3070_v3 = vld [vmem:[#allocation4 + $0x48] sm:$0xff]  ;;  %v3071_v9 = vld [vmem:[#allocation4 + $0x50] sm:$0xff] }
 0x1cb   : > { %v3182_v35 = vsel %vm1112_vm10, %v3085_v25, 0.0  ;;  %v3221_v21 = vmul.f32 %v3085_v25, %v3085_v25  ;;  %v3645_v1 = vpack.c.bf16 %v3086_v29, %v3086_v29  ;;  %v3184_v36 = vsel %vm1112_vm10, %v3086_v29, 0.0  ;;  %v3072_v25 = vld [vmem:[#allocation4 + $0x58] sm:$0xff]  ;;  %v3073_v26 = vld [vmem:[#allocation4 + $0x60] sm:$0xff] }
 0x1cc   : > { %3165 = vst.msk [vmem:[%s4092_s21] sm:$0xf] %vm3164_vm1, %v3643_v32  ;;  %v3236_v7 = vsel %vm1112_vm10, %v3220_v34, 0.0  ;;  %3166 = vst.msk [vmem:[%s4092_s21 + $0x4] sm:$0xf] %vm3164_vm1, %v3644_v11  ;;  %v3183_v37 = vadd.f32 %v3182_v35, %v3181_v33  ;;  %v3222_v38 = vmul.f32 %v3086_v29, %v3086_v29  ;;  %v3646_v39 = vpack.c.bf16 %v3087_v30, %v3087_v30 }
 0x1cd   : > { %v3237_v42 = vsel %vm1112_vm10, %v3221_v21, 0.0  ;;  %3167 = vst.msk [vmem:[%s4092_s21 + $0x8] sm:$0xf] %vm3164_vm1, %v3645_v1  ;;  %v3186_v43 = vsel %vm1112_vm10, %v3087_v30, 0.0  ;;  %v3223_v45 = vmul.f32 %v3087_v30, %v3087_v30  ;;  %v3647_v46 = vpack.c.bf16 %v3088_v31, %v3088_v31  ;;  %v3074_v11 = vld [vmem:[#allocation4 + $0x68] sm:$0xff] }
 0x1ce   : > { %v3238_v49 = vadd.f32 %v3237_v42, %v3236_v7  ;;  %v3185_v50 = vadd.f32 %v3184_v36, %v3183_v37  ;;  %v3239_v51 = vsel %vm1112_vm10, %v3222_v38, 0.0  ;;  %3168 = vst.msk [vmem:[%s4092_s21 + $0xc] sm:$0xf] %vm3164_vm1, %v3646_v39  ;;  %v3188_v52 = vsel %vm1112_vm10, %v3088_v31, 0.0  ;;  %v3075_v7 = vld [vmem:[#allocation4 + $0x70] sm:$0xff] }
 0x1cf   : > { %v3241_v24 = vsel %vm1112_vm10, %v3223_v45, 0.0  ;;  %3169 = vst.msk [vmem:[%s4092_s21 + $0x10] sm:$0xf] %vm3164_vm1, %v3647_v46  ;;  %v3224_v53 = vmul.f32 %v3088_v31, %v3088_v31  ;;  %v3089_v54 = vadd.f32 %v4806_v20, %v3066_v40  ;;  %v3090_v55 = vadd.f32 %v4806_v20, %v3067_v41 }
 0x1d0   : > { %v3240_v56 = vadd.f32 %v3239_v51, %v3238_v49  ;;  %v3187_v57 = vadd.f32 %v3186_v43, %v3185_v50  ;;  %v3091_v58 = vadd.f32 %v4806_v20, %v3068_v47  ;;  %v3092_v59 = vadd.f32 %v4806_v20, %v3069_v48  ;;  %v3076_v49 = vld [vmem:[#allocation4 + $0x78] sm:$0xff] }
 0x1d1   : > { %v3243_v13 = vsel %vm1112_vm10, %v3224_v53, 0.0  ;;  %v3648_v60 = vpack.c.bf16 %v3089_v54, %v3089_v54  ;;  %v3190_v61 = vsel %vm1112_vm10, %v3089_v54, 0.0  ;;  %v3225_v62 = vmul.f32 %v3089_v54, %v3089_v54 }
 0x1d2   : > { %v3242_v63 = vadd.f32 %v3241_v24, %v3240_v56  ;;  %v3189_v0 = vadd.f32 %v3188_v52, %v3187_v57  ;;  %v3649_v2 = vpack.c.bf16 %v3090_v55, %v3090_v55  ;;  %v3192_v5 = vsel %vm1112_vm10, %v3090_v55, 0.0 }
 0x1d3   : > { %3170 = vst.msk [vmem:[%s4092_s21 + $0x14] sm:$0xf] %vm3164_vm1, %v3648_v60  ;;  %v3245_v4 = vsel %vm1112_vm10, %v3225_v62, 0.0  ;;  %v3226_v6 = vmul.f32 %v3090_v55, %v3090_v55  ;;  %v3650_v8 = vpack.c.bf16 %v3091_v58, %v3091_v58  ;;  %v3227_v14 = vmul.f32 %v3091_v58, %v3091_v58 }
 0x1d4   : > { %v3244_v10 = vadd.f32 %v3243_v13, %v3242_v63  ;;  %v3191_v12 = vadd.f32 %v3190_v61, %v3189_v0  ;;  %3171 = vst.msk [vmem:[%s4092_s21 + $0x18] sm:$0xf] %vm3164_vm1, %v3649_v2  ;;  %v3651_v15 = vpack.c.bf16 %v3092_v59, %v3092_v59  ;;  %v3194_v44 = vsel %vm1112_vm10, %v3091_v58, 0.0 }
 0x1d5   : > { %v3247_v16 = vsel %vm1112_vm10, %v3226_v6, 0.0  ;;  %3172 = vst.msk [vmem:[%s4092_s21 + $0x1c] sm:$0xf] %vm3164_vm1, %v3650_v8  ;;  %v3228_v17 = vmul.f32 %v3092_v59, %v3092_v59  ;;  %v3093_v18 = vadd.f32 %v4806_v20, %v3070_v3  ;;  %v3094_v23 = vadd.f32 %v4806_v20, %v3071_v9 }
 0x1d6   : > { %v3246_v19 = vadd.f32 %v3245_v4, %v3244_v10  ;;  %v3193_v22 = vadd.f32 %v3192_v5, %v3191_v12  ;;  %3173 = vst.msk [vmem:[%s4092_s21 + $0x20] sm:$0xf] %vm3164_vm1, %v3651_v15  ;;  %v3249_v27 = vsel %vm1112_vm10, %v3227_v14, 0.0  ;;  %v3196_v28 = vsel %vm1112_vm10, %v3092_v59, 0.0 }
 0x1d7   : > { %v3652_v29 = vpack.c.bf16 %v3093_v18, %v3093_v18  ;;  %v3229_v30 = vmul.f32 %v3093_v18, %v3093_v18  ;;  %v3251_v33 = vsel %vm1112_vm10, %v3228_v17, 0.0  ;;  %v3653_v34 = vpack.c.bf16 %v3094_v23, %v3094_v23 }
 0x1d8   : > { %v3248_v31 = vadd.f32 %v3247_v16, %v3246_v19  ;;  %v3195_v32 = vadd.f32 %v3194_v44, %v3193_v22  ;;  %v3198_v35 = vsel %vm1112_vm10, %v3093_v18, 0.0  ;;  %v3230_v21 = vmul.f32 %v3094_v23, %v3094_v23 }
 0x1d9   : > { %3174 = vst.msk [vmem:[%s4092_s21 + $0x24] sm:$0xf] %vm3164_vm1, %v3652_v29  ;;  %v3095_v1 = vadd.f32 %v4806_v20, %v3072_v25  ;;  %v3096_v36 = vadd.f32 %v4806_v20, %v3073_v26  ;;  %3175 = vst.msk [vmem:[%s4092_s21 + $0x28] sm:$0xf] %vm3164_vm1, %v3653_v34  ;;  %v3200_v39 = vsel %vm1112_vm10, %v3094_v23, 0.0  ;;  %v3253_v40 = vsel %vm1112_vm10, %v3229_v30, 0.0 }
 0x1da   : > { %v3250_v37 = vadd.f32 %v3249_v27, %v3248_v31  ;;  %v3197_v38 = vadd.f32 %v3196_v28, %v3195_v32  ;;  %v3097_v43 = vadd.f32 %v4806_v20, %v3074_v11  ;;  %v3098_v48 = vadd.f32 %v4806_v20, %v3075_v7 }
 0x1db   : > { %v3654_v41 = vpack.c.bf16 %v3095_v1, %v3095_v1  ;;  %v3231_v42 = vmul.f32 %v3095_v1, %v3095_v1  ;;  %v3655_v47 = vpack.c.bf16 %v3096_v36, %v3096_v36  ;;  %v3255_v50 = vsel %vm1112_vm10, %v3230_v21, 0.0 }
 0x1dc   : > { %v3252_v45 = vadd.f32 %v3251_v33, %v3250_v37  ;;  %v3199_v46 = vadd.f32 %v3198_v35, %v3197_v38  ;;  %v3202_v51 = vsel %vm1112_vm10, %v3095_v1, 0.0  ;;  %v3232_v52 = vmul.f32 %v3096_v36, %v3096_v36 }
 0x1dd   : > { %3176 = vst.msk [vmem:[%s4092_s21 + $0x2c] sm:$0xf] %vm3164_vm1, %v3654_v41  ;;  %v3656_v24 = vpack.c.bf16 %v3097_v43, %v3097_v43  ;;  %3177 = vst.msk [vmem:[%s4092_s21 + $0x30] sm:$0xf] %vm3164_vm1, %v3655_v47  ;;  %v3657_v55 = vpack.c.bf16 %v3098_v48, %v3098_v48  ;;  %v3257_v56 = vsel %vm1112_vm10, %v3231_v42, 0.0  ;;  %v3204_v57 = vsel %vm1112_vm10, %v3096_v36, 0.0 }
 0x1de   : > { %v3254_v53 = vadd.f32 %v3253_v40, %v3252_v45  ;;  %v3201_v54 = vadd.f32 %v3200_v39, %v3199_v46  ;;  %v3233_v58 = vmul.f32 %v3097_v43, %v3097_v43  ;;  %v3099_v59 = vadd.f32 %v4806_v20, %v3076_v49 }
 0x1df   : > { %3178 = vst.msk [vmem:[%s4092_s21 + $0x34] sm:$0xf] %vm3164_vm1, %v3656_v24  ;;  %3179 = vst.msk [vmem:[%s4092_s21 + $0x38] sm:$0xf] %vm3164_vm1, %v3657_v55  ;;  %v3259_v61 = vsel %vm1112_vm10, %v3232_v52, 0.0  ;;  %v3206_v62 = vsel %vm1112_vm10, %v3097_v43, 0.0  ;;  %v3234_v63 = vmul.f32 %v3098_v48, %v3098_v48 }
 0x1e0   : > { %v3256_v13 = vadd.f32 %v3255_v50, %v3254_v53  ;;  %v3203_v60 = vadd.f32 %v3202_v51, %v3201_v54  ;;  %v3658_v0 = vpack.c.bf16 %v3099_v59, %v3099_v59  ;;  %v3261_v4 = vsel %vm1112_vm10, %v3233_v58, 0.0 }
 0x1e1   : > { %v3208_v5 = vsel %vm1112_vm10, %v3098_v48, 0.0  ;;  %v3235_v6 = vmul.f32 %v3099_v59, %v3099_v59  ;;  %v3210_v9 = vsel %vm1112_vm10, %v3099_v59, 0.0  ;;  %v3263_v10 = vsel %vm1112_vm10, %v3234_v63, 0.0 }
 0x1e2   : > { %v3258_v2 = vadd.f32 %v3257_v56, %v3256_v13  ;;  %v3205_v3 = vadd.f32 %v3204_v57, %v3203_v60  ;;  %3180 = vst.msk [vmem:[%s4092_s21 + $0x3c] sm:$0xf] %vm3164_vm1, %v3658_v0 }
 0x1e3   : > { %v3265_v15 = vsel %vm1112_vm10, %v3235_v6, 0.0 }
 0x1e4   : > { %v3260_v20 = vadd.f32 %v3259_v61, %v3258_v2  ;;  %v3207_v8 = vadd.f32 %v3206_v62, %v3205_v3 }
 0x1e6   : > { %v3209_v12 = vadd.f32 %v3208_v5, %v3207_v8  ;;  %v3262_v14 = vadd.f32 %v3261_v4, %v3260_v20 }
 0x1e8   : > { %v3211_v16 = vadd.f32 %v3210_v9, %v3209_v12  ;;  %v3264_v44 = vadd.f32 %v3263_v10, %v3262_v14 }
 0x1ea   : > { %v3212_v17 = vrot.slane %v3211_v16, 4  ;;  %v3266_v18 = vadd.f32 %v3265_v15, %v3264_v44 }
 0x1ec   : > { %v3213_v19 = vadd.f32 %v3212_v17, %v3211_v16  ;;  %v3267_v22 = vrot.slane %v3266_v18, 4 }
 0x1ee   : > { %v3214_v23 = vrot.slane %v3213_v19, 2  ;;  %v3268_v25 = vadd.f32 %v3267_v22, %v3266_v18 }
 0x1f0   : > { %v3215_v26 = vadd.f32 %v3214_v23, %v3213_v19  ;;  %v3269_v27 = vrot.slane %v3268_v25, 2 }
 0x1f2   : > { %v3216_v28 = vrot.slane %v3215_v26, 1  ;;  %v3270_v29 = vadd.f32 %v3269_v27, %v3268_v25 }
 0x1f4   : > { %v3217_v30 = vadd.f32 %v3216_v28, %v3215_v26  ;;  %v3271_v31 = vrot.slane %v3270_v29, 1 }
 0x1f6   : > { %3219 = vst.msk [vmem:[%s4935_s19] sm:$0x1] %vm3218_vm2, %v3217_v30  ;;  %v3272_v32 = vadd.f32 %v3271_v31, %v3270_v29 }
 0x1f8   : > { %3273 = vst.msk [vmem:[%s377_s10] sm:$0x1] %vm3218_vm2, %v3272_v32 }
 0x1f9 PF: > { %s18_s28 = sadd.s32 1, %s3995_s28   ;;  %s4936_s24 = smov %s3987_s26 }
 0x1fa   : > { %p15_p9 = scmp.ge.s32.totalorder %s18_s28, 8   ;;  %s4937_s25 = smov %s3991_s27 }
 0x1fb   : > { %s4938_s26 = smov %s4941_s29  ;;  %s4939_s27 = smov %s4945_s30 }
 0x1fc   :  { %17 = sbr.rel (!%p15_p9) target bundleno = 3 (0x3), region = 121 }

</bundles_post_ra>
